<compile_context>
chip_gen: v7x
topology: tpu7x:2x2x1
jax: 0.10.0
libtpu: 0.0.40
codegen_flags: <defaults>
</compile_context>

<pallas_src>
import functools

import jax
import jax.numpy as jnp
from jax.experimental import pallas as pl
from jax.experimental.pallas import tpu as pltpu

_EPS = 1e-5            # nn.InstanceNorm2d default
_NEG_SLOPE = 0.01      # nn.LeakyReLU default
_NEG = float(jnp.finfo(jnp.float32).min)   # maxpool padding value (never selected)
_LANE = 128


def _convblock_kernel(x_ref, w_ref, b_ref, o_ref, *scratch, downsample, use_im2col):
    # x_ref   : (1, H, W, Cin)        f32   one image per grid step (NHWC)
    # w_ref   : (9*Cin, CP)           bf16  rows ordered (dy, dx, cin); CP = Cout padded to 128
    # b_ref   : (1, CP)               f32
    # o_ref   : (1, Ho, Wo, Cout)     f32   exact channels -- no CP padding written to HBM
    # scratch : pad_ref (H+3, W+2, Cin)            bf16   zero-padded activations
    #           [imc_ref (H*(W+2), 9*Cin) bf16]    only when use_im2col (Cin < 32)
    #           [pool_ref (H+2, W+2, CP) f32]      only when downsample
    if use_im2col:
        pad_ref, imc_ref = scratch[0], scratch[1]
        rest = scratch[2:]
    else:
        pad_ref, imc_ref = scratch[0], None
        rest = scratch[1:]
    pool_ref = rest[0] if downsample else None

    _, H, W, Cin = x_ref.shape
    CP = w_ref.shape[1]
    Cout = o_ref.shape[3]
    Wp = W + 2
    M1 = H * Wp          # conv is computed on an (H, W+2) grid; last 2 cols per row discarded

    # ---- InstanceNorm2d (affine=False, biased variance, eps=1e-5), two-pass stats (f32) ----
    x = x_ref[0]                                                   # (H, W, Cin)
    mean = jnp.mean(x, axis=(0, 1), keepdims=True)                 # per image, per channel
    var = jnp.mean((x - mean) * (x - mean), axis=(0, 1), keepdims=True)
    xn = (x - mean) * jax.lax.rsqrt(var + _EPS)

    # ---- LeakyReLU(0.01), then cast to bf16 ONCE (matmul operand precision) ----
    xa = jnp.where(xn >= 0, xn, _NEG_SLOPE * xn).astype(jnp.bfloat16)

    # ---- zero-padded activation buffer: halo-only fill + interior store (bf16 scratch) ----
    pad_ref[0:1, :, :] = jnp.zeros((1, Wp, Cin), jnp.bfloat16)             # top halo row
    pad_ref[H + 1:H + 3, :, :] = jnp.zeros((2, Wp, Cin), jnp.bfloat16)     # bottom halo + spill row
    pad_ref[1:H + 1, 0:1, :] = jnp.zeros((H, 1, Cin), jnp.bfloat16)        # left halo col
    pad_ref[1:H + 1, W + 1:W + 2, :] = jnp.zeros((H, 1, Cin), jnp.bfloat16)  # right halo col
    pad_ref[1:H + 1, 1:W + 1, :] = xa                                       # interior

    # Row-major flattened padded buffer: tap (dy, dx) for output position p = y*(W+2)+x is
    # F[p + dy*(W+2) + dx, :] -> pure offset slices, no per-tap 2-D reshapes.
    F = pad_ref[...].reshape((H + 3) * Wp, Cin)

    # ---- Conv2d 3x3, padding=1, on the MXU ----
    if use_im2col:
        # Small Cin: build one bf16 im2col matrix and do a single K = 9*Cin matmul.
        for k in range(9):
            dy, dx = divmod(k, 3)
            off = dy * Wp + dx
            imc_ref[:, k * Cin:(k + 1) * Cin] = F[off:off + M1, :]
        acc = jnp.dot(imc_ref[...], w_ref[...], preferred_element_type=jnp.float32)
    else:
        # Cin >= 32: no materialized im2col -- 9 accumulating tap dots (f32 accumulation).
        acc = jnp.zeros((M1, CP), jnp.float32)
        for k in range(9):
            dy, dx = divmod(k, 3)
            off = dy * Wp + dx
            acc = acc + jnp.dot(F[off:off + M1, :], w_ref[k * Cin:(k + 1) * Cin, :],
                                preferred_element_type=jnp.float32)

    acc = acc + b_ref[...]                                          # (M1, CP) f32
    y = acc.reshape(H, Wp, CP)                                      # cols [0, W) are valid

    if not downsample:
        o_ref[0] = y[:, :W, :Cout].astype(o_ref.dtype)              # exact channels to HBM
        return

    # ---- MaxPool2d(kernel=3, stride=2, padding=1): separable 3-tap max + even-index picks ----
    # TODO(synk): odd spatial sizes (supported by PyTorch MaxPool2d(3,2,1)) are not handled.
    Ho, Wo = o_ref.shape[1], o_ref.shape[2]                         # = H//2, W//2 (even H, W)
    neg_row = jnp.full((1, Wp, CP), _NEG, jnp.float32)
    neg_col = jnp.full((H, 1, CP), _NEG, jnp.float32)
    pool_ref[0:1, :, :] = neg_row                                   # halo-only -inf fill
    pool_ref[H + 1:H + 2, :, :] = neg_row
    pool_ref[1:H + 1, 0:1, :] = neg_col
    pool_ref[1:H + 1, W + 1:W + 2, :] = neg_col
    pool_ref[1:H + 1, 1:W + 1, :] = y[:, :W, :]                     # stage matmul result

    # height direction: 3-tap max of shifted row slabs, then keep even start rows
    hm = jnp.maximum(jnp.maximum(pool_ref[0:H, :, :], pool_ref[1:H + 1, :, :]),
                     pool_ref[2:H + 2, :, :])                       # (H, W+2, CP)
    hm = hm.reshape(Ho, 2, Wp, CP)[:, 0]                            # (Ho, W+2, CP)
    # width direction: 3-tap max of shifted column slices, then keep even start cols
    wm = jnp.maximum(jnp.maximum(hm[:, 0:W], hm[:, 1:W + 1]), hm[:, 2:W + 2])
    out = wm.reshape(Ho, Wo, 2, CP)[:, :, 0]                        # (Ho, Wo, CP)
    o_ref[0] = out[:, :, :Cout].astype(o_ref.dtype)                 # exact channels to HBM


def conv_block(x_nchw, weight_oihw, bias, *, downsample=False):
    """x: (N, Cin, H, W); weight: (Cout, Cin, 3, 3); bias: (Cout,). Returns NCHW."""
    N, Cin, H, W = x_nchw.shape
    Cout = weight_oihw.shape[0]
    CP = ((Cout + _LANE - 1) // _LANE) * _LANE            # lane-dense padded Cout (weights/MXU only)
    if downsample:
        assert H % 2 == 0 and W % 2 == 0, "downsample path assumes even H, W"
        Ho, Wo = H // 2, W // 2
    else:
        Ho, Wo = H, W

    use_im2col = Cin < 32            # tiny K: one im2col matmul; otherwise 9 accumulating dots

    x = jnp.transpose(x_nchw, (0, 2, 3, 1)).astype(jnp.float32)             # NHWC
    w = jnp.transpose(weight_oihw, (2, 3, 1, 0)).reshape(9 * Cin, Cout)     # rows = (dy, dx, cin)
    w = jnp.pad(w, ((0, 0), (0, CP - Cout))).astype(jnp.bfloat16)           # pad Cout -> 128, bf16
    b = jnp.pad(bias.astype(jnp.float32), (0, CP - Cout)).reshape(1, CP)

    kernel = functools.partial(_convblock_kernel, downsample=downsample, use_im2col=use_im2col)

    scratch = [pltpu.VMEM((H + 3, W + 2, Cin), jnp.bfloat16)]                # padded activations
    if use_im2col:
        scratch.append(pltpu.VMEM((H * (W + 2), 9 * Cin), jnp.bfloat16))     # im2col tap matrix
    if downsample:
        scratch.append(pltpu.VMEM((H + 2, W + 2, CP), jnp.float32))          # -inf padded pool buf

    flops = N * (2 * H * (W + 2) * 9 * Cin * CP + 12 * H * W * Cin)
    bytes_accessed = (N * H * W * Cin * 4) + (9 * Cin * CP * 2) + (CP * 4) + (N * Ho * Wo * Cout * 4)

    out_nhwc = pl.pallas_call(
        kernel,
        out_shape=jax.ShapeDtypeStruct((N, Ho, Wo, Cout), jnp.float32),
        grid_spec=pltpu.PrefetchScalarGridSpec(
            num_scalar_prefetch=0,
            grid=(N,),                                     # one image per step -> pipelined DMA
            in_specs=[
                pl.BlockSpec((1, H, W, Cin), lambda n: (n, 0, 0, 0)),
                pl.BlockSpec((9 * Cin, CP), lambda n: (0, 0)),   # weights stay VMEM-resident
                pl.BlockSpec((1, CP), lambda n: (0, 0)),
            ],
            out_specs=pl.BlockSpec((1, Ho, Wo, Cout), lambda n: (n, 0, 0, 0)),
            scratch_shapes=scratch,
        ),
        compiler_params=pltpu.CompilerParams(
            dimension_semantics=("parallel",),             # megacore-shardable batch axis
            vmem_limit_bytes=48 * 1024 * 1024,             # within v7x's 64 MiB physical VMEM
        ),
        cost_estimate=pl.CostEstimate(
            flops=flops, transcendentals=N * Cin, bytes_accessed=bytes_accessed),
    )(x, w, b)

    return jnp.transpose(out_nhwc, (0, 3, 1, 2))           # exact-size relayout back to NCHW


def _reference(x, w, b, downsample):
    """Pure-JAX reference mirroring the PyTorch forward (NCHW, f32)."""
    mean = x.mean(axis=(2, 3), keepdims=True)
    var = ((x - mean) ** 2).mean(axis=(2, 3), keepdims=True)
    xn = (x - mean) / jnp.sqrt(var + _EPS)
    xa = jnp.where(xn >= 0, xn, _NEG_SLOPE * xn)
    y = jax.lax.conv_general_dilated(
        xa, w, window_strides=(1, 1), padding=((1, 1), (1, 1)),
        dimension_numbers=("NCHW", "OIHW", "NCHW"),
        precision=jax.lax.Precision.HIGHEST)
    y = y + b[None, :, None, None]
    if downsample:
        y = jax.lax.reduce_window(
            y, -jnp.inf, jax.lax.max,
            window_dimensions=(1, 1, 3, 3), window_strides=(1, 1, 2, 2),
            padding=((0, 0), (0, 0), (1, 1), (1, 1)))
    return y


if __name__ == "__main__":
    key = jax.random.PRNGKey(0)

    # (N, Cin, Cout, H, W, tol):
    #   cfg 1 -> im2col path (Cin < 32), Cout << 128 (exact-channel HBM output)
    #   cfg 2 -> direct 9-tap accumulating-dot path (Cin >= 32), lane-dense Cout = 128
    configs = [
        (2, 4, 8, 16, 16, 2e-2),
        (2, 32, 128, 16, 16, 5e-2),   # larger K in bf16 -> slightly looser tolerance
    ]

    for (N, Cin, Cout, H, W, tol) in configs:
        key, kx, kw, kb = jax.random.split(key, 4)
        x = jax.random.normal(kx, (N, Cin, H, W), jnp.float32)
        weight = 0.1 * jax.random.normal(kw, (Cout, Cin, 3, 3), jnp.float32)
        bias = 0.1 * jax.random.normal(kb, (Cout,), jnp.float32)

        for downsample in (False, True):
            out = jax.block_until_ready(conv_block(x, weight, bias, downsample=downsample))
            ref = _reference(x, weight, bias, downsample)
            assert out.shape == ref.shape, (out.shape, ref.shape)
            max_err = float(jnp.max(jnp.abs(out - ref)))
            # bf16 MXU operands (f32 accumulation) vs f32 reference.
            assert max_err < tol, (
                f"mismatch (Cin={Cin}, Cout={Cout}, downsample={downsample}): {max_err}")

    print("KERNEL_OK")
</pallas_src>

<mosaic_0001>
module attributes {stable_mosaic.version = 11 : i64} {
  func.func @_convblock_kernel(%arg0: i32, %arg1: memref<1x16x16x4xf32, #tpu.memory_space<vmem>>, %arg2: memref<36x128xbf16, #tpu.memory_space<vmem>>, %arg3: memref<1x128xf32, #tpu.memory_space<vmem>>, %arg4: memref<1x16x16x8xf32, #tpu.memory_space<vmem>>, %arg5: memref<19x18x4xbf16, #tpu.memory_space<vmem>>, %arg6: memref<288x36xbf16, #tpu.memory_space<vmem>>) attributes {dimension_semantics = [#tpu.dimension_semantics<parallel>], iteration_bounds = array<i64: 2>, scalar_prefetch = 0 : i64, scratch_operands = 2 : i64, tpu.core_type = #tpu.core_type<tc>, window_params = [{transform_indices = @transform_0, window_bounds = array<i64: 1, 16, 16, 4>}, {pipeline_mode = #tpu.pipeline_mode<synchronous>, transform_indices = @transform_1, window_bounds = array<i64: 36, 128>}, {pipeline_mode = #tpu.pipeline_mode<synchronous>, transform_indices = @transform_2, window_bounds = array<i64: 1, 128>}, {transform_indices = @transform_3, window_bounds = array<i64: 1, 16, 16, 8>}]} {
    %c0 = arith.constant 0 : index
    %c0_0 = arith.constant 0 : index
    %c0_1 = arith.constant 0 : index
    %c0_2 = arith.constant 0 : index
    %0 = vector.load %arg1[%c0, %c0_0, %c0_1, %c0_2] : memref<1x16x16x4xf32, #tpu.memory_space<vmem>>, vector<1x16x16x4xf32>
    %1 = vector.shape_cast %0 : vector<1x16x16x4xf32> to vector<16x16x4xf32>
    %cst = arith.constant dense<0.000000e+00> : vector<4xf32>
    %2 = vector.multi_reduction <add>, %1, %cst [0, 1] : vector<16x16x4xf32> to vector<4xf32>
    %3 = vector.shape_cast %2 : vector<4xf32> to vector<1x1x4xf32>
    %cst_3 = arith.constant 2.560000e+02 : f32
    %4 = vector.broadcast %cst_3 : f32 to vector<1x1x4xf32>
    %5 = arith.divf %3, %4 : vector<1x1x4xf32>
    %6 = vector.broadcast %5 : vector<1x1x4xf32> to vector<16x16x4xf32>
    %7 = arith.subf %1, %6 : vector<16x16x4xf32>
    %8 = vector.broadcast %5 : vector<1x1x4xf32> to vector<16x16x4xf32>
    %9 = arith.subf %1, %8 : vector<16x16x4xf32>
    %10 = arith.mulf %7, %9 : vector<16x16x4xf32>
    %cst_4 = arith.constant dense<0.000000e+00> : vector<4xf32>
    %11 = vector.multi_reduction <add>, %10, %cst_4 [0, 1] : vector<16x16x4xf32> to vector<4xf32>
    %12 = vector.shape_cast %11 : vector<4xf32> to vector<1x1x4xf32>
    %cst_5 = arith.constant 2.560000e+02 : f32
    %13 = vector.broadcast %cst_5 : f32 to vector<1x1x4xf32>
    %14 = arith.divf %12, %13 : vector<1x1x4xf32>
    %15 = vector.broadcast %5 : vector<1x1x4xf32> to vector<16x16x4xf32>
    %16 = arith.subf %1, %15 : vector<16x16x4xf32>
    %cst_6 = arith.constant 9.99999974E-6 : f32
    %17 = vector.broadcast %cst_6 : f32 to vector<1x1x4xf32>
    %18 = arith.addf %14, %17 : vector<1x1x4xf32>
    %19 = math.rsqrt %18 : vector<1x1x4xf32>
    %20 = vector.broadcast %19 : vector<1x1x4xf32> to vector<16x16x4xf32>
    %21 = arith.mulf %16, %20 : vector<16x16x4xf32>
    %cst_7 = arith.constant 0.000000e+00 : f32
    %22 = vector.broadcast %cst_7 : f32 to vector<16x16x4xf32>
    %23 = arith.cmpf oge, %21, %22 : vector<16x16x4xf32>
    %cst_8 = arith.constant 0.00999999977 : f32
    %24 = vector.broadcast %cst_8 : f32 to vector<16x16x4xf32>
    %25 = arith.mulf %24, %21 : vector<16x16x4xf32>
    %26 = arith.select %23, %21, %25 : vector<16x16x4xi1>, vector<16x16x4xf32>
    %27 = arith.truncf %26 : vector<16x16x4xf32> to vector<16x16x4xbf16>
    %cst_9 = arith.constant 0.000000e+00 : bf16
    %28 = vector.broadcast %cst_9 : bf16 to vector<1x18x4xbf16>
    %c0_10 = arith.constant 0 : index
    %c0_11 = arith.constant 0 : index
    %c0_12 = arith.constant 0 : index
    %29 = vector.load %arg5[%c0_10, %c0_11, %c0_12] : memref<19x18x4xbf16, #tpu.memory_space<vmem>>, vector<1x18x4xbf16>
    tpu.vector_store %arg5[%c0_10, %c0_11, %c0_12], %28 {strides = array<i32>} : memref<19x18x4xbf16, #tpu.memory_space<vmem>>, vector<1x18x4xbf16>,
    %cst_13 = arith.constant 0.000000e+00 : bf16
    %30 = vector.broadcast %cst_13 : bf16 to vector<2x18x4xbf16>
    %c17 = arith.constant 17 : index
    %c0_14 = arith.constant 0 : index
    %c0_15 = arith.constant 0 : index
    %31 = vector.load %arg5[%c17, %c0_14, %c0_15] : memref<19x18x4xbf16, #tpu.memory_space<vmem>>, vector<2x18x4xbf16>
    tpu.vector_store %arg5[%c17, %c0_14, %c0_15], %30 {strides = array<i32>} : memref<19x18x4xbf16, #tpu.memory_space<vmem>>, vector<2x18x4xbf16>,
    %cst_16 = arith.constant 0.000000e+00 : bf16
    %32 = vector.broadcast %cst_16 : bf16 to vector<16x1x4xbf16>
    %c1 = arith.constant 1 : index
    %c0_17 = arith.constant 0 : index
    %c0_18 = arith.constant 0 : index
    %33 = vector.load %arg5[%c1, %c0_17, %c0_18] : memref<19x18x4xbf16, #tpu.memory_space<vmem>>, vector<16x1x4xbf16>
    tpu.vector_store %arg5[%c1, %c0_17, %c0_18], %32 {strides = array<i32>} : memref<19x18x4xbf16, #tpu.memory_space<vmem>>, vector<16x1x4xbf16>,
    %cst_19 = arith.constant 0.000000e+00 : bf16
    %34 = vector.broadcast %cst_19 : bf16 to vector<16x1x4xbf16>
    %c1_20 = arith.constant 1 : index
    %c17_21 = arith.constant 17 : index
    %c0_22 = arith.constant 0 : index
    %35 = vector.load %arg5[%c1_20, %c17_21, %c0_22] : memref<19x18x4xbf16, #tpu.memory_space<vmem>>, vector<16x1x4xbf16>
    tpu.vector_store %arg5[%c1_20, %c17_21, %c0_22], %34 {strides = array<i32>} : memref<19x18x4xbf16, #tpu.memory_space<vmem>>, vector<16x1x4xbf16>,
    %c1_23 = arith.constant 1 : index
    %c1_24 = arith.constant 1 : index
    %c0_25 = arith.constant 0 : index
    %36 = vector.load %arg5[%c1_23, %c1_24, %c0_25] : memref<19x18x4xbf16, #tpu.memory_space<vmem>>, vector<16x16x4xbf16>
    tpu.vector_store %arg5[%c1_23, %c1_24, %c0_25], %27 {strides = array<i32>} : memref<19x18x4xbf16, #tpu.memory_space<vmem>>, vector<16x16x4xbf16>,
    %c0_26 = arith.constant 0 : index
    %c0_27 = arith.constant 0 : index
    %c0_28 = arith.constant 0 : index
    %37 = vector.load %arg5[%c0_26, %c0_27, %c0_28] : memref<19x18x4xbf16, #tpu.memory_space<vmem>>, vector<19x18x4xbf16>
    %38 = vector.shape_cast %37 : vector<19x18x4xbf16> to vector<342x4xbf16>
    %39 = vector.extract_strided_slice %38 {offsets = [0, 0], sizes = [288, 4], strides = [1, 1]} : vector<342x4xbf16> to vector<288x4xbf16>
    %c0_29 = arith.constant 0 : index
    %c0_30 = arith.constant 0 : index
    %40 = vector.load %arg6[%c0_29, %c0_30] : memref<288x36xbf16, #tpu.memory_space<vmem>>, vector<288x4xbf16>
    tpu.vector_store %arg6[%c0_29, %c0_30], %39 {strides = array<i32>} : memref<288x36xbf16, #tpu.memory_space<vmem>>, vector<288x4xbf16>,
    %41 = vector.extract_strided_slice %38 {offsets = [1, 0], sizes = [288, 4], strides = [1, 1]} : vector<342x4xbf16> to vector<288x4xbf16>
    %c0_31 = arith.constant 0 : index
    %c4 = arith.constant 4 : index
    %42 = vector.load %arg6[%c0_31, %c4] : memref<288x36xbf16, #tpu.memory_space<vmem>>, vector<288x4xbf16>
    tpu.vector_store %arg6[%c0_31, %c4], %41 {strides = array<i32>} : memref<288x36xbf16, #tpu.memory_space<vmem>>, vector<288x4xbf16>,
    %43 = vector.extract_strided_slice %38 {offsets = [2, 0], sizes = [288, 4], strides = [1, 1]} : vector<342x4xbf16> to vector<288x4xbf16>
    %c0_32 = arith.constant 0 : index
    %c8 = arith.constant 8 : index
    %44 = vector.load %arg6[%c0_32, %c8] : memref<288x36xbf16, #tpu.memory_space<vmem>>, vector<288x4xbf16>
    tpu.vector_store %arg6[%c0_32, %c8], %43 {strides = array<i32>} : memref<288x36xbf16, #tpu.memory_space<vmem>>, vector<288x4xbf16>,
    %45 = vector.extract_strided_slice %38 {offsets = [18, 0], sizes = [288, 4], strides = [1, 1]} : vector<342x4xbf16> to vector<288x4xbf16>
    %c0_33 = arith.constant 0 : index
    %c12 = arith.constant 12 : index
    %46 = vector.load %arg6[%c0_33, %c12] : memref<288x36xbf16, #tpu.memory_space<vmem>>, vector<288x4xbf16>
    tpu.vector_store %arg6[%c0_33, %c12], %45 {strides = array<i32>} : memref<288x36xbf16, #tpu.memory_space<vmem>>, vector<288x4xbf16>,
    %47 = vector.extract_strided_slice %38 {offsets = [19, 0], sizes = [288, 4], strides = [1, 1]} : vector<342x4xbf16> to vector<288x4xbf16>
    %c0_34 = arith.constant 0 : index
    %c16 = arith.constant 16 : index
    %48 = vector.load %arg6[%c0_34, %c16] : memref<288x36xbf16, #tpu.memory_space<vmem>>, vector<288x4xbf16>
    tpu.vector_store %arg6[%c0_34, %c16], %47 {strides = array<i32>} : memref<288x36xbf16, #tpu.memory_space<vmem>>, vector<288x4xbf16>,
    %49 = vector.extract_strided_slice %38 {offsets = [20, 0], sizes = [288, 4], strides = [1, 1]} : vector<342x4xbf16> to vector<288x4xbf16>
    %c0_35 = arith.constant 0 : index
    %c20 = arith.constant 20 : index
    %50 = vector.load %arg6[%c0_35, %c20] : memref<288x36xbf16, #tpu.memory_space<vmem>>, vector<288x4xbf16>
    tpu.vector_store %arg6[%c0_35, %c20], %49 {strides = array<i32>} : memref<288x36xbf16, #tpu.memory_space<vmem>>, vector<288x4xbf16>,
    %51 = vector.extract_strided_slice %38 {offsets = [36, 0], sizes = [288, 4], strides = [1, 1]} : vector<342x4xbf16> to vector<288x4xbf16>
    %c0_36 = arith.constant 0 : index
    %c24 = arith.constant 24 : index
    %52 = vector.load %arg6[%c0_36, %c24] : memref<288x36xbf16, #tpu.memory_space<vmem>>, vector<288x4xbf16>
    tpu.vector_store %arg6[%c0_36, %c24], %51 {strides = array<i32>} : memref<288x36xbf16, #tpu.memory_space<vmem>>, vector<288x4xbf16>,
    %53 = vector.extract_strided_slice %38 {offsets = [37, 0], sizes = [288, 4], strides = [1, 1]} : vector<342x4xbf16> to vector<288x4xbf16>
    %c0_37 = arith.constant 0 : index
    %c28 = arith.constant 28 : index
    %54 = vector.load %arg6[%c0_37, %c28] : memref<288x36xbf16, #tpu.memory_space<vmem>>, vector<288x4xbf16>
    tpu.vector_store %arg6[%c0_37, %c28], %53 {strides = array<i32>} : memref<288x36xbf16, #tpu.memory_space<vmem>>, vector<288x4xbf16>,
    %55 = vector.extract_strided_slice %38 {offsets = [38, 0], sizes = [288, 4], strides = [1, 1]} : vector<342x4xbf16> to vector<288x4xbf16>
    %c0_38 = arith.constant 0 : index
    %c32 = arith.constant 32 : index
    %56 = vector.load %arg6[%c0_38, %c32] : memref<288x36xbf16, #tpu.memory_space<vmem>>, vector<288x4xbf16>
    tpu.vector_store %arg6[%c0_38, %c32], %55 {strides = array<i32>} : memref<288x36xbf16, #tpu.memory_space<vmem>>, vector<288x4xbf16>,
    %c0_39 = arith.constant 0 : index
    %c0_40 = arith.constant 0 : index
    %57 = vector.load %arg6[%c0_39, %c0_40] : memref<288x36xbf16, #tpu.memory_space<vmem>>, vector<288x36xbf16>
    %c0_41 = arith.constant 0 : index
    %c0_42 = arith.constant 0 : index
    %58 = vector.load %arg2[%c0_41, %c0_42] : memref<36x128xbf16, #tpu.memory_space<vmem>>, vector<36x128xbf16>
    %cst_43 = arith.constant dense<0.000000e+00> : vector<288x128xf32>
    %59 = tpu.matmul %57, %58, %cst_43 {dimension_numbers = #tpu.dot_dimension_numbers<[1], [0], [0], [1], [0, 0, 1, 1], [], []>} : vector<288x36xbf16>, vector<36x128xbf16>, vector<288x128xf32> -> vector<288x128xf32>
    %c0_44 = arith.constant 0 : index
    %c0_45 = arith.constant 0 : index
    %60 = vector.load %arg3[%c0_44, %c0_45] : memref<1x128xf32, #tpu.memory_space<vmem>>, vector<1x128xf32>
    %61 = vector.broadcast %60 : vector<1x128xf32> to vector<288x128xf32>
    %62 = arith.addf %59, %61 : vector<288x128xf32>
    %63 = vector.shape_cast %62 : vector<288x128xf32> to vector<16x18x128xf32>
    %64 = vector.extract_strided_slice %63 {offsets = [0, 0, 0], sizes = [16, 16, 8], strides = [1, 1, 1]} : vector<16x18x128xf32> to vector<16x16x8xf32>
    %c0_46 = arith.constant 0 : index
    %c0_47 = arith.constant 0 : index
    %c0_48 = arith.constant 0 : index
    %c0_49 = arith.constant 0 : index
    %65 = vector.load %arg4[%c0_46, %c0_47, %c0_48, %c0_49] : memref<1x16x16x8xf32, #tpu.memory_space<vmem>>, vector<1x16x16x8xf32>
    %66 = vector.shape_cast %65 : vector<1x16x16x8xf32> to vector<16x16x8xf32>
    %67 = vector.shape_cast %64 : vector<16x16x8xf32> to vector<1x16x16x8xf32>
    tpu.vector_store %arg4[%c0_46, %c0_47, %c0_48, %c0_49], %67 {strides = array<i32>} : memref<1x16x16x8xf32, #tpu.memory_space<vmem>>, vector<1x16x16x8xf32>,
    return
  }
  func.func @transform_0(%arg0: i32) -> (i32, i32, i32, i32) {
    %c0_i32 = arith.constant 0 : i32
    %c0_i32_0 = arith.constant 0 : i32
    %c0_i32_1 = arith.constant 0 : i32
    %c0_i32_2 = arith.constant 0 : i32
    return %arg0, %c0_i32, %c0_i32_0, %c0_i32_1 : i32, i32, i32, i32
  }
  func.func @transform_1(%arg0: i32) -> (i32, i32) {
    %c0_i32 = arith.constant 0 : i32
    %c0_i32_0 = arith.constant 0 : i32
    %c0_i32_1 = arith.constant 0 : i32
    return %c0_i32, %c0_i32_0 : i32, i32
  }
  func.func @transform_2(%arg0: i32) -> (i32, i32) {
    %c0_i32 = arith.constant 0 : i32
    %c0_i32_0 = arith.constant 0 : i32
    %c0_i32_1 = arith.constant 0 : i32
    return %c0_i32, %c0_i32_0 : i32, i32
  }
  func.func @transform_3(%arg0: i32) -> (i32, i32, i32, i32) {
    %c0_i32 = arith.constant 0 : i32
    %c0_i32_0 = arith.constant 0 : i32
    %c0_i32_1 = arith.constant 0 : i32
    %c0_i32_2 = arith.constant 0 : i32
    return %arg0, %c0_i32, %c0_i32_0, %c0_i32_1 : i32, i32, i32, i32
  }
}

</mosaic_0001>

<bundles_post_ra>
// kernel: tpu_custom_call.1
= control target key start
LH: loop header
LB: loop body
LE: loop exit
PB: predicated region body
PF: predicated region fallthrough
CT: control target
= control target key end

     0   :  { %s7996_s12 = smov 0   ;;  %s11714_s0 = inlined_call_operand.vmem [shape: f32[2,16,16,4], index: 0, kind: input, shape index: {}]   ;;  %s11715_s1 = inlined_call_operand.vmem [shape: bf16[36,128], index: 1, kind: input, shape index: {}]   ;;  %s11716_s2 = inlined_call_operand.vmem [shape: f32[1,128], index: 2, kind: input, shape index: {}]   ;;  %s11717_s3 = inlined_call_operand.vmem [shape: f32[2,16,16,8], index: 3, kind: output, shape index: {}]  }
   0x1 LB: > { %s7672_s13 = sadd.s32 4294967295, %s7963_s12   ;;  %p7676_p0 = scmp.ge.s32.totalorder %s7963_s12, 1  ;;  %s7963_s12 = sphi %s7996_s12, %s13_s12  }
   0x2   : > { %p137_p1 = scmp.lt.s32.totalorder %s7963_s12, 3 }
   0x4   : > { %p138_p2 = pnand %p7676_p0, %p137_p1 }
   0x6   : > { %141 = sbr.rel (%p138_p2) target bundleno = 1008 (0x3f0), region = 32 }
   0xd   : > { %vm556_vm0 = vcmask 27648   ;;  %vm559_vm1 = vcmask 24576   ;;  %vm570_vm2 = vsmask.f32 256  ;;  %v7965_v0 = vmov 0   ;;  %p161_p3 = scmp.lt.s32.totalorder %s7672_s13, 1 }
   0xe   : > { %557 = vst.msk [vmem:[#allocation2] sm:$0xf] %vm556_vm0, %v7965_v0  ;;  %558 = vst.msk [vmem:[#allocation2 + $0x4] sm:$0xf] %vm556_vm0, %v7965_v0  ;;  %v11924_v1 = vmov 0  ;;  %v1307_v3 = vlaneseq  ;;  %vm204_vm4 = vcmask 31744  }
   0xf   : > { %560 = vst.msk [vmem:[#allocation2 + $0x8] sm:$0x1] %vm559_vm1, %v7965_v0  ;;  %vm8009_vm3 = vmand %vm559_vm1, %vm570_vm2  ;;  %v572_v2 = vld [vmem:[#allocation2 + $0xc] sm:$0x1]  ;;  %v7966_v5 = vmov 1966171168  }
  0x10   : > { %v11925_v1 = vsel %vm8009_vm3, 4294967295, %v11924_v1  ;;  %562 = vst.msk [vmem:[#allocation2 + $0xcc] sm:$0xf] %vm556_vm0, %v7965_v0  ;;  %563 = vst.msk [vmem:[#allocation2 + $0xd0] sm:$0xf] %vm556_vm0, %v7965_v0  ;;  %v573_v4 = vsel %vm8009_vm3, 0, %v572_v2  ;;  %v1305_v6 = vunpack.c.l.s4 %v7966_v5 }
  0x11   : > { %11926 = vst [vmem:[#allocation4_spill] sm:$0xff] %v11925_v1  ;;  %564 = vst.msk [vmem:[#allocation2 + $0xd4] sm:$0x1] %vm559_vm1, %v7965_v0  ;;  %v8019_v7 = vshrl.u32 %v1307_v3, 7  ;;  %s12359_s13 = smov (!%p161_p3, %s7672_s13), 1  ;;  %s7967_s18 = smov 8  }
  0x12   : > { %565 = vst.msk [vmem:[#allocation2 + $0xd8] sm:$0xf] %vm556_vm0, %v7965_v0  ;;  %574 = vst [vmem:[#allocation2 + $0xc] sm:$0x1] %v573_v4  ;;  %v1306_v8 = vunpack.c.0.s8 %v1305_v6  ;;  %s7828_s14 = sshll.u32 %s12359_s13, 8  ;;  %s7968_s19 = smov 12  }
  0x13   : > { %11927 = vst [vmem:[#allocation5_spill] sm:$0xff] %v8019_v7  ;;  %s8032_s17 = scalar_lea.vmem %s11714_s0, %s7828_s14  ;;  %vm620_vm5 = vsmask.f32 7938  ;;  %vm750_vm7 = vsmask.f32 4368  ;;  %s7969_s20 = smov 24  }
  0x14   : > { %v8024_v9 = vsub.s32 %v1306_v8, %v8019_v7  ;;  %v8035_v11 = vld [vmem:[%s8032_s17] sm:$0xff]  ;;  %v8041_v15 = vld [vmem:[%s8032_s17 + $0x8] sm:$0xff]  ;;  %v8044_v16 = vld [vmem:[%s8032_s17 + $0x10] sm:$0xff]  ;;  %s7970_s21 = smov 20   ;;  %s7971_s22 = smov 32  }
  0x15   : > { %v7713_v10 = vld.sshfl [vmem:[#allocation2] sm:$0x33 pattern:$0x75316420]  ;;  %v205_v23 = vsel %vm204_vm4, %v8035_v11, 0.0  ;;  %v8065_v26 = vld [vmem:[%s8032_s17 + $0x18] sm:$0xff]  ;;  %vm8297_vm6 = vmand %vm559_vm1, %vm620_vm5  ;;  %s11430_s9 = scalar_lea.vmem %s11717_s3, %s7828_s14 }
  0x16   : > { %v7714_v12 = vld.sshfl [vmem:[#allocation2 + $0x4] sm:$0x33 pattern:$0x75316420]  ;;  %v1303_v13 = vcombine.high %v7713_v10, %v7713_v10  ;;  %v8038_v14 = vrot.slane %v7713_v10, %v8024_v9  ;;  %v206_v27 = vsel %vm204_vm4, %v8041_v15, 0.0  ;;  %v208_v28 = vsel %vm204_vm4, %v8044_v16, 0.0  ;;  %vm8520_vm14 = vmand %vm556_vm0, %vm620_vm5 }
  0x17   : > { %v7715_v17 = vld.sshfl [vmem:[#allocation2 + $0x8] sm:$0x1 pattern:$0x75316420]  ;;  %v1327_v18 = vcombine.high %v7714_v12, %v7714_v12  ;;  %v8047_v19 = vrot.slane %v7714_v12, %v8024_v9  ;;  %v8082_v35 = vld [vmem:[%s8032_s17 + $0x20] sm:$0xff]  ;;  %v207_v36 = vadd.f32 %v206_v27, %v205_v23  ;;  %v210_v39 = vsel %vm204_vm4, %v8065_v26, 0.0  ;;  %vm8530_vm15 = vmor %vm570_vm2, %vm750_vm7 }
  0x18   : > { %11928 = vst [vmem:[#allocation6_spill] sm:$0xff] %v8038_v14  ;;  %v8050_v20 = vrot.slane %v1303_v13, %v8024_v9  ;;  %v1318_v21 = vcombine.high %v8038_v14, %v8038_v14  ;;  %v8055_v22 = vrot.slane %v7715_v17, %v8024_v9  ;;  %v8091_v42 = vld [vmem:[%s8032_s17 + $0x28] sm:$0xff]  ;;  %v212_v45 = vsel %vm204_vm4, %v8082_v35, 0.0  ;;  %v8098_v47 = vld [vmem:[%s8032_s17 + $0x30] sm:$0xff]  ;;  %v8103_v52 = vld [vmem:[%s8032_s17 + $0x38] sm:$0xff]  ;;  %s7972_s23 = smov 4  }
  0x19   : > { %11929 = vst [vmem:[#allocation7_spill] sm:$0xff] %v8047_v19  ;;  %v8060_v24 = vrot.slane %v1327_v18, %v8024_v9  ;;  %v1342_v25 = vcombine.high %v8047_v19, %v8047_v19  ;;  %v209_v43 = vadd.f32 %v208_v28, %v207_v36  ;;  %v214_v50 = vsel %vm204_vm4, %v8091_v42, 0.0  ;;  %v8110_v57 = vld [vmem:[%s8032_s17 + $0x40] sm:$0xff]  ;;  %v8115_v61 = vld [vmem:[%s8032_s17 + $0x48] sm:$0xff]  ;;  %v8121_v0 = vld [vmem:[%s8032_s17 + $0x50] sm:$0xff]  ;;  %s7973_s24 = smov 16  }
  0x1a   : > { %11930 = vst [vmem:[#allocation8_spill] sm:$0xff] %v8050_v20  ;;  %v1319_v29 = vcombine.high %v8050_v20, %v8050_v20  ;;  %v3580_v32 = vcombine.low %v8050_v20, %v1318_v21  ;;  %v216_v55 = vsel %vm204_vm4, %v8098_v47, 0.0  ;;  %v218_v59 = vsel %vm204_vm4, %v8103_v52, 0.0  ;;  %v8126_v4 = vld [vmem:[%s8032_s17 + $0x58] sm:$0xff]  ;;  %v8131_v8 = vld [vmem:[%s8032_s17 + $0x60] sm:$0xff]  ;;  %v8136_v13 = vld [vmem:[%s8032_s17 + $0x68] sm:$0xff] }
  0x1b   : > { %11931 = vst [vmem:[#allocation9_spill] sm:$0xff] %v8060_v24  ;;  %v1343_v33 = vcombine.high %v8060_v24, %v8060_v24  ;;  %v3582_v34 = vcombine.low %v8060_v24, %v1342_v25  ;;  %v211_v48 = vadd.f32 %v210_v39, %v209_v43  ;;  %v220_v63 = vsel %vm204_vm4, %v8110_v57, 0.0  ;;  %v8141_v21 = vld [vmem:[%s8032_s17 + $0x70] sm:$0xff]  ;;  %v8146_v27 = vld [vmem:[%s8032_s17 + $0x78] sm:$0xff]  ;;  %v8156_v36 = vld [vmem:[%s8032_s17 + $0x88] sm:$0xff]  ;;  %s7974_s25 = smov 28  }
  0x1c   : > { %v3581_v37 = vcombine.low %v1319_v29, %v8047_v19  ;;  %v3590_v38 = vrot.slane %v3580_v32, %v8024_v9  ;;  %v222_v3 = vsel %vm204_vm4, %v8115_v61, 0.0  ;;  %v224_v6 = vsel %vm204_vm4, %v8121_v0, 0.0  ;;  %v8151_v32 = vld [vmem:[%s8032_s17 + $0x80] sm:$0xff]  ;;  %v8161_v39 = vld [vmem:[%s8032_s17 + $0x90] sm:$0xff]  ;;  %v8166_v43 = vld [vmem:[%s8032_s17 + $0x98] sm:$0xff] }
  0x1d   : > { %v3583_v40 = vcombine.low %v1343_v33, %v8055_v22  ;;  %v3604_v41 = vrot.slane %v3582_v34, %v8024_v9  ;;  %v213_v53 = vadd.f32 %v212_v45, %v211_v48  ;;  %v226_v12 = vsel %vm204_vm4, %v8126_v4, 0.0 }
  0x1e   : > { %v3597_v44 = vrot.slane %v3581_v37, %v8024_v9  ;;  %v228_v18 = vsel %vm204_vm4, %v8131_v8, 0.0  ;;  %v230_v25 = vsel %vm204_vm4, %v8136_v13, 0.0  ;;  %v232_v29 = vsel %vm204_vm4, %v8141_v21, 0.0 }
  0x1f   : > { %v3611_v46 = vrot.slane %v3583_v40, %v8024_v9  ;;  %v215_v58 = vadd.f32 %v214_v50, %v213_v53  ;;  %v234_v34 = vsel %vm204_vm4, %v8146_v27, 0.0  ;;  %v240_v45 = vsel %vm204_vm4, %v8161_v39, 0.0  ;;  %v8176_v50 = vld [vmem:[%s8032_s17 + $0xa8] sm:$0xff] }
  0x20   : > { %v3612_v49 = vcombine.low %v3590_v38, %v3597_v44  ;;  %v236_v38 = vsel %vm204_vm4, %v8151_v32, 0.0 }
  0x21   : > { %v3613_v51 = vcombine.low %v3604_v41, %v3611_v46  ;;  %v217_v62 = vadd.f32 %v216_v55, %v215_v58  ;;  %v238_v41 = vsel %vm204_vm4, %v8156_v36, 0.0  ;;  %v8171_v46 = vld [vmem:[%s8032_s17 + $0xa0] sm:$0xff]  ;;  %v8186_v58 = vld [vmem:[%s8032_s17 + $0xb8] sm:$0xff] }
  0x22   : > { %v3620_v54 = vrot.slane %v3612_v49, %v8024_v9  ;;  %v242_v49 = vsel %vm204_vm4, %v8166_v43, 0.0  ;;  %v244_v53 = vsel %vm204_vm4, %v8171_v46, 0.0 }
  0x23   : > { %v3627_v56 = vrot.slane %v3613_v51, %v8024_v9  ;;  %v219_v2 = vadd.f32 %v218_v59, %v217_v62  ;;  %v8191_v62 = vld [vmem:[%s8032_s17 + $0xc0] sm:$0xff] }
  0x25   : > { %v3628_v60 = vcombine.low %v3620_v54, %v3627_v56  ;;  %v221_v5 = vadd.f32 %v220_v63, %v219_v2  ;;  %v8181_v54 = vld [vmem:[%s8032_s17 + $0xb0] sm:$0xff]  ;;  %v246_v56 = vsel %vm204_vm4, %v8176_v50, 0.0  ;;  %v250_v2 = vsel %vm204_vm4, %v8186_v58, 0.0 }
  0x27   : > { %4462 = vrot.lane.b32.xlu1 %v3628_v60, %s7967_s18  ;;  %v223_v10 = vadd.f32 %v222_v3, %v221_v5  ;;  %v248_v60 = vsel %vm204_vm4, %v8181_v54, 0.0  ;;  %v8196_v3 = vld [vmem:[%s8032_s17 + $0xc8] sm:$0xff] }
  0x29   : > { %v225_v17 = vadd.f32 %v224_v6, %v223_v10  ;;  %v252_v6 = vsel %vm204_vm4, %v8191_v62, 0.0  ;;  %v8201_v10 = vld [vmem:[%s8032_s17 + $0xd0] sm:$0xff] }
  0x2b   : > { %v227_v23 = vadd.f32 %v226_v12, %v225_v17  ;;  %v254_v17 = vsel %vm204_vm4, %v8196_v3, 0.0 }
  0x2d   : > { %v229_v28 = vadd.f32 %v228_v18, %v227_v23  ;;  %v8206_v18 = vld [vmem:[%s8032_s17 + $0xd8] sm:$0xff] }
  0x2f   : > { %v231_v33 = vadd.f32 %v230_v25, %v229_v28  ;;  %v256_v25 = vsel %vm204_vm4, %v8201_v10, 0.0  ;;  %v8211_v28 = vld [vmem:[%s8032_s17 + $0xe0] sm:$0xff] }
  0x31   : > { %v233_v37 = vadd.f32 %v232_v29, %v231_v33  ;;  %v258_v33 = vsel %vm204_vm4, %v8206_v18, 0.0 }
  0x33   : > { %v235_v40 = vadd.f32 %v234_v34, %v233_v37  ;;  %v8216_v34 = vld [vmem:[%s8032_s17 + $0xe8] sm:$0xff] }
  0x35   : > { %v237_v44 = vadd.f32 %v236_v38, %v235_v40  ;;  %v260_v38 = vsel %vm204_vm4, %v8211_v28, 0.0  ;;  %v8221_v40 = vld [vmem:[%s8032_s17 + $0xf0] sm:$0xff] }
  0x37   : > { %v239_v48 = vadd.f32 %v238_v41, %v237_v44  ;;  %v262_v44 = vsel %vm204_vm4, %v8216_v34, 0.0 }
  0x39   : > { %v241_v51 = vadd.f32 %v240_v45, %v239_v48  ;;  %v8226_v45 = vld [vmem:[%s8032_s17 + $0xf8] sm:$0xff] }
  0x3b   : > { %v243_v55 = vadd.f32 %v242_v49, %v241_v51  ;;  %v264_v49 = vsel %vm204_vm4, %v8221_v40, 0.0 }
  0x3d   : > { %v245_v59 = vadd.f32 %v244_v53, %v243_v55  ;;  %v266_v53 = vsel %vm204_vm4, %v8226_v45, 0.0 }
  0x3f   : > { %v247_v63 = vadd.f32 %v246_v56, %v245_v59 }
  0x41   : > { %v249_v5 = vadd.f32 %v248_v60, %v247_v63  ;;  %v575_v60 = vld [vmem:[#allocation2 + $0x18] sm:$0x1] }
  0x42   : > { %v576_v63 = vsel %vm8009_vm3, 0, %v575_v60 }
  0x43   : > { %v251_v12 = vadd.f32 %v250_v2, %v249_v5  ;;  %577 = vst [vmem:[#allocation2 + $0x18] sm:$0x1] %v576_v63 }
  0x45   : > { %v253_v23 = vadd.f32 %v252_v6, %v251_v12  ;;  %v596_v6 = vld [vmem:[#allocation2 + $0x6c] sm:$0x1] }
  0x46   : > { %v597_v12 = vsel %vm8009_vm3, 0, %v596_v6 }
  0x47   : > { %v255_v29 = vadd.f32 %v254_v17, %v253_v23  ;;  %598 = vst [vmem:[#allocation2 + $0x6c] sm:$0x1] %v597_v12  ;;  %v578_v23 = vld [vmem:[#allocation2 + $0x24] sm:$0x1] }
  0x49   : > { %v257_v37 = vadd.f32 %v256_v25, %v255_v29  ;;  %v579_v25 = vsel %vm8009_vm3, 0, %v578_v23  ;;  %v587_v23 = vld [vmem:[#allocation2 + $0x48] sm:$0x1] }
  0x4a   : > { %580 = vst [vmem:[#allocation2 + $0x24] sm:$0x1] %v579_v25 }
  0x4b   : > { %v259_v41 = vadd.f32 %v258_v33, %v257_v37 }
  0x4d   : > { %v261_v48 = vadd.f32 %v260_v38, %v259_v41 }
  0x4f   : > { %v263_v51 = vadd.f32 %v262_v44, %v261_v48 }
  0x51   : > { %v265_v55 = vadd.f32 %v264_v49, %v263_v51 }
  0x53   : > { %v267_v56 = vadd.f32 %v266_v53, %v265_v55 }
  0x55   : > { %v268_v59 = vrot.slane %v267_v56, 4 }
  0x57   : > { %v269_v2 = vadd.f32 %v268_v59, %v267_v56 }
  0x59   : > { %v270_v5 = vrot.slane %v269_v2, 2 }
  0x5b   : > { %v271_v17 = vadd.f32 %v270_v5, %v269_v2 }
  0x5d   : > { %v272_v29 = vrot.slane %v271_v17, 1 }
  0x5f   : > { %v273_v33 = vadd.f32 %v272_v29, %v271_v17 }
  0x61   : > { %v8238_v37 = vmul.f32 0.00390625, %v273_v33  ;;  %v634_v33 = vld [vmem:[#allocation2 + $0x44] sm:$0x1] }
  0x63   : > { %v8242_v38 = vsub.f32 %v8035_v11, %v8238_v37  ;;  %v8246_v41 = vsub.f32 %v8041_v15, %v8238_v37  ;;  %v8250_v44 = vsub.f32 %v8044_v16, %v8238_v37  ;;  %v8254_v48 = vsub.f32 %v8065_v26, %v8238_v37 }
  0x64   : > { %v8258_v49 = vsub.f32 %v8082_v35, %v8238_v37  ;;  %v8268_v16 = vsub.f32 %v8091_v42, %v8238_v37  ;;  %v8274_v35 = vsub.f32 %v8098_v47, %v8238_v37  ;;  %v8283_v42 = vsub.f32 %v8103_v52, %v8238_v37 }
  0x65   : > { %v308_v11 = vmul.f32 %v8242_v38, %v8242_v38  ;;  %v309_v51 = vmul.f32 %v8246_v41, %v8246_v41  ;;  %v310_v15 = vmul.f32 %v8250_v44, %v8250_v44  ;;  %v311_v26 = vmul.f32 %v8254_v48, %v8254_v48 }
  0x66   : > { %11932 = vst [vmem:[#allocation10_spill] sm:$0xff] %v8274_v35  ;;  %v312_v53 = vmul.f32 %v8258_v49, %v8258_v49  ;;  %11933 = vst [vmem:[#allocation11_spill] sm:$0xff] %v8283_v42  ;;  %v313_v63 = vmul.f32 %v8268_v16, %v8268_v16  ;;  %v8290_v5 = vsub.f32 %v8110_v57, %v8238_v37  ;;  %v11934_v52 = vmov 0 }
  0x67   : > { %v340_v55 = vsel %vm204_vm4, %v308_v11, 0.0  ;;  %v341_v56 = vsel %vm204_vm4, %v309_v51, 0.0  ;;  %v343_v59 = vsel %vm204_vm4, %v310_v15, 0.0  ;;  %v345_v47 = vsel %vm204_vm4, %v311_v26, 0.0  ;;  %v599_v11 = vld [vmem:[#allocation2 + $0x78] sm:$0x1] }
  0x68   : > { %v342_v60 = vadd.f32 %v341_v56, %v340_v55  ;;  %v314_v6 = vmul.f32 %v8274_v35, %v8274_v35  ;;  %v347_v12 = vsel %vm204_vm4, %v312_v53, 0.0  ;;  %v11935_v52 = vsel %vm8297_vm6, 4294967295, %v11934_v52 }
  0x69   : > { %11936 = vst [vmem:[#allocation12_spill] sm:$0xff] %v11935_v52  ;;  %v8303_v25 = vsub.f32 %v8115_v61, %v8238_v37  ;;  %v315_v57 = vmul.f32 %v8283_v42, %v8283_v42  ;;  %v349_v29 = vsel %vm204_vm4, %v313_v63, 0.0  ;;  %v8310_v15 = vsub.f32 %v8121_v0, %v8238_v37 }
  0x6a   : > { %v344_v2 = vadd.f32 %v343_v59, %v342_v60  ;;  %v316_v26 = vmul.f32 %v8290_v5, %v8290_v5  ;;  %v351_v53 = vsel %vm204_vm4, %v314_v6, 0.0  ;;  %v588_v61 = vsel %vm8009_vm3, 0, %v587_v23 }
  0x6b   : > { %v635_v56 = vsel %vm8297_vm6, 0, %v634_v33  ;;  %v600_v59 = vsel %vm8009_vm3, 0, %v599_v11  ;;  %v8323_v60 = vsub.f32 %v8126_v4, %v8238_v37  ;;  %v317_v0 = vmul.f32 %v8303_v25, %v8303_v25  ;;  %589 = vst [vmem:[#allocation2 + $0x48] sm:$0x1] %v588_v61  ;;  %v637_v61 = vld [vmem:[#allocation2 + $0x50] sm:$0x1] }
  0x6c   : > { %v346_v17 = vadd.f32 %v345_v47, %v344_v2  ;;  %v353_v63 = vsel %vm204_vm4, %v315_v57, 0.0  ;;  %636 = vst [vmem:[#allocation2 + $0x44] sm:$0x1] %v635_v56  ;;  %601 = vst [vmem:[#allocation2 + $0x78] sm:$0x1] %v600_v59  ;;  %v8330_v2 = vsub.f32 %v8131_v8, %v8238_v37  ;;  %v318_v6 = vmul.f32 %v8310_v15, %v8310_v15 }
  0x6d   : > { %v319_v23 = vmul.f32 %v8323_v60, %v8323_v60  ;;  %v357_v57 = vsel %vm204_vm4, %v317_v0, 0.0  ;;  %v8344_v8 = vsub.f32 %v8141_v21, %v8238_v37  ;;  %v638_v59 = vsel %vm8297_vm6, 0, %v637_v61 }
  0x6e   : > { %v348_v51 = vadd.f32 %v347_v12, %v346_v17  ;;  %v355_v12 = vsel %vm204_vm4, %v316_v26, 0.0  ;;  %v8337_v17 = vsub.f32 %v8136_v13, %v8238_v37  ;;  %v320_v33 = vmul.f32 %v8330_v2, %v8330_v2  ;;  %639 = vst [vmem:[#allocation2 + $0x50] sm:$0x1] %v638_v59 }
  0x6f   : > { %v359_v11 = vsel %vm204_vm4, %v318_v6, 0.0  ;;  %v8351_v13 = vsub.f32 %v8146_v27, %v8238_v37  ;;  %v8362_v0 = vsub.f32 %v8151_v32, %v8238_v37  ;;  %v322_v27 = vmul.f32 %v8344_v8, %v8344_v8 }
  0x70   : > { %v350_v55 = vadd.f32 %v349_v29, %v348_v51  ;;  %v590_v51 = vld [vmem:[#allocation2 + $0x54] sm:$0x1]  ;;  %v8369_v6 = vsub.f32 %v8156_v36, %v8238_v37  ;;  %v8376_v32 = vsub.f32 %v8161_v39, %v8238_v37  ;;  %v8383_v36 = vsub.f32 %v8166_v43, %v8238_v37 }
  0x71   : > { %v591_v21 = vsel %vm8009_vm3, 0, %v590_v51  ;;  %v8390_v39 = vsub.f32 %v8171_v46, %v8238_v37  ;;  %v8397_v43 = vsub.f32 %v8176_v50, %v8238_v37  ;;  %v8404_v46 = vsub.f32 %v8181_v54, %v8238_v37 }
  0x72   : > { %v352_v47 = vadd.f32 %v351_v53, %v350_v55  ;;  %v321_v53 = vmul.f32 %v8337_v17, %v8337_v17  ;;  %v361_v55 = vsel %vm204_vm4, %v319_v23, 0.0  ;;  %592 = vst [vmem:[#allocation2 + $0x54] sm:$0x1] %v591_v21  ;;  %v327_v61 = vmul.f32 %v8383_v36, %v8383_v36 }
  0x73   : > { %11937 = vst [vmem:[#allocation13_spill] sm:$0xff] %v8404_v46 }
  0x74   : > { %v354_v4 = vadd.f32 %v353_v63, %v352_v47  ;;  %v363_v63 = vsel %vm204_vm4, %v320_v33, 0.0  ;;  %v377_v54 = vsel %vm204_vm4, %v327_v61, 0.0 }
  0x76   : > { %v356_v29 = vadd.f32 %v355_v12, %v354_v4  ;;  %v323_v12 = vmul.f32 %v8351_v13, %v8351_v13  ;;  %v365_v4 = vsel %vm204_vm4, %v321_v53, 0.0  ;;  %v326_v53 = vmul.f32 %v8376_v32, %v8376_v32 }
  0x78   : > { %v358_v26 = vadd.f32 %v357_v57, %v356_v29  ;;  %v324_v57 = vmul.f32 %v8362_v0, %v8362_v0  ;;  %v367_v29 = vsel %vm204_vm4, %v322_v27, 0.0  ;;  %v369_v51 = vsel %vm204_vm4, %v323_v12, 0.0  ;;  %v602_v27 = vld [vmem:[#allocation2 + $0x84] sm:$0x1] }
  0x79   : > { %v603_v50 = vsel %vm8009_vm3, 0, %v602_v27 }
  0x7a   : > { %v360_v56 = vadd.f32 %v359_v11, %v358_v26  ;;  %v325_v11 = vmul.f32 %v8369_v6, %v8369_v6  ;;  %604 = vst [vmem:[#allocation2 + $0x84] sm:$0x1] %v603_v50  ;;  %v8450_v50 = vsub.f32 %v8211_v28, %v8238_v37 }
  0x7c   : > { %v362_v47 = vadd.f32 %v361_v55, %v360_v56  ;;  %v371_v55 = vsel %vm204_vm4, %v324_v57, 0.0  ;;  %v373_v56 = vsel %vm204_vm4, %v325_v11, 0.0 }
  0x7e   : > { %v364_v23 = vadd.f32 %v363_v63, %v362_v47  ;;  %v328_v63 = vmul.f32 %v8390_v39, %v8390_v39  ;;  %v375_v47 = vsel %vm204_vm4, %v326_v53, 0.0 }
  0x80   : > { %v366_v33 = vadd.f32 %v365_v4, %v364_v23  ;;  %v8413_v4 = vsub.f32 %v8186_v58, %v8238_v37  ;;  %v329_v23 = vmul.f32 %v8397_v43, %v8397_v43  ;;  %v379_v11 = vsel %vm204_vm4, %v328_v63, 0.0  ;;  %v611_v63 = vld [vmem:[#allocation2 + $0xa8] sm:$0x1] }
  0x81   : > { %v8427_v58 = vsub.f32 %v8196_v3, %v8238_v37  ;;  %v8441_v3 = vsub.f32 %v8206_v18, %v8238_v37 }
  0x82   : > { %v368_v26 = vadd.f32 %v367_v29, %v366_v33  ;;  %11938 = vst [vmem:[#allocation14_spill] sm:$0xff] %v8413_v4  ;;  %v8420_v29 = vsub.f32 %v8191_v62, %v8238_v37  ;;  %v330_v33 = vmul.f32 %v8404_v46, %v8404_v46  ;;  %v381_v53 = vsel %vm204_vm4, %v329_v23, 0.0  ;;  %v658_v23 = vld [vmem:[#allocation2 + $0xa4] sm:$0x1] }
  0x83   : > { %v8434_v62 = vsub.f32 %v8201_v10, %v8238_v37  ;;  %v612_v10 = vsel %vm8009_vm3, 0, %v611_v63  ;;  %v640_v63 = vld [vmem:[#allocation2 + $0x5c] sm:$0x1] }
  0x84   : > { %v370_v21 = vadd.f32 %v369_v51, %v368_v26  ;;  %v331_v26 = vmul.f32 %v8413_v4, %v8413_v4  ;;  %v383_v61 = vsel %vm204_vm4, %v330_v33, 0.0  ;;  %613 = vst [vmem:[#allocation2 + $0xa8] sm:$0x1] %v612_v10  ;;  %v8459_v33 = vsub.f32 %v8216_v34, %v8238_v37 }
  0x85   : > { %v8473_v34 = vsub.f32 %v8226_v45, %v8238_v37  ;;  %v641_v45 = vsel %vm8297_vm6, 0, %v640_v63 }
  0x86   : > { %v372_v59 = vadd.f32 %v371_v55, %v370_v21  ;;  %v332_v21 = vmul.f32 %v8420_v29, %v8420_v29  ;;  %v385_v27 = vsel %vm204_vm4, %v331_v26, 0.0  ;;  %v8466_v26 = vsub.f32 %v8221_v40, %v8238_v37  ;;  %642 = vst [vmem:[#allocation2 + $0x5c] sm:$0x1] %v641_v45  ;;  %v643_v45 = vld [vmem:[#allocation2 + $0x68] sm:$0x1] }
  0x88   : > { %v374_v12 = vadd.f32 %v373_v56, %v372_v59  ;;  %v333_v59 = vmul.f32 %v8427_v58, %v8427_v58  ;;  %v387_v18 = vsel %vm204_vm4, %v332_v21, 0.0  ;;  %v338_v40 = vmul.f32 %v8466_v26, %v8466_v26 }
  0x8a   : > { %v376_v57 = vadd.f32 %v375_v47, %v374_v12  ;;  %v334_v12 = vmul.f32 %v8434_v62, %v8434_v62  ;;  %v389_v28 = vsel %vm204_vm4, %v333_v59, 0.0 }
  0x8c   : > { %v378_v51 = vadd.f32 %v377_v54, %v376_v57  ;;  %v659_v57 = vsel %vm8297_vm6, 0, %v658_v23 }
  0x8d   : > { %660 = vst [vmem:[#allocation2 + $0xa4] sm:$0x1] %v659_v57 }
  0x8e   : > { %v380_v55 = vadd.f32 %v379_v11, %v378_v51  ;;  %v335_v11 = vmul.f32 %v8441_v3, %v8441_v3 }
  0x90   : > { %v382_v56 = vadd.f32 %v381_v53, %v380_v55  ;;  %v336_v53 = vmul.f32 %v8450_v50, %v8450_v50  ;;  %v391_v55 = vsel %vm204_vm4, %v334_v12, 0.0  ;;  %v339_v12 = vmul.f32 %v8473_v34, %v8473_v34 }
  0x92   : > { %v384_v47 = vadd.f32 %v383_v61, %v382_v56  ;;  %v337_v61 = vmul.f32 %v8459_v33, %v8459_v33  ;;  %v393_v56 = vsel %vm204_vm4, %v335_v11, 0.0  ;;  %v401_v11 = vsel %vm204_vm4, %v339_v12, 0.0 }
  0x94   : > { %v386_v54 = vadd.f32 %v385_v27, %v384_v47  ;;  %v593_v27 = vld [vmem:[#allocation2 + $0x60] sm:$0x1]  ;;  %v395_v47 = vsel %vm204_vm4, %v336_v53, 0.0  ;;  %v614_v53 = vld [vmem:[#allocation2 + $0xb4] sm:$0x1] }
  0x95   : > { %v594_v10 = vsel %vm8009_vm3, 0, %v593_v27 }
  0x96   : > { %v388_v51 = vadd.f32 %v387_v18, %v386_v54  ;;  %595 = vst [vmem:[#allocation2 + $0x60] sm:$0x1] %v594_v10  ;;  %v397_v18 = vsel %vm204_vm4, %v337_v61, 0.0  ;;  %v399_v54 = vsel %vm204_vm4, %v338_v40, 0.0 }
  0x98   : > { %v390_v21 = vadd.f32 %v389_v28, %v388_v51 }
  0x9a   : > { %v392_v59 = vadd.f32 %v391_v55, %v390_v21  ;;  %v615_v55 = vsel %vm8009_vm3, 0, %v614_v53 }
  0x9b   : > { %616 = vst [vmem:[#allocation2 + $0xb4] sm:$0x1] %v615_v55 }
  0x9c   : > { %v394_v37 = vadd.f32 %v393_v56, %v392_v59  ;;  %v661_v56 = vld [vmem:[#allocation2 + $0xb0] sm:$0x1] }
  0x9d   : > { %v662_v59 = vsel %vm8297_vm6, 0, %v661_v56 }
  0x9e   : > { %v396_v23 = vadd.f32 %v395_v47, %v394_v37  ;;  %663 = vst [vmem:[#allocation2 + $0xb0] sm:$0x1] %v662_v59  ;;  %v644_v37 = vsel %vm8297_vm6, 0, %v643_v45 }
  0x9f   : > { %645 = vst [vmem:[#allocation2 + $0x68] sm:$0x1] %v644_v37 }
  0xa0   : > { %v398_v57 = vadd.f32 %v397_v18, %v396_v23 }
  0xa2   : > { %v400_v28 = vadd.f32 %v399_v54, %v398_v57 }
  0xa4   : > { %v402_v51 = vadd.f32 %v401_v11, %v400_v28 }
  0xa6   : > { %v403_v21 = vrot.slane %v402_v51, 4 }
  0xa8   : > { %v404_v27 = vadd.f32 %v403_v21, %v402_v51 }
  0xaa   : > { %v405_v61 = vrot.slane %v404_v27, 2 }
  0xac   : > { %v406_v63 = vadd.f32 %v405_v61, %v404_v27 }
  0xae   : > { %v407_v40 = vrot.slane %v406_v63, 1 }
  0xb0   : > { %v408_v47 = vadd.f32 %v407_v40, %v406_v63 }
  0xb2   : > { %v409_v10 = vmul.f32 0.00390625, %v408_v47 }
  0xb4   : > { %v410_v12 = vadd.f32 1e-05, %v409_v10 }
  0xb6   : > { %7955 = vrsqrt.f32 %v410_v12 }
  0xc0   : > { %v8496_v18 = vpop.eup %7955 }
  0xc1   : > { %v412_v23 = vmul.f32 %v8496_v18, %v8242_v38  ;;  %v413_v54 = vmul.f32 %v8496_v18, %v8246_v41  ;;  %v414_v57 = vmul.f32 %v8496_v18, %v8250_v44  ;;  %v415_v11 = vmul.f32 %v8496_v18, %v8254_v48 }
  0xc2   : > { %v428_v28 = vmul.f32 %v8496_v18, %v8362_v0  ;;  %v429_v51 = vmul.f32 %v8496_v18, %v8369_v6  ;;  %v8512_v53 = vmul.f32 %v8496_v18, %v8258_v49  ;;  %v8516_v38 = vmul.f32 %v8496_v18, %v8268_v16 }
  0xc3   : > { %vm444_vm8 = vcmp.ge.f32.partialorder %v412_v23, 0.0  ;;  %v476_v41 = vmul.f32 0.01, %v412_v23  ;;  %vm445_vm9 = vcmp.ge.f32.partialorder %v413_v54, 0.0  ;;  %v477_v44 = vmul.f32 0.01, %v413_v54 }
  0xc4   : > { %vm446_vm10 = vcmp.ge.f32.partialorder %v414_v57, 0.0  ;;  %vm447_vm11 = vcmp.ge.f32.partialorder %v415_v11, 0.0  ;;  %v478_v48 = vmul.f32 0.01, %v414_v57  ;;  %v479_v55 = vmul.f32 0.01, %v415_v11 }
  0xc5   : > { %v508_v0 = vsel %vm444_vm8, %v412_v23, %v476_v41  ;;  %v509_v21 = vsel %vm445_vm9, %v413_v54, %v477_v44  ;;  %vm460_vm12 = vcmp.ge.f32.partialorder %v428_v28, 0.0  ;;  %vm461_vm13 = vcmp.ge.f32.partialorder %v429_v51, 0.0  ;;  %v1074_v44 = vld [vmem:[#allocation2 + $0xc] sm:$0xf] }
  0xc6   : > { %v7830_v6 = vpack.c.bf16 %v508_v0, %v508_v0  ;;  %v7831_v56 = vpack.c.bf16 %v509_v21, %v509_v21  ;;  %v510_v49 = vsel %vm446_vm10, %v414_v57, %v478_v48  ;;  %v511_v59 = vsel %vm447_vm11, %v415_v11, %v479_v55 }
  0xc7   : > { %v7832_v27 = vpack.c.bf16 %v510_v49, %v510_v49  ;;  %v7833_v61 = vpack.c.bf16 %v511_v59, %v511_v59  ;;  %v492_v16 = vmul.f32 0.01, %v428_v28  ;;  %v493_v63 = vmul.f32 0.01, %v429_v51 }
  0xc8   : > { %v753_v40 = vshrl.u32 %v7830_v6, 16  ;;  %v756_v47 = vshll.u32 %v7830_v6, 16  ;;  %v761_v10 = vshrl.u32 %v7831_v56, 16  ;;  %v764_v45 = vshll.u32 %v7831_v56, 16 }
  0xc9   : > { %v770_v37 = vshrl.u32 %v7832_v27, 16  ;;  %v773_v12 = vshll.u32 %v7832_v27, 16  ;;  %v778_v31 = vshrl.u32 %v7833_v61, 16  ;;  %v781_v30 = vshll.u32 %v7833_v61, 16  ;;  %v1081_v27 = vld [vmem:[#allocation2 + $0x18] sm:$0xf] }
  0xca   : > { %v755_v54 = vrot.slane %v753_v40, 7  ;;  %v8524_v57 = vrot.slane %v761_v10, 7  ;;  %v524_v11 = vsel %vm460_vm12, %v428_v28, %v492_v16  ;;  %v525_v41 = vsel %vm461_vm13, %v429_v51, %v493_v63 }
  0xcb   : > { %v772_v55 = vrot.slane %v770_v37, 7  ;;  %v8534_v0 = vrot.slane %v778_v31, 7  ;;  %v7846_v21 = vpack.c.bf16 %v524_v11, %v524_v11  ;;  %v7847_v6 = vpack.c.bf16 %v525_v41, %v525_v41 }
  0xcc   : > { %v758_v56 = vor.u32 %v756_v47, %v755_v54  ;;  %v759_v49 = vrot.slane %v755_v54, 4  ;;  %v766_v59 = vor.u32 %v764_v45, %v8524_v57  ;;  %vm448_vm1 = vcmp.ge.f32.partialorder %v8512_v53, 0.0 }
  0xcd   : > { %v775_v28 = vor.u32 %v773_v12, %v772_v55  ;;  %v776_v51 = vrot.slane %v772_v55, 4  ;;  %v783_v61 = vor.u32 %v781_v30, %v8534_v0  ;;  %v889_v16 = vshrl.u32 %v7846_v21, 16  ;;  %v1130_v12 = vld [vmem:[#allocation2 + $0x6c] sm:$0xf] }
  0xce   : > { %v1075_v63 = vsel %vm8520_vm14, %v758_v56, %v1074_v44  ;;  %v767_v31 = vsel %vm8530_vm15, %v759_v49, %v766_v59  ;;  %v892_v40 = vshll.u32 %v7846_v21, 16  ;;  %v897_v10 = vshrl.u32 %v7847_v6, 16 }
  0xcf   : > { %1076 = vst [vmem:[#allocation2 + $0xc] sm:$0xf] %v1075_v63  ;;  %1077 = vst.msk [vmem:[#allocation2 + $0x10] sm:$0xf] %vm556_vm0, %v767_v31  ;;  %v784_v47 = vsel %vm8530_vm15, %v776_v51, %v783_v61  ;;  %v1082_v45 = vsel %vm8520_vm14, %v775_v28, %v1081_v27  ;;  %v891_v37 = vrot.slane %v889_v16, 7  ;;  %v900_v30 = vshll.u32 %v7847_v6, 16 }
  0xd0   : > { %1083 = vst [vmem:[#allocation2 + $0x18] sm:$0xf] %v1082_v45  ;;  %1084 = vst.msk [vmem:[#allocation2 + $0x1c] sm:$0xf] %vm556_vm0, %v784_v47  ;;  %v8549_v54 = vrot.slane %v897_v10, 7  ;;  %vm449_vm2 = vcmp.ge.f32.partialorder %v8516_v38, 0.0  ;;  %v420_v21 = vmul.f32 %v8496_v18, %v8290_v5  ;;  %v421_v6 = vmul.f32 %v8496_v18, %v8303_v25 }
  0xd1   : > { %v480_v11 = vmul.f32 0.01, %v8512_v53  ;;  %v481_v41 = vmul.f32 0.01, %v8516_v38  ;;  %v894_v44 = vor.u32 %v892_v40, %v891_v37  ;;  %v895_v55 = vrot.slane %v891_v37, 4 }
  0xd2   : > { %v902_v56 = vor.u32 %v900_v30, %v8549_v54  ;;  %vm452_vm5 = vcmp.ge.f32.partialorder %v420_v21, 0.0  ;;  %v8571_v25 = vmul.f32 %v8496_v18, %v8310_v15  ;;  %vm453_vm7 = vcmp.ge.f32.partialorder %v421_v6, 0.0 }
  0xd3   : > { %v512_v49 = vsel %vm448_vm1, %v8512_v53, %v480_v11  ;;  %v513_v59 = vsel %vm449_vm2, %v8516_v38, %v481_v41  ;;  %v1131_v27 = vsel %vm8520_vm14, %v894_v44, %v1130_v12  ;;  %v484_v61 = vmul.f32 0.01, %v420_v21 }
  0xd4   : > { %v7834_v28 = vpack.c.bf16 %v512_v49, %v512_v49  ;;  %v8565_v51 = vpack.c.bf16 %v513_v59, %v513_v59  ;;  %v903_v5 = vsel %vm8530_vm15, %v895_v55, %v902_v56  ;;  %1132 = vst [vmem:[#allocation2 + $0x6c] sm:$0xf] %v1131_v27  ;;  %v485_v40 = vmul.f32 0.01, %v421_v6 }
  0xd5   : > { %1133 = vst.msk [vmem:[#allocation2 + $0x70] sm:$0xf] %vm556_vm0, %v903_v5  ;;  %v8576_v10 = vsel %vm452_vm5, %v420_v21, %v484_v61  ;;  %v8580_v47 = vmul.f32 %v8496_v18, %v8376_v32  ;;  %v486_v55 = vmul.f32 0.01, %v8571_v25  ;;  %v8595_v32 = vmul.f32 %v8496_v18, %v8383_v36 }
  0xd6   : > { %v787_v53 = vshrl.u32 %v7834_v28, 16  ;;  %v790_v38 = vshll.u32 %v7834_v28, 16  ;;  %v795_v16 = vshrl.u32 %v8565_v51, 16  ;;  %v798_v63 = vshll.u32 %v8565_v51, 16 }
  0xd7   : > { %v7716_v31 = vld.sshfl [vmem:[#allocation2 + $0xc] sm:$0x33 pattern:$0x75316420]  ;;  %v8604_v27 = vsel %vm453_vm7, %v421_v6, %v485_v40  ;;  %vm454_vm8 = vcmp.ge.f32.partialorder %v8571_v25, 0.0  ;;  %vm462_vm9 = vcmp.ge.f32.partialorder %v8580_v47, 0.0 }
  0xd8   : > { %v1365_v15 = vcombine.high %v7716_v31, %v7716_v31  ;;  %v8583_v45 = vrot.slane %v7716_v31, %v8024_v9  ;;  %v7717_v37 = vld.sshfl [vmem:[#allocation2 + $0x10] sm:$0x33 pattern:$0x75316420]  ;;  %v8585_v30 = vrot.slane %v787_v53, 7  ;;  %v8587_v12 = vrot.slane %v795_v16, 7 }
  0xd9   : > { %v1389_v11 = vcombine.high %v7717_v37, %v7717_v37  ;;  %v8590_v41 = vrot.slane %v7717_v37, %v8024_v9  ;;  %v7719_v44 = vld.sshfl [vmem:[#allocation2 + $0x18] sm:$0x33 pattern:$0x75316420]  ;;  %vm463_vm10 = vcmp.ge.f32.partialorder %v8595_v32, 0.0 }
  0xda   : > { %11943 = vst [vmem:[#allocation15_spill] sm:$0xff] %v8587_v12  ;;  %v8598_v21 = vrot.slane %v1365_v15, %v8024_v9  ;;  %v7720_v56 = vld.sshfl [vmem:[#allocation2 + $0x1c] sm:$0x33 pattern:$0x75316420]  ;;  %v1427_v49 = vcombine.high %v7719_v44, %v7719_v44  ;;  %v8601_v59 = vrot.slane %v7719_v44, %v8024_v9  ;;  %v792_v36 = vor.u32 %v790_v38, %v8585_v30 }
  0xdb   : > { %v8607_v28 = vrot.slane %v1389_v11, %v8024_v9  ;;  %v1451_v51 = vcombine.high %v7720_v56, %v7720_v56  ;;  %v8610_v5 = vrot.slane %v7720_v56, %v8024_v9  ;;  %v7740_v16 = vld.sshfl [vmem:[#allocation2 + $0x6c] sm:$0x33 pattern:$0x75316420]  ;;  %v793_v31 = vrot.slane %v8585_v30, 4 }
  0xdc   : > { %v3629_v61 = vcombine.low %v8583_v45, %v8598_v21  ;;  %v7784_v53 = vcombine.high %v8583_v45, %v8598_v21  ;;  %v8619_v6 = vrot.slane %v1427_v49, %v8024_v9  ;;  %v1861_v37 = vcombine.high %v7740_v16, %v7740_v16  ;;  %v7741_v14 = vld.sshfl [vmem:[#allocation2 + $0x70] sm:$0x33 pattern:$0x75316420] }
  0xdd   : > { %v3631_v40 = vcombine.low %v8590_v41, %v8607_v28  ;;  %v7785_v38 = vcombine.high %v8590_v41, %v8607_v28  ;;  %v8627_v15 = vrot.slane %v1451_v51, %v8024_v9  ;;  %v8648_v24 = vrot.slane %v7740_v16, %v8024_v9 }
  0xde   : > { %v3639_v11 = vrot.slane %v3629_v61, %v8024_v9  ;;  %v3646_v44 = vrot.slane %v7784_v53, %v8024_v9  ;;  %v2525_v56 = vcombine.low %v8601_v59, %v8619_v6  ;;  %v7770_v30 = vcombine.high %v8601_v59, %v8619_v6 }
  0xdf   : > { %v3653_v49 = vrot.slane %v3631_v40, %v8024_v9  ;;  %v3660_v7 = vrot.slane %v7785_v38, %v8024_v9  ;;  %v2527_v20 = vcombine.low %v8610_v5, %v8627_v15  ;;  %v7771_v51 = vcombine.high %v8610_v5, %v8627_v15 }
  0xe0   : > { %v3661_v61 = vcombine.low %v3639_v11, %v3646_v44  ;;  %v8642_v53 = vrot.slane %v2525_v56, %v8024_v9  ;;  %v8645_v19 = vrot.slane %v7770_v30, %v8024_v9  ;;  %v8657_v46 = vrot.slane %v1861_v37, %v8024_v9  ;;  %v1088_v11 = vld [vmem:[#allocation2 + $0x24] sm:$0xf] }
  0xe1   : > { %v3662_v40 = vcombine.low %v3653_v49, %v3660_v7  ;;  %v8651_v38 = vrot.slane %v2527_v20, %v8024_v9  ;;  %v8654_v4 = vrot.slane %v7771_v51, %v8024_v9  ;;  %v1885_v30 = vcombine.high %v7741_v14, %v7741_v14 }
  0xe2   : > { %11944 = vst [vmem:[#allocation16_spill] sm:$0xff] %v8642_v53  ;;  %11945 = vst [vmem:[#allocation17_spill] sm:$0xff] %v8645_v19  ;;  %v3669_v44 = vrot.slane %v3661_v61, %v8024_v9  ;;  %v4909_v56 = vcombine.low %v8642_v53, %v8645_v19  ;;  %v8663_v16 = vrot.slane %v7741_v14, %v8024_v9 }
  0xe3   : > { %11946 = vst [vmem:[#allocation18_spill] sm:$0xff] %v8651_v38  ;;  %11947 = vst [vmem:[#allocation19_spill] sm:$0xff] %v8654_v4  ;;  %v3676_v7 = vrot.slane %v3662_v40, %v8024_v9  ;;  %v4910_v20 = vcombine.low %v8651_v38, %v8654_v4  ;;  %v4070_v49 = vcombine.low %v8648_v24, %v8657_v46 }
  0xe4   : > { %11948 = vst [vmem:[#allocation20_spill] sm:$0xff] %v8663_v16  ;;  %v7792_v37 = vcombine.high %v8648_v24, %v8657_v46  ;;  %v4917_v51 = vrot.slane %v4909_v56, %v8024_v9  ;;  %v8674_v61 = vrot.slane %v1885_v30, %v8024_v9  ;;  %v800_v19 = vor.u32 %v798_v63, %v8587_v12 }
  0xe5   : > { %v1089_v14 = vsel %vm8520_vm14, %v792_v36, %v1088_v11  ;;  %v8679_v40 = vcombine.low %v3669_v44, %v3676_v7  ;;  %v4924_v4 = vrot.slane %v4910_v20, %v8024_v9  ;;  %v8683_v38 = vrot.slane %v4070_v49, %v8024_v9 }
  0xe6   : > { %11949 = vst [vmem:[#allocation21_spill] sm:$0xff] %v8674_v61  ;;  %v8686_v42 = vrot.slane %v7792_v37, %v8024_v9  ;;  %1090 = vst [vmem:[#allocation2 + $0x24] sm:$0xf] %v1089_v14  ;;  %v4072_v56 = vcombine.low %v8663_v16, %v8674_v61  ;;  %v7793_v63 = vcombine.high %v8663_v16, %v8674_v61  ;;  %v1109_v16 = vld [vmem:[#allocation2 + $0x48] sm:$0xf] }
  0xe7   : > { %11950 = vst [vmem:[#allocation22_spill] sm:$0xff] %v8679_v40  ;;  %11951 = vst [vmem:[#allocation23_spill] sm:$0xff] %v8683_v38  ;;  %v801_v36 = vsel %vm8530_vm15, %v793_v31, %v800_v19  ;;  %v518_v11 = vsel %vm454_vm8, %v8571_v25, %v486_v55  ;;  %4584 = vrot.lane.b32.xlu0 %v8679_v40, %s7968_s19  ;;  %4464 = vrot.lane.b32.xlu1 %v8679_v40, %s7967_s18 }
  0xe8   : > { %11952 = vst [vmem:[#allocation24_spill] sm:$0xff] %v8686_v42  ;;  %v8701_v44 = vcombine.low %v4917_v51, %v4924_v4  ;;  %v4102_v30 = vcombine.low %v8683_v38, %v8686_v42  ;;  %1091 = vst.msk [vmem:[#allocation2 + $0x28] sm:$0xf] %vm556_vm0, %v801_v36  ;;  %v8708_v19 = vpack.c.bf16 %v8576_v10, %v8576_v10  ;;  %v494_v10 = vmul.f32 0.01, %v8580_v47 }
  0xe9   : > { %v8712_v25 = vrot.slane %v4072_v56, %v8024_v9  ;;  %v8715_v55 = vrot.slane %v7793_v63, %v8024_v9  ;;  %v7839_v4 = vpack.c.bf16 %v8604_v27, %v8604_v27  ;;  %v7840_v31 = vpack.c.bf16 %v518_v11, %v518_v11 }
  0xea   : > { %11953 = vst [vmem:[#allocation25_spill] sm:$0xff] %v8701_v44  ;;  %11954 = vst [vmem:[#allocation26_spill] sm:$0xff] %v8708_v19  ;;  %v4110_v7 = vrot.slane %v4102_v30, %v8024_v9  ;;  %v821_v20 = vshrl.u32 %v8708_v19, 16  ;;  %v495_v63 = vmul.f32 0.01, %v8595_v32  ;;  %v526_v36 = vsel %vm462_vm9, %v8580_v47, %v494_v10 }
  0xeb   : > { %11955 = vst [vmem:[#allocation27_spill] sm:$0xff] %v8712_v25  ;;  %11956 = vst [vmem:[#allocation28_spill] sm:$0xff] %v8715_v55  ;;  %v4103_v49 = vcombine.low %v8712_v25, %v8715_v55  ;;  %v829_v37 = vshrl.u32 %v7839_v4, 16  ;;  %v832_v51 = vshll.u32 %v7839_v4, 16  ;;  %v838_v14 = vshrl.u32 %v7840_v31, 16  ;;  %5360 = vrot.lane.b32.xlu0 %v8701_v44, %s7969_s20  ;;  %5240 = vrot.lane.b32.xlu1 %v8701_v44, %s7970_s21 }
  0xec   : > { %v8729_v27 = vrot.slane %v821_v20, 7  ;;  %v841_v56 = vshll.u32 %v7840_v31, 16  ;;  %v7848_v42 = vpack.c.bf16 %v526_v36, %v526_v36  ;;  %v1106_v31 = vld [vmem:[#allocation2 + $0x44] sm:$0x1]  ;;  %v527_v44 = vsel %vm463_vm10, %v8595_v32, %v495_v63 }
  0xed   : > { %v4117_v11 = vrot.slane %v4103_v49, %v8024_v9  ;;  %v7722_v30 = vld.sshfl [vmem:[#allocation2 + $0x24] sm:$0x33 pattern:$0x75316420]  ;;  %v831_v4 = vrot.slane %v829_v37, 7  ;;  %v8736_v55 = vrot.slane %v838_v14, 7 }
  0xee   : > { %11957 = vst [vmem:[#allocation29_spill] sm:$0xff] %v8729_v27  ;;  %v1489_v25 = vcombine.high %v7722_v30, %v7722_v30  ;;  %v8739_v38 = vrot.slane %v7722_v30, %v8024_v9  ;;  %v827_v20 = vrot.slane %v8729_v27, 4  ;;  %v7849_v27 = vpack.c.bf16 %v527_v44, %v527_v44 }
  0xef   : > { %v8745_v47 = vcombine.low %v4110_v7, %v4117_v11  ;;  %v7723_v10 = vld.sshfl [vmem:[#allocation2 + $0x28] sm:$0x33 pattern:$0x75316420]  ;;  %v834_v49 = vor.u32 %v832_v51, %v831_v4  ;;  %v836_v37 = vrot.slane %v831_v4, 4  ;;  %v843_v14 = vor.u32 %v841_v56, %v8736_v55 }
  0xf0   : > { %v8749_v36 = vrot.slane %v1489_v25, %v8024_v9  ;;  %v1513_v30 = vcombine.high %v7723_v10, %v7723_v10  ;;  %v8752_v40 = vrot.slane %v7723_v10, %v8024_v9  ;;  %v906_v56 = vshrl.u32 %v7848_v42, 16 }
  0xf1   : > { %11958 = vst [vmem:[#allocation30_spill] sm:$0xff] %v8745_v47  ;;  %4482 = vrot.lane.b32.xlu0 %v8745_v47, %s7967_s18  ;;  %v835_v32 = vsel %vm8530_vm15, %v827_v20, %v834_v49  ;;  %v1107_v7 = vsel %vm8009_vm3, %v836_v37, %v1106_v31  ;;  %v1110_v51 = vsel %vm8520_vm14, %v843_v14, %v1109_v16  ;;  %v909_v11 = vshll.u32 %v7848_v42, 16 }
  0xf2   : > { %v8763_v25 = vrot.slane %v1513_v30, %v8024_v9  ;;  %v3728_v63 = vcombine.low %v8739_v38, %v8749_v36  ;;  %v7786_v44 = vcombine.high %v8739_v38, %v8749_v36  ;;  %1105 = vst.msk [vmem:[#allocation2 + $0x40] sm:$0xf] %vm556_vm0, %v835_v32  ;;  %1108 = vst [vmem:[#allocation2 + $0x44] sm:$0x1] %v1107_v7  ;;  %v908_v4 = vrot.slane %v906_v56, 7 }
  0xf3   : > { %1111 = vst [vmem:[#allocation2 + $0x48] sm:$0xf] %v1110_v51  ;;  %v914_v20 = vshrl.u32 %v7849_v27, 16  ;;  %v917_v31 = vshll.u32 %v7849_v27, 16  ;;  %v423_v16 = vmul.f32 %v8496_v18, %v8323_v60  ;;  %v1137_v30 = vld [vmem:[#allocation2 + $0x78] sm:$0xf]  ;;  %v424_v60 = vmul.f32 %v8496_v18, %v8330_v2 }
  0xf4   : > { %v3730_v10 = vcombine.low %v8752_v40, %v8763_v25  ;;  %v8775_v49 = vrot.slane %v3728_v63, %v8024_v9  ;;  %v8778_v37 = vrot.slane %v7786_v44, %v8024_v9  ;;  %v7787_v14 = vcombine.high %v8752_v40, %v8763_v25 }
  0xf5   : > { %v911_v42 = vor.u32 %v909_v11, %v908_v4  ;;  %v912_v32 = vrot.slane %v908_v4, 4  ;;  %v8782_v7 = vrot.slane %v914_v20, 7  ;;  %vm455_vm11 = vcmp.ge.f32.partialorder %v423_v16, 0.0 }
  0xf6   : > { %11959 = vst [vmem:[#allocation31_spill] sm:$0xff] %v8775_v49  ;;  %11960 = vst [vmem:[#allocation32_spill] sm:$0xff] %v8778_v37  ;;  %v8787_v27 = vrot.slane %v3730_v10, %v8024_v9  ;;  %v8790_v51 = vrot.slane %v7787_v14, %v8024_v9  ;;  %v5685_v56 = vcombine.low %v8775_v49, %v8778_v37  ;;  %vm456_vm12 = vcmp.ge.f32.partialorder %v424_v60, 0.0 }
  0xf7   : > { %11961 = vst [vmem:[#allocation33_spill] sm:$0xff] %v8782_v7  ;;  %v919_v63 = vor.u32 %v917_v31, %v8782_v7  ;;  %v1138_v44 = vsel %vm8520_vm14, %v911_v42, %v1137_v30  ;;  %v487_v11 = vmul.f32 0.01, %v423_v16  ;;  %v488_v20 = vmul.f32 0.01, %v424_v60 }
  0xf8   : > { %11962 = vst [vmem:[#allocation34_spill] sm:$0xff] %v8787_v27  ;;  %11963 = vst [vmem:[#allocation35_spill] sm:$0xff] %v8790_v51  ;;  %v5686_v2 = vcombine.low %v8787_v27, %v8790_v51  ;;  %v5693_v4 = vrot.slane %v5685_v56, %v8024_v9  ;;  %v844_v19 = vrot.slane %v8736_v55, 4  ;;  %v8805_v31 = vmul.f32 %v8496_v18, %v8390_v39 }
  0xf9   : > { %1139 = vst [vmem:[#allocation2 + $0x78] sm:$0xf] %v1138_v44  ;;  %v7729_v10 = vld.sshfl [vmem:[#allocation2 + $0x40] sm:$0x33 pattern:$0x75316420]  ;;  %v920_v14 = vsel %vm8530_vm15, %v912_v32, %v919_v63  ;;  %v519_v47 = vsel %vm455_vm11, %v423_v16, %v487_v11  ;;  %v520_v56 = vsel %vm456_vm12, %v424_v60, %v488_v20  ;;  %v8818_v39 = vmul.f32 %v8496_v18, %v8397_v43 }
  0xfa   : > { %v5700_v30 = vrot.slane %v5686_v2, %v8024_v9  ;;  %v7730_v42 = vld.sshfl [vmem:[#allocation2 + $0x44] sm:$0x1 pattern:$0x75316420]  ;;  %v1637_v12 = vcombine.high %v7729_v10, %v7729_v10  ;;  %v8809_v51 = vrot.slane %v7729_v10, %v8024_v9  ;;  %1140 = vst.msk [vmem:[#allocation2 + $0x7c] sm:$0xf] %vm556_vm0, %v920_v14  ;;  %v7841_v55 = vpack.c.bf16 %v519_v47, %v519_v47 }
  0xfb   : > { %v7731_v44 = vld.sshfl [vmem:[#allocation2 + $0x48] sm:$0x33 pattern:$0x75316420]  ;;  %v8814_v16 = vrot.slane %v7730_v42, %v8024_v9  ;;  %v7842_v32 = vpack.c.bf16 %v520_v56, %v520_v56  ;;  %vm464_vm13 = vcmp.ge.f32.partialorder %v8805_v31, 0.0  ;;  %vm465_vm1 = vcmp.ge.f32.partialorder %v8818_v39, 0.0 }
  0xfc   : > { %11964 = vst [vmem:[#allocation36_spill] sm:$0xff] %v8809_v51  ;;  %v5701_v63 = vcombine.low %v5693_v4, %v5700_v30  ;;  %v8821_v11 = vrot.slane %v1637_v12, %v8024_v9  ;;  %v1675_v2 = vcombine.high %v7731_v44, %v7731_v44  ;;  %v8824_v10 = vrot.slane %v7731_v44, %v8024_v9 }
  0xfd   : > { %11965 = vst [vmem:[#allocation37_spill] sm:$0xff] %v8814_v16  ;;  %v846_v60 = vshrl.u32 %v7841_v55, 16  ;;  %v849_v20 = vshll.u32 %v7841_v55, 16  ;;  %v855_v14 = vshrl.u32 %v7842_v32, 16  ;;  %v858_v42 = vshll.u32 %v7842_v32, 16 }
  0xfe   : > { %11966 = vst [vmem:[#allocation38_spill] sm:$0xff] %v8821_v11  ;;  %11967 = vst [vmem:[#allocation39_spill] sm:$0xff] %v8824_v10  ;;  %6016 = vrot.lane.b32.xlu1 %v5701_v63, %s7971_s22  ;;  %v8829_v43 = vrot.slane %v1675_v2, %v8024_v9  ;;  %v1690_v12 = vcombine.high %v8824_v10, %v8824_v10  ;;  %v3874_v47 = vcombine.low %v8809_v51, %v8821_v11 }
  0xff   : > { %v7789_v4 = vcombine.high %v8809_v51, %v8821_v11  ;;  %v3876_v30 = vcombine.low %v8814_v16, %v8824_v10  ;;  %v848_v44 = vrot.slane %v846_v60, 7  ;;  %v8839_v55 = vrot.slane %v855_v14, 7  ;;  %v1113_v51 = vld [vmem:[#allocation2 + $0x50] sm:$0x1] }
 0x100   : > { %11968 = vst [vmem:[#allocation40_spill] sm:$0xff] %v8829_v43  ;;  %v7743_v56 = vld.sshfl [vmem:[#allocation2 + $0x78] sm:$0x33 pattern:$0x75316420]  ;;  %v8843_v32 = vmul.f32 %v8496_v18, %v8420_v29  ;;  %v3877_v63 = vcombine.low %v8829_v43, %v1690_v12  ;;  %v8847_v2 = vrot.slane %v3874_v47, %v8024_v9 }
 0x101   : > { %v8850_v49 = vrot.slane %v7789_v4, %v8024_v9  ;;  %v1923_v11 = vcombine.high %v7743_v56, %v7743_v56  ;;  %v8853_v10 = vrot.slane %v3876_v30, %v8024_v9  ;;  %v7744_v60 = vld.sshfl [vmem:[#allocation2 + $0x7c] sm:$0x33 pattern:$0x75316420]  ;;  %v8856_v14 = vrot.slane %v7743_v56, %v8024_v9  ;;  %v1116_v43 = vld [vmem:[#allocation2 + $0x54] sm:$0xf] }
 0x102   : > { %11969 = vst [vmem:[#allocation41_spill] sm:$0xff] %v8847_v2  ;;  %v851_v16 = vor.u32 %v849_v20, %v848_v44  ;;  %v853_v29 = vrot.slane %v848_v44, 4  ;;  %v8859_v35 = vrot.slane %v3877_v63, %v8024_v9  ;;  %v1947_v4 = vcombine.high %v7744_v60, %v7744_v60 }
 0x103   : > { %11970 = vst [vmem:[#allocation42_spill] sm:$0xff] %v8850_v49  ;;  %11971 = vst [vmem:[#allocation43_spill] sm:$0xff] %v8853_v10  ;;  %v3906_v12 = vcombine.low %v8847_v2, %v8850_v49  ;;  %v8864_v47 = vrot.slane %v1923_v11, %v8024_v9  ;;  %v8867_v30 = vrot.slane %v7744_v60, %v8024_v9  ;;  %vm468_vm2 = vcmp.ge.f32.partialorder %v8843_v32, 0.0 }
 0x104   : > { %11972 = vst [vmem:[#allocation44_spill] sm:$0xff] %v8859_v35  ;;  %v852_v56 = vsel %vm8530_vm15, %v844_v19, %v851_v16  ;;  %v860_v20 = vor.u32 %v858_v42, %v8839_v55  ;;  %v1114_v44 = vsel %vm8009_vm3, %v853_v29, %v1113_v51  ;;  %v3907_v63 = vcombine.low %v8853_v10, %v8859_v35 }
 0x105   : > { %v3914_v49 = vrot.slane %v3906_v12, %v8024_v9  ;;  %v8878_v11 = vrot.slane %v1947_v4, %v8024_v9  ;;  %v2966_v60 = vcombine.low %v8856_v14, %v8864_v47  ;;  %1112 = vst.msk [vmem:[#allocation2 + $0x4c] sm:$0xf] %vm556_vm0, %v852_v56  ;;  %1115 = vst [vmem:[#allocation2 + $0x50] sm:$0x1] %v1114_v44  ;;  %v496_v16 = vmul.f32 0.01, %v8805_v31 }
 0x106   : > { %v7778_v19 = vcombine.high %v8856_v14, %v8864_v47  ;;  %v1117_v51 = vsel %vm8520_vm14, %v860_v20, %v1116_v43  ;;  %v3921_v42 = vrot.slane %v3907_v63, %v8024_v9  ;;  %v497_v43 = vmul.f32 0.01, %v8818_v39 }
 0x107   : > { %11973 = vst [vmem:[#allocation45_spill] sm:$0xff] %v8878_v11  ;;  %v2968_v29 = vcombine.low %v8867_v30, %v8878_v11  ;;  %v8893_v12 = vrot.slane %v2966_v60, %v8024_v9  ;;  %v7779_v4 = vcombine.high %v8867_v30, %v8878_v11  ;;  %1118 = vst [vmem:[#allocation2 + $0x54] sm:$0xf] %v1117_v51 }
 0x108   : > { %v8898_v56 = vrot.slane %v7778_v19, %v8024_v9  ;;  %v528_v20 = vsel %vm464_vm13, %v8805_v31, %v496_v16  ;;  %v437_v44 = vmul.f32 %v8496_v18, %v8427_v58  ;;  %v8906_v63 = vcombine.low %v3914_v49, %v3921_v42 }
 0x109   : > { %11974 = vst [vmem:[#allocation46_spill] sm:$0xff] %v8893_v12  ;;  %v8909_v60 = vrot.slane %v2968_v29, %v8024_v9  ;;  %v8912_v35 = vrot.slane %v7779_v4, %v8024_v9  ;;  %v7850_v51 = vpack.c.bf16 %v528_v20, %v528_v20  ;;  %v529_v10 = vsel %vm465_vm1, %v8818_v39, %v497_v43 }
 0x10a   : > { %11975 = vst [vmem:[#allocation47_spill] sm:$0xff] %v8898_v56  ;;  %11976 = vst [vmem:[#allocation48_spill] sm:$0xff] %v8906_v63  ;;  %v5062_v19 = vcombine.low %v8893_v12, %v8898_v56  ;;  %v438_v31 = vmul.f32 %v8496_v18, %v8434_v62  ;;  %4594 = vrot.lane.b32.xlu0 %v8906_v63, %s7968_s19  ;;  %v7851_v49 = vpack.c.bf16 %v529_v10, %v529_v10 }
 0x10b   : > { %11977 = vst [vmem:[#allocation49_spill] sm:$0xff] %v8909_v60  ;;  %11978 = vst [vmem:[#allocation50_spill] sm:$0xff] %v8912_v35  ;;  %v5063_v58 = vcombine.low %v8909_v60, %v8912_v35  ;;  %v923_v16 = vshrl.u32 %v7850_v51, 16  ;;  %v926_v42 = vshll.u32 %v7850_v51, 16  ;;  %vm469_vm5 = vcmp.ge.f32.partialorder %v437_v44, 0.0 }
 0x10c   : > { %v5070_v29 = vrot.slane %v5062_v19, %v8024_v9  ;;  %v7732_v4 = vld.sshfl [vmem:[#allocation2 + $0x4c] sm:$0x33 pattern:$0x75316420]  ;;  %vm470_vm7 = vcmp.ge.f32.partialorder %v438_v31, 0.0  ;;  %v8929_v39 = vmul.f32 %v8496_v18, %v8337_v17  ;;  %v931_v19 = vshrl.u32 %v7851_v49, 16 }
 0x10d   : > { %v5077_v62 = vrot.slane %v5063_v58, %v8024_v9  ;;  %v7733_v43 = vld.sshfl [vmem:[#allocation2 + $0x50] sm:$0x1 pattern:$0x75316420]  ;;  %v1699_v20 = vcombine.high %v7732_v4, %v7732_v4  ;;  %v8933_v56 = vrot.slane %v7732_v4, %v8024_v9  ;;  %v925_v35 = vrot.slane %v923_v16, 7 }
 0x10e   : > { %v7734_v10 = vld.sshfl [vmem:[#allocation2 + $0x54] sm:$0x33 pattern:$0x75316420]  ;;  %v8936_v51 = vrot.slane %v7733_v43, %v8024_v9  ;;  %v934_v60 = vshll.u32 %v7851_v49, 16  ;;  %v8940_v12 = vmul.f32 %v8496_v18, %v8344_v8  ;;  %v8950_v43 = vrot.slane %v931_v19, 7 }
 0x10f   : > { %11979 = vst [vmem:[#allocation51_spill] sm:$0xff] %v8933_v56  ;;  %v8942_v17 = vcombine.low %v5070_v29, %v5077_v62  ;;  %v8945_v58 = vrot.slane %v1699_v20, %v8024_v9  ;;  %v1737_v2 = vcombine.high %v7734_v10, %v7734_v10  ;;  %v8948_v4 = vrot.slane %v7734_v10, %v8024_v9  ;;  %v1144_v16 = vld [vmem:[#allocation2 + $0x84] sm:$0xf] }
 0x110   : > { %11980 = vst [vmem:[#allocation52_spill] sm:$0xff] %v8936_v51  ;;  %v928_v7 = vor.u32 %v926_v42, %v925_v35  ;;  %v929_v11 = vrot.slane %v925_v35, 4  ;;  %11984 = vst [vmem:[#allocation56_spill] sm:$0xff] %v8950_v43  ;;  %v500_v49 = vmul.f32 0.01, %v8843_v32  ;;  %v936_v20 = vor.u32 %v934_v60, %v8950_v43 }
 0x111   : > { %11981 = vst [vmem:[#allocation53_spill] sm:$0xff] %v8942_v17  ;;  %11982 = vst [vmem:[#allocation54_spill] sm:$0xff] %v8945_v58  ;;  %5258 = vrot.lane.b32.xlu1 %v8942_v17, %s7970_s21  ;;  %v8956_v8 = vrot.slane %v1737_v2, %v8024_v9  ;;  %v1752_v29 = vcombine.high %v8948_v4, %v8948_v4  ;;  %v2770_v62 = vcombine.low %v8933_v56, %v8945_v58 }
 0x112   : > { %11983 = vst [vmem:[#allocation55_spill] sm:$0xff] %v8948_v4  ;;  %v7775_v42 = vcombine.high %v8933_v56, %v8945_v58  ;;  %v2772_v35 = vcombine.low %v8936_v51, %v8948_v4  ;;  %v1145_v10 = vsel %vm8520_vm14, %v928_v7, %v1144_v16  ;;  %v501_v19 = vmul.f32 0.01, %v437_v44  ;;  %v1165_v51 = vld [vmem:[#allocation2 + $0xa8] sm:$0xf] }
 0x113   : > { %11985 = vst [vmem:[#allocation57_spill] sm:$0xff] %v8956_v8  ;;  %v8970_v2 = vrot.slane %v2770_v62, %v8024_v9  ;;  %v2818_v37 = vcombine.low %v8956_v8, %v1752_v29  ;;  %1146 = vst [vmem:[#allocation2 + $0x84] sm:$0xf] %v1145_v10  ;;  %v502_v27 = vmul.f32 0.01, %v438_v31  ;;  %v937_v60 = vsel %vm8530_vm15, %v929_v11, %v936_v20 }
 0x114   : > { %v8973_v17 = vrot.slane %v7775_v42, %v8024_v9  ;;  %v8977_v58 = vrot.slane %v2772_v35, %v8024_v9  ;;  %v532_v7 = vsel %vm468_vm2, %v8843_v32, %v500_v49  ;;  %v533_v16 = vsel %vm469_vm5, %v437_v44, %v501_v19  ;;  %1147 = vst.msk [vmem:[#allocation2 + $0x88] sm:$0xf] %vm556_vm0, %v937_v60 }
 0x115   : > { %11986 = vst [vmem:[#allocation58_spill] sm:$0xff] %v8970_v2  ;;  %v8986_v62 = vrot.slane %v2818_v37, %v8024_v9  ;;  %v534_v42 = vsel %vm470_vm7, %v438_v31, %v502_v27  ;;  %v8992_v35 = vpack.c.bf16 %v532_v7, %v532_v7  ;;  %v7855_v20 = vpack.c.bf16 %v533_v16, %v533_v16 }
 0x116   : > { %11987 = vst [vmem:[#allocation59_spill] sm:$0xff] %v8973_v17  ;;  %11988 = vst [vmem:[#allocation60_spill] sm:$0xff] %v8977_v58  ;;  %v4994_v29 = vcombine.low %v8970_v2, %v8973_v17  ;;  %v7856_v10 = vpack.c.bf16 %v534_v42, %v534_v42  ;;  %vm457_vm8 = vcmp.ge.f32.partialorder %v8929_v39, 0.0  ;;  %vm458_vm9 = vcmp.ge.f32.partialorder %v8940_v12, 0.0 }
 0x117   : > { %11989 = vst [vmem:[#allocation61_spill] sm:$0xff] %v8986_v62  ;;  %11990 = vst [vmem:[#allocation62_spill] sm:$0xff] %v8992_v35  ;;  %v4995_v37 = vcombine.low %v8977_v58, %v8986_v62  ;;  %v957_v44 = vshrl.u32 %v8992_v35, 16  ;;  %v965_v49 = vshrl.u32 %v7855_v20, 16  ;;  %v968_v27 = vshll.u32 %v7855_v20, 16 }
 0x118   : > { %v5002_v32 = vrot.slane %v4994_v29, %v8024_v9  ;;  %v974_v31 = vshrl.u32 %v7856_v10, 16  ;;  %v977_v19 = vshll.u32 %v7856_v10, 16  ;;  %v489_v16 = vmul.f32 0.01, %v8929_v39 }
 0x119   : > { %v5009_v60 = vrot.slane %v4995_v37, %v8024_v9  ;;  %v9003_v7 = vrot.slane %v957_v44, 7  ;;  %v490_v42 = vmul.f32 0.01, %v8940_v12  ;;  %v967_v62 = vrot.slane %v965_v49, 7  ;;  %v1162_v44 = vld [vmem:[#allocation2 + $0xa4] sm:$0x1] }
 0x11a   : > { %v7746_v11 = vld.sshfl [vmem:[#allocation2 + $0x84] sm:$0x33 pattern:$0x75316420]  ;;  %v9007_v58 = vrot.slane %v974_v31, 7  ;;  %v9011_v29 = vmul.f32 %v8496_v18, %v8441_v3  ;;  %v521_v3 = vsel %vm457_vm8, %v8929_v39, %v489_v16 }
 0x11b   : > { %11991 = vst [vmem:[#allocation63_spill] sm:$0xff] %v9003_v7  ;;  %v9013_v17 = vcombine.low %v5002_v32, %v5009_v60  ;;  %v1985_v20 = vcombine.high %v7746_v11, %v7746_v11  ;;  %v9016_v10 = vrot.slane %v7746_v11, %v8024_v9  ;;  %v963_v37 = vrot.slane %v9003_v7, 4  ;;  %v7747_v56 = vld.sshfl [vmem:[#allocation2 + $0x88] sm:$0x33 pattern:$0x75316420] }
 0x11c   : > { %v970_v2 = vor.u32 %v968_v27, %v967_v62  ;;  %v972_v35 = vrot.slane %v967_v62, 4  ;;  %v979_v49 = vor.u32 %v977_v19, %v9007_v58  ;;  %v2009_v11 = vcombine.high %v7747_v56, %v7747_v56 }
 0x11d   : > { %11992 = vst [vmem:[#allocation64_spill] sm:$0xff] %v9013_v17  ;;  %5370 = vrot.lane.b32.xlu0 %v9013_v17, %s7969_s20  ;;  %v9026_v32 = vrot.slane %v1985_v20, %v8024_v9  ;;  %v9029_v31 = vrot.slane %v7747_v56, %v8024_v9  ;;  %v522_v62 = vsel %vm458_vm9, %v8940_v12, %v490_v42  ;;  %vm471_vm10 = vcmp.ge.f32.partialorder %v9011_v29, 0.0 }
 0x11e   : > { %v971_v27 = vsel %vm8530_vm15, %v963_v37, %v970_v2  ;;  %v1163_v39 = vsel %vm8009_vm3, %v972_v35, %v1162_v44  ;;  %v1166_v19 = vsel %vm8520_vm14, %v979_v49, %v1165_v51  ;;  %v7843_v60 = vpack.c.bf16 %v521_v3, %v521_v3 }
 0x11f   : > { %11993 = vst [vmem:[#allocation65_spill] sm:$0xff] %v9026_v32  ;;  %11994 = vst [vmem:[#allocation66_spill] sm:$0xff] %v9029_v31  ;;  %v9041_v16 = vrot.slane %v2009_v11, %v8024_v9  ;;  %v4169_v56 = vcombine.low %v9016_v10, %v9026_v32  ;;  %v7794_v20 = vcombine.high %v9016_v10, %v9026_v32  ;;  %v861_v2 = vrot.slane %v8839_v55, 4 }
 0x120   : > { %1161 = vst.msk [vmem:[#allocation2 + $0xa0] sm:$0xf] %vm556_vm0, %v971_v27  ;;  %1164 = vst [vmem:[#allocation2 + $0xa4] sm:$0x1] %v1163_v39  ;;  %v7844_v12 = vpack.c.bf16 %v522_v62, %v522_v62  ;;  %v863_v35 = vshrl.u32 %v7843_v60, 16  ;;  %v866_v42 = vshll.u32 %v7843_v60, 16  ;;  %v440_v27 = vmul.f32 %v8496_v18, %v8450_v50 }
 0x121   : > { %11995 = vst [vmem:[#allocation67_spill] sm:$0xff] %v9041_v16  ;;  %1167 = vst [vmem:[#allocation2 + $0xa8] sm:$0xf] %v1166_v19  ;;  %v4171_v37 = vcombine.low %v9029_v31, %v9041_v16  ;;  %v9054_v44 = vrot.slane %v4169_v56, %v8024_v9  ;;  %v9057_v49 = vrot.slane %v7794_v20, %v8024_v9  ;;  %v1120_v56 = vld [vmem:[#allocation2 + $0x5c] sm:$0x1] }
 0x122   : > { %v7795_v3 = vcombine.high %v9029_v31, %v9041_v16  ;;  %v865_v11 = vrot.slane %v863_v35, 7  ;;  %v872_v62 = vshrl.u32 %v7844_v12, 16  ;;  %v875_v55 = vshll.u32 %v7844_v12, 16 }
 0x123   : > { %11996 = vst [vmem:[#allocation68_spill] sm:$0xff] %v9054_v44  ;;  %v9064_v39 = vrot.slane %v4171_v37, %v8024_v9  ;;  %v5838_v60 = vcombine.low %v9054_v44, %v9057_v49  ;;  %vm472_vm11 = vcmp.ge.f32.partialorder %v440_v27, 0.0  ;;  %v1123_v37 = vld [vmem:[#allocation2 + $0x60] sm:$0xf]  ;;  %v504_v7 = vmul.f32 0.01, %v440_v27 }
 0x124   : > { %v9067_v19 = vrot.slane %v7795_v3, %v8024_v9  ;;  %v868_v20 = vor.u32 %v866_v42, %v865_v11  ;;  %v870_v51 = vrot.slane %v865_v11, 4  ;;  %v9072_v35 = vrot.slane %v872_v62, 7 }
 0x125   : > { %v5846_v12 = vrot.slane %v5838_v60, %v8024_v9  ;;  %v503_v3 = vmul.f32 0.01, %v9011_v29  ;;  %v980_v11 = vrot.slane %v9007_v58, 4 }
 0x126   : > { %11997 = vst [vmem:[#allocation69_spill] sm:$0xff] %v9067_v19  ;;  %v5839_v50 = vcombine.low %v9064_v39, %v9067_v19  ;;  %v869_v44 = vsel %vm8530_vm15, %v861_v2, %v868_v20  ;;  %v877_v16 = vor.u32 %v875_v55, %v9072_v35  ;;  %v1121_v42 = vsel %vm8009_vm3, %v870_v51, %v1120_v56 }
 0x127   : > { %v7753_v43 = vld.sshfl [vmem:[#allocation2 + $0xa0] sm:$0x33 pattern:$0x75316420]  ;;  %1119 = vst.msk [vmem:[#allocation2 + $0x58] sm:$0xf] %vm556_vm0, %v869_v44  ;;  %v535_v2 = vsel %vm471_vm10, %v9011_v29, %v503_v3  ;;  %v536_v51 = vsel %vm472_vm11, %v440_v27, %v504_v7 }
 0x128   : > { %v5853_v62 = vrot.slane %v5839_v50, %v8024_v9  ;;  %v7754_v19 = vld.sshfl [vmem:[#allocation2 + $0xa4] sm:$0x1 pattern:$0x75316420]  ;;  %v2133_v31 = vcombine.high %v7753_v43, %v7753_v43  ;;  %v9086_v60 = vrot.slane %v7753_v43, %v8024_v9  ;;  %1122 = vst [vmem:[#allocation2 + $0x5c] sm:$0x1] %v1121_v42  ;;  %v1124_v58 = vsel %vm8520_vm14, %v877_v16, %v1123_v37 }
 0x129   : > { %v7755_v55 = vld.sshfl [vmem:[#allocation2 + $0xa8] sm:$0x33 pattern:$0x75316420]  ;;  %v9093_v20 = vrot.slane %v7754_v19, %v8024_v9  ;;  %v7857_v56 = vpack.c.bf16 %v535_v2, %v535_v2  ;;  %1125 = vst [vmem:[#allocation2 + $0x60] sm:$0xf] %v1124_v58  ;;  %v7858_v29 = vpack.c.bf16 %v536_v51, %v536_v51  ;;  %v427_v19 = vmul.f32 %v8496_v18, %v8351_v13 }
 0x12a   : > { %v5854_v50 = vcombine.low %v5846_v12, %v5853_v62  ;;  %v9099_v43 = vrot.slane %v2133_v31, %v8024_v9  ;;  %v2171_v44 = vcombine.high %v7755_v55, %v7755_v55  ;;  %v9102_v42 = vrot.slane %v7755_v55, %v8024_v9  ;;  %v1169_v51 = vld [vmem:[#allocation2 + $0xb0] sm:$0x1] }
 0x12b   : > { %v982_v3 = vshrl.u32 %v7857_v56, 16  ;;  %v985_v32 = vshll.u32 %v7857_v56, 16  ;;  %v991_v62 = vshrl.u32 %v7858_v29, 16  ;;  %v994_v13 = vshll.u32 %v7858_v29, 16 }
 0x12c   : > { %11998 = vst [vmem:[#allocation70_spill] sm:$0xff] %v9099_v43  ;;  %11999 = vst [vmem:[#allocation71_spill] sm:$0xff] %v9102_v42  ;;  %6034 = vrot.lane.b32.xlu1 %v5854_v50, %s7971_s22  ;;  %v9108_v7 = vrot.slane %v2171_v44, %v8024_v9  ;;  %v2186_v31 = vcombine.high %v9102_v42, %v9102_v42  ;;  %v4315_v16 = vcombine.low %v9086_v60, %v9099_v43  ;;  %vm5292_vm10 = vcmask 195744  }
 0x12d   : > { %v7797_v27 = vcombine.high %v9086_v60, %v9099_v43  ;;  %v4317_v12 = vcombine.low %v9093_v20, %v9102_v42  ;;  %v984_v37 = vrot.slane %v982_v3, 7  ;;  %vm459_vm12 = vcmp.ge.f32.partialorder %v427_v19, 0.0 }
 0x12e   : > { %12000 = vst [vmem:[#allocation72_spill] sm:$0xff] %v9108_v7  ;;  %v4318_v2 = vcombine.low %v9108_v7, %v2186_v31  ;;  %v9120_v55 = vrot.slane %v4315_v16, %v8024_v9  ;;  %v7735_v50 = vld.sshfl [vmem:[#allocation2 + $0x58] sm:$0x33 pattern:$0x75316420]  ;;  %v9128_v42 = vrot.slane %v991_v62, 7 }
 0x12f   : > { %v9123_v58 = vrot.slane %v7797_v27, %v8024_v9  ;;  %v9126_v56 = vrot.slane %v4317_v12, %v8024_v9  ;;  %v987_v44 = vor.u32 %v985_v32, %v984_v37  ;;  %v989_v43 = vrot.slane %v984_v37, 4  ;;  %v7736_v31 = vld.sshfl [vmem:[#allocation2 + $0x5c] sm:$0x1 pattern:$0x75316420] }
 0x130   : > { %12001 = vst [vmem:[#allocation73_spill] sm:$0xff] %v9120_v55  ;;  %v9131_v29 = vrot.slane %v4318_v2, %v8024_v9  ;;  %4474 = vrot.lane.b32.xlu1 %v8906_v63, %s7967_s18  ;;  %v1761_v16 = vcombine.high %v7735_v50, %v7735_v50  ;;  %v9138_v27 = vrot.slane %v7735_v50, %v8024_v9  ;;  %v1172_v12 = vld [vmem:[#allocation2 + $0xb4] sm:$0xf]  ;;  %vm5414_vm11 = vcmask 228544  }
 0x131   : > { %12002 = vst [vmem:[#allocation74_spill] sm:$0xff] %v9123_v58  ;;  %12003 = vst [vmem:[#allocation75_spill] sm:$0xff] %v9126_v56  ;;  %v4347_v3 = vcombine.low %v9120_v55, %v9123_v58  ;;  %v7737_v7 = vld.sshfl [vmem:[#allocation2 + $0x60] sm:$0x33 pattern:$0x75316420]  ;;  %v9141_v32 = vrot.slane %v7736_v31, %v8024_v9  ;;  %v988_v37 = vsel %vm8530_vm15, %v980_v11, %v987_v44 }
 0x132   : > { %12004 = vst [vmem:[#allocation76_spill] sm:$0xff] %v9131_v29  ;;  %12005 = vst [vmem:[#allocation77_spill] sm:$0xff] %v9138_v27  ;;  %v996_v62 = vor.u32 %v994_v13, %v9128_v42  ;;  %v1170_v2 = vsel %vm8009_vm3, %v989_v43, %v1169_v51  ;;  %v4348_v63 = vcombine.low %v9126_v56, %v9131_v29  ;;  %v491_v51 = vmul.f32 0.01, %v427_v19 }
 0x133   : > { %12006 = vst [vmem:[#allocation78_spill] sm:$0xff] %v9141_v32  ;;  %v4355_v58 = vrot.slane %v4347_v3, %v8024_v9  ;;  %v9152_v50 = vrot.slane %v1761_v16, %v8024_v9  ;;  %v9155_v55 = vrot.slane %v7737_v7, %v8024_v9  ;;  %1168 = vst.msk [vmem:[#allocation2 + $0xac] sm:$0xf] %vm556_vm0, %v988_v37 }
 0x134   : > { %1171 = vst [vmem:[#allocation2 + $0xb0] sm:$0x1] %v1170_v2  ;;  %v12008_v11 = vcombine.high %v8948_v4, %v8956_v8  ;;  %v1173_v43 = vsel %vm8520_vm14, %v996_v62, %v1172_v12  ;;  %v4362_v44 = vrot.slane %v4348_v63, %v8024_v9  ;;  %v523_v37 = vsel %vm459_vm12, %v427_v19, %v491_v51 }
 0x135   : > { %12007 = vst [vmem:[#allocation79_spill] sm:$0xff] %v9152_v50  ;;  %v3973_v3 = vcombine.low %v9138_v27, %v9152_v50  ;;  %v7791_v31 = vcombine.high %v9138_v27, %v9152_v50  ;;  %v3975_v16 = vcombine.low %v9141_v32, %v9155_v55  ;;  %1174 = vst [vmem:[#allocation2 + $0xb4] sm:$0xf] %v1173_v43  ;;  %vm5649_vm12 = vcmask 261344  }
 0x136   : > { %v9162_v13 = vrot.slane %v12008_v11, %v8024_v9  ;;  %v1799_v2 = vcombine.high %v7737_v7, %v7737_v7  ;;  %v617_v11 = vld [vmem:[#allocation2 + $0xc0] sm:$0x1]  ;;  %v9174_v29 = vcombine.low %v4355_v58, %v4362_v44  ;;  %v7845_v50 = vpack.c.bf16 %v523_v37, %v523_v37 }
 0x137   : > { %v9177_v12 = vrot.slane %v3973_v3, %v8024_v9  ;;  %v9180_v63 = vrot.slane %v7791_v31, %v8024_v9  ;;  %v9183_v62 = vrot.slane %v3975_v16, %v8024_v9  ;;  %v618_v58 = vsel %vm8009_vm3, 0, %v617_v11 }
 0x138   : > { %12009 = vst [vmem:[#allocation80_spill] sm:$0xff] %v9162_v13  ;;  %12010 = vst [vmem:[#allocation81_spill] sm:$0xff] %v9174_v29  ;;  %4492 = vrot.lane.b32.xlu0 %v9174_v29, %s7967_s18  ;;  %4612 = vrot.lane.b32.xlu1 %v9174_v29, %s7968_s19  ;;  %v880_v51 = vshrl.u32 %v7845_v50, 16  ;;  %v883_v44 = vshll.u32 %v7845_v50, 16  ;;  %v9196_v3 = vrot.slane %v1799_v2, %v8024_v9  ;;  %v878_v50 = vrot.slane %v9072_v35, 4 }
 0x139   : > { %v4004_v19 = vcombine.low %v9162_v13, %v9177_v12  ;;  %v4005_v7 = vcombine.low %v9180_v63, %v9183_v62  ;;  %v1814_v31 = vcombine.high %v9155_v55, %v9155_v55  ;;  %619 = vst [vmem:[#allocation2 + $0xc0] sm:$0x1] %v618_v58 }
 0x13a   : > { %v7756_v43 = vld.sshfl [vmem:[#allocation2 + $0xac] sm:$0x33 pattern:$0x75316420]  ;;  %v882_v2 = vrot.slane %v880_v51, 7 }
 0x13b   : > { %v4012_v16 = vrot.slane %v4004_v19, %v8024_v9  ;;  %v4019_v37 = vrot.slane %v4005_v7, %v8024_v9  ;;  %v7757_v32 = vld.sshfl [vmem:[#allocation2 + $0xb0] sm:$0x1 pattern:$0x75316420]  ;;  %v2195_v27 = vcombine.high %v7756_v43, %v7756_v43  ;;  %v9203_v29 = vrot.slane %v7756_v43, %v8024_v9 }
 0x13c   : > { %v7758_v11 = vld.sshfl [vmem:[#allocation2 + $0xb4] sm:$0x33 pattern:$0x75316420]  ;;  %v9206_v13 = vrot.slane %v7757_v32, %v8024_v9  ;;  %5250 = vrot.lane.b32.xlu1 %v9013_v17, %s7970_s21  ;;  %v1127_v32 = vld [vmem:[#allocation2 + $0x68] sm:$0x1]  ;;  %v885_v43 = vor.u32 %v883_v44, %v882_v2  ;;  %v4021_v51 = vcombine.low %v9196_v3, %v1814_v31 }
 0x13d   : > { %12011 = vst [vmem:[#allocation82_spill] sm:$0xff] %v9203_v29  ;;  %v9211_v58 = vcombine.low %v4012_v16, %v4019_v37  ;;  %v9214_v19 = vrot.slane %v2195_v27, %v8024_v9  ;;  %v2233_v7 = vcombine.high %v7758_v11, %v7758_v11  ;;  %v9217_v8 = vrot.slane %v7758_v11, %v8024_v9 }
 0x13e   : > { %12012 = vst [vmem:[#allocation83_spill] sm:$0xff] %v9206_v13  ;;  %v887_v56 = vrot.slane %v882_v2, 4  ;;  %v886_v31 = vsel %vm8530_vm15, %v878_v50, %v885_v43  ;;  %v441_v50 = vmul.f32 %v8496_v18, %v8459_v33 }
 0x13f   : > { %12013 = vst [vmem:[#allocation84_spill] sm:$0xff] %v9211_v58  ;;  %12014 = vst [vmem:[#allocation85_spill] sm:$0xff] %v9214_v19  ;;  %4598 = vrot.lane.b32.xlu0 %v9211_v58, %s7968_s19  ;;  %v9227_v27 = vrot.slane %v2233_v7, %v8024_v9  ;;  %v2248_v16 = vcombine.high %v9217_v8, %v9217_v8  ;;  %v3211_v37 = vcombine.low %v9203_v29, %v9214_v19 }
 0x140   : > { %12015 = vst [vmem:[#allocation86_spill] sm:$0xff] %v9217_v8  ;;  %v7783_v44 = vcombine.high %v9203_v29, %v9214_v19  ;;  %v3213_v11 = vcombine.low %v9206_v13, %v9217_v8  ;;  %v1128_v2 = vsel %vm8009_vm3, %v887_v56, %v1127_v32  ;;  %v1815_v7 = vcombine.high %v9196_v3, %v9196_v3 }
 0x141   : > { %12016 = vst [vmem:[#allocation87_spill] sm:$0xff] %v9227_v27  ;;  %v9244_v4 = vrot.slane %v3211_v37, %v8024_v9  ;;  %v3259_v58 = vcombine.low %v9227_v27, %v2248_v16  ;;  %1126 = vst.msk [vmem:[#allocation2 + $0x64] sm:$0xf] %vm556_vm0, %v886_v31  ;;  %v9257_v56 = vrot.slane %v4021_v51, %v8024_v9  ;;  %vm473_vm13 = vcmp.ge.f32.partialorder %v441_v50, 0.0  ;;  %v664_v31 = vld [vmem:[#allocation2 + $0xbc] sm:$0x1] }
 0x142   : > { %v9247_v35 = vrot.slane %v7783_v44, %v8024_v9  ;;  %1129 = vst [vmem:[#allocation2 + $0x68] sm:$0x1] %v1128_v2  ;;  %v9254_v43 = vrot.slane %v3213_v11, %v8024_v9  ;;  %v442_v32 = vmul.f32 %v8496_v18, %v8466_v26  ;;  %v443_v37 = vmul.f32 %v8496_v18, %v8473_v34  ;;  %v622_v2 = vld [vmem:[#allocation2 + $0x14] sm:$0x1] }
 0x143   : > { %12017 = vst [vmem:[#allocation88_spill] sm:$0xff] %v9244_v4  ;;  %v9264_v16 = vrot.slane %v3259_v58, %v8024_v9  ;;  %v505_v33 = vmul.f32 0.01, %v441_v50  ;;  %v665_v8 = vsel %vm8297_vm6, 0, %v664_v31  ;;  %v997_v19 = vrot.slane %v9128_v42, 4 }
 0x144   : > { %12018 = vst [vmem:[#allocation89_spill] sm:$0xff] %v9247_v35  ;;  %12019 = vst [vmem:[#allocation90_spill] sm:$0xff] %v9254_v43  ;;  %v5147_v44 = vcombine.low %v9244_v4, %v9247_v35  ;;  %vm474_vm1 = vcmp.ge.f32.partialorder %v442_v32, 0.0  ;;  %vm475_vm2 = vcmp.ge.f32.partialorder %v443_v37, 0.0  ;;  %v506_v51 = vmul.f32 0.01, %v442_v32 }
 0x145   : > { %12020 = vst [vmem:[#allocation91_spill] sm:$0xff] %v9264_v16  ;;  %v5148_v26 = vcombine.low %v9254_v43, %v9264_v16  ;;  %v507_v58 = vmul.f32 0.01, %v443_v37  ;;  %v537_v17 = vsel %vm473_vm13, %v441_v50, %v505_v33  ;;  %666 = vst [vmem:[#allocation2 + $0xbc] sm:$0x1] %v665_v8  ;;  %v623_v4 = vsel %vm8297_vm6, 0, %v622_v2 }
 0x146   : > { %v5155_v34 = vrot.slane %v5147_v44, %v8024_v9  ;;  %v538_v13 = vsel %vm474_vm1, %v442_v32, %v506_v51  ;;  %v7859_v27 = vpack.c.bf16 %v537_v17, %v537_v17  ;;  %v5770_v44 = vcombine.low %v9177_v12, %v9180_v63  ;;  %624 = vst [vmem:[#allocation2 + $0x14] sm:$0x1] %v623_v4 }
 0x147   : > { %v5162_v11 = vrot.slane %v5148_v26, %v8024_v9  ;;  %v539_v35 = vsel %vm475_vm2, %v443_v37, %v507_v58  ;;  %v7860_v29 = vpack.c.bf16 %v538_v13, %v538_v13  ;;  %v5771_v4 = vcombine.low %v9183_v62, %v9257_v56 }
 0x148   : > { %v7738_v16 = vld.sshfl [vmem:[#allocation2 + $0x64] sm:$0x33 pattern:$0x75316420]  ;;  %v7861_v50 = vpack.c.bf16 %v539_v35, %v539_v35  ;;  %v999_v32 = vshrl.u32 %v7859_v27, 16  ;;  %v1002_v33 = vshll.u32 %v7859_v27, 16 }
 0x149   : > { %v9281_v31 = vcombine.low %v5155_v34, %v5162_v11  ;;  %v7739_v17 = vld.sshfl [vmem:[#allocation2 + $0x68] sm:$0x1 pattern:$0x75316420]  ;;  %v1823_v42 = vcombine.high %v7738_v16, %v7738_v16  ;;  %v9284_v51 = vrot.slane %v7738_v16, %v8024_v9  ;;  %v1008_v8 = vshrl.u32 %v7860_v29, 16 }
 0x14a   : > { %v9287_v13 = vrot.slane %v7739_v17, %v8024_v9  ;;  %v1001_v37 = vrot.slane %v999_v32, 7  ;;  %v1011_v2 = vshll.u32 %v7860_v29, 16  ;;  %v1016_v26 = vshrl.u32 %v7861_v50, 16 }
 0x14b   : > { %12021 = vst [vmem:[#allocation92_spill] sm:$0xff] %v9284_v51  ;;  %5268 = vrot.lane.b32.xlu0 %v9281_v31, %s7970_s21  ;;  %v9292_v12 = vrot.slane %v1823_v42, %v8024_v9  ;;  %5388 = vrot.lane.b32.xlu1 %v9281_v31, %s7969_s20  ;;  %v1010_v63 = vrot.slane %v1008_v8, 7  ;;  %v1019_v35 = vshll.u32 %v7861_v50, 16  ;;  %v12024_v32 = vcombine.high %v9155_v55, %v9196_v3 }
 0x14c   : > { %v2916_v27 = vcombine.low %v9287_v13, %v8648_v24  ;;  %v1004_v16 = vor.u32 %v1002_v33, %v1001_v37  ;;  %v1006_v29 = vrot.slane %v1001_v37, 4  ;;  %v9300_v11 = vrot.slane %v1016_v26, 7  ;;  %v1176_v37 = vld [vmem:[#allocation2 + $0xbc] sm:$0x1] }
 0x14d   : > { %12022 = vst [vmem:[#allocation93_spill] sm:$0xff] %v9292_v12  ;;  %v2869_v34 = vcombine.low %v9284_v51, %v9292_v12  ;;  %v7777_v58 = vcombine.high %v9284_v51, %v9292_v12  ;;  %v9310_v62 = vrot.slane %v12024_v32, %v8024_v9  ;;  %v4022_v50 = vcombine.low %v1815_v7, %v9284_v51  ;;  %v1179_v51 = vld [vmem:[#allocation2 + $0xc0] sm:$0xf] }
 0x14e   : > { %12023 = vst [vmem:[#allocation94_spill] sm:$0xff] %v9300_v11  ;;  %v9314_v17 = vrot.slane %v2916_v27, %v8024_v9  ;;  %v1005_v33 = vsel %vm8530_vm15, %v997_v19, %v1004_v16  ;;  %v1013_v42 = vor.u32 %v1011_v2, %v1010_v63  ;;  %v1014_v8 = vrot.slane %v1010_v63, 4 }
 0x14f   : > { %12025 = vst [vmem:[#allocation95_spill] sm:$0xff] %v9310_v62  ;;  %v9319_v26 = vrot.slane %v2869_v34, %v8024_v9  ;;  %v9322_v43 = vrot.slane %v7777_v58, %v8024_v9  ;;  %v12029_v32 = vcombine.high %v8648_v24, %v8648_v24  ;;  %v5778_v27 = vrot.slane %v5770_v44, %v8024_v9 }
 0x150   : > { %12026 = vst [vmem:[#allocation96_spill] sm:$0xff] %v9314_v17  ;;  %1175 = vst.msk [vmem:[#allocation2 + $0xb8] sm:$0xf] %vm556_vm0, %v1005_v33  ;;  %v5785_v19 = vrot.slane %v5771_v4, %v8024_v9  ;;  %v1021_v2 = vor.u32 %v1019_v35, %v9300_v11  ;;  %v1177_v63 = vsel %vm8009_vm3, %v1006_v29, %v1176_v37  ;;  %v1078_v4 = vld [vmem:[#allocation2 + $0x14] sm:$0x1]  ;;  %v768_v33 = vrot.slane %v8524_v57, 4 }
 0x151   : > { %12027 = vst [vmem:[#allocation97_spill] sm:$0xff] %v9319_v26  ;;  %12028 = vst [vmem:[#allocation98_spill] sm:$0xff] %v9322_v43  ;;  %v2917_v7 = vcombine.low %v8657_v46, %v12029_v32  ;;  %v1442_v16 = vcombine.high %v8601_v59, %v8601_v59  ;;  %v5028_v34 = vcombine.low %v9310_v62, %v9319_v26  ;;  %vm6068_vm13 = vcmask 294144  }
 0x152   : > { %v5029_v44 = vcombine.low %v9322_v43, %v9314_v17  ;;  %v9343_v58 = vrot.slane %v4022_v50, %v8024_v9  ;;  %1178 = vst [vmem:[#allocation2 + $0xbc] sm:$0x1] %v1177_v63  ;;  %v1022_v35 = vsel %vm8530_vm15, %v1014_v8, %v1021_v2  ;;  %v1180_v29 = vsel %vm8520_vm14, %v1013_v42, %v1179_v51 }
 0x153   : > { %v1443_v37 = vcombine.high %v8619_v6, %v8619_v6  ;;  %v1839_v32 = vcombine.high %v9292_v12, %v9292_v12  ;;  %v5036_v24 = vrot.slane %v5028_v34, %v8024_v9  ;;  %1181 = vst [vmem:[#allocation2 + $0xc0] sm:$0xf] %v1180_v29  ;;  %1182 = vst.msk [vmem:[#allocation2 + $0xc4] sm:$0xf] %vm556_vm0, %v1022_v35  ;;  %v625_v35 = vld [vmem:[#allocation2 + $0x20] sm:$0x1] }
 0x154   : > { %12030 = vst [vmem:[#allocation99_spill] sm:$0xff] %v9343_v58  ;;  %v5043_v50 = vrot.slane %v5029_v44, %v8024_v9  ;;  %v1466_v8 = vcombine.high %v8610_v5, %v8610_v5  ;;  %v9360_v51 = vrot.slane %v2917_v7, %v8024_v9  ;;  %v1079_v57 = vsel %vm8009_vm3, %v768_v33, %v1078_v4 }
 0x155   : > { %v1380_v42 = vcombine.high %v8583_v45, %v8583_v45  ;;  %v1381_v2 = vcombine.high %v8598_v21, %v8598_v21  ;;  %v4053_v34 = vcombine.low %v9257_v56, %v9343_v58  ;;  %1080 = vst [vmem:[#allocation2 + $0x14] sm:$0x1] %v1079_v57  ;;  %v3679_v44 = vcombine.low %v8619_v6, %v1442_v16 }
 0x156   : > { %12031 = vst [vmem:[#allocation100_spill] sm:$0xff] %v9360_v51  ;;  %v9368_v63 = vcombine.low %v5036_v24, %v5043_v50  ;;  %v1404_v7 = vcombine.high %v8590_v41, %v8590_v41  ;;  %v2475_v4 = vcombine.low %v8055_v22, %v8583_v45  ;;  %v5786_v29 = vcombine.low %v5778_v27, %v5785_v19 }
 0x157   : > { %v7759_v33 = vld.sshfl [vmem:[#allocation2 + $0xb8] sm:$0x33 pattern:$0x75316420]  ;;  %v3680_v43 = vcombine.low %v1443_v37, %v8610_v5  ;;  %v3681_v24 = vcombine.low %v8627_v15, %v1466_v8  ;;  %v9382_v56 = vcombine.low %v1839_v32, %v9287_v13  ;;  %v2476_v45 = vcombine.low %v8598_v21, %v1380_v42 }
 0x158   : > { %12032 = vst [vmem:[#allocation101_spill] sm:$0xff] %v9368_v63  ;;  %5374 = vrot.lane.b32.xlu0 %v9368_v63, %s7969_s20  ;;  %v2257_v6 = vcombine.high %v7759_v33, %v7759_v33  ;;  %v9387_v16 = vrot.slane %v7759_v33, %v8024_v9  ;;  %v2477_v5 = vcombine.low %v1381_v2, %v8590_v41  ;;  %v626_v19 = vsel %vm8297_vm6, 0, %v625_v35  ;;  %v12097_v63 = vld [vmem:[#allocation69_spill] sm:$0xff] }
 0x159   : > { %12033 = vst [vmem:[#allocation102_spill] sm:$0xff] %v9382_v56  ;;  %v7760_v22 = vld.sshfl [vmem:[#allocation2 + $0xbc] sm:$0x1 pattern:$0x75316420]  ;;  %v2478_v27 = vcombine.low %v8607_v28, %v1404_v7  ;;  %v9395_v13 = vrot.slane %v4053_v34, %v8024_v9  ;;  %v9404_v8 = vrot.slane %v3679_v44, %v8024_v9  ;;  %v9407_v41 = vrot.slane %v3680_v43, %v8024_v9 }
 0x15a   : > { %v9398_v37 = vrot.slane %v2257_v6, %v8024_v9  ;;  %v9401_v32 = vrot.slane %v7760_v22, %v8024_v9  ;;  %627 = vst [vmem:[#allocation2 + $0x20] sm:$0x1] %v626_v19  ;;  %v7761_v21 = vld.sshfl [vmem:[#allocation2 + $0xc0] sm:$0x33 pattern:$0x75316420]  ;;  %v9410_v57 = vrot.slane %v3681_v24, %v8024_v9  ;;  %v1405_v42 = vcombine.high %v8607_v28, %v8607_v28 }
 0x15b   : > { %12034 = vst [vmem:[#allocation103_spill] sm:$0xff] %v9395_v13  ;;  %v9415_v2 = vrot.slane %v2475_v4, %v8024_v9  ;;  %v2295_v34 = vcombine.high %v7761_v21, %v7761_v21  ;;  %v9419_v44 = vrot.slane %v7761_v21, %v8024_v9  ;;  %v9426_v33 = vrot.slane %v2476_v45, %v8024_v9  ;;  %v646_v56 = vld [vmem:[#allocation2 + $0x74] sm:$0x1] }
 0x15c   : > { %6026 = vrot.lane.b32.xlu0 %v5786_v29, %s7971_s22  ;;  %v4414_v7 = vcombine.low %v9387_v16, %v9398_v37  ;;  %v7799_v43 = vcombine.high %v9387_v16, %v9398_v37  ;;  %v7718_v35 = vld.sshfl [vmem:[#allocation2 + $0x14] sm:$0x1 pattern:$0x75316420]  ;;  %v9429_v28 = vrot.slane %v2477_v5, %v8024_v9  ;;  %v9432_v4 = vrot.slane %v2478_v27, %v8024_v9 }
 0x15d   : > { %v785_v29 = vrot.slane %v8534_v0, 4  ;;  %v9436_v24 = vrot.slane %v2295_v34, %v8024_v9  ;;  %v2310_v6 = vcombine.high %v9419_v44, %v9419_v44  ;;  %v4416_v22 = vcombine.low %v9401_v32, %v9419_v44 }
 0x15e   : > { %v9443_v45 = vrot.slane %v4414_v7, %v8024_v9  ;;  %v4437_v5 = vrot.slane %v7799_v43, %v8024_v9  ;;  %v1419_v19 = vrot.slane %v7718_v35, %v8024_v9  ;;  %v1504_v0 = vcombine.high %v8739_v38, %v8739_v38 }
 0x15f   : > { %v4444_v21 = vrot.slane %v4416_v22, %v8024_v9  ;;  %v4535_v34 = vcombine.low %v9436_v24, %v2310_v6  ;;  %v3711_v50 = vcombine.low %v9407_v41, %v9410_v57  ;;  %v1505_v7 = vcombine.high %v8749_v36, %v8749_v36 }
 0x160   : > { %v5923_v43 = vcombine.low %v9443_v45, %v4437_v5  ;;  %v3678_v35 = vcombine.low %v1419_v19, %v8601_v59  ;;  %v2524_v26 = vcombine.low %v1405_v42, %v1419_v19  ;;  %v4892_v27 = vcombine.low %v9426_v33, %v9429_v28 }
 0x161   : > { %v1085_v58 = vld [vmem:[#allocation2 + $0x20] sm:$0x1]  ;;  %v4446_v11 = vcombine.low %v4437_v5, %v4444_v21  ;;  %v9462_v22 = vrot.slane %v4535_v34, %v8024_v9  ;;  %v1528_v62 = vcombine.high %v8752_v40, %v8752_v40  ;;  %v2575_v5 = vcombine.low %v8749_v36, %v1504_v0 }
 0x162   : > { %v1086_v6 = vsel %vm8009_vm3, %v785_v29, %v1085_v58  ;;  %v3688_v13 = vrot.slane %v3678_v35, %v8024_v9  ;;  %v9472_v42 = vrot.slane %v2524_v26, %v8024_v9  ;;  %v5931_v34 = vrot.slane %v5923_v43, %v8024_v9 }
 0x163   : > { %12035 = vst [vmem:[#allocation104_spill] sm:$0xff] %v9462_v22  ;;  %1087 = vst [vmem:[#allocation2 + $0x20] sm:$0x1] %v1086_v6  ;;  %v5924_v19 = vcombine.low %v4444_v21, %v9462_v22  ;;  %v3725_v58 = vrot.slane %v3711_v50, %v8024_v9  ;;  %v2576_v29 = vcombine.low %v1505_v7, %v8752_v40  ;;  %v12043_v22 = vld [vmem:[#allocation45_spill] sm:$0xff]  ;;  %vm6132_vm1 = vcmask 293888  }
 0x164   : > { %12036 = vst [vmem:[#allocation105_spill] sm:$0xff] %v9472_v42  ;;  %v9480_v35 = vrot.slane %v4446_v11, %v8024_v9  ;;  %v3710_v59 = vcombine.low %v3688_v13, %v9404_v8  ;;  %v4893_v26 = vcombine.low %v9432_v4, %v9472_v42  ;;  %v4900_v6 = vrot.slane %v4892_v27, %v8024_v9 }
 0x165   : > { %v5938_v36 = vrot.slane %v5924_v19, %v8024_v9  ;;  %v9490_v50 = vrot.slane %v2576_v29, %v8024_v9  ;;  %v2622_v40 = vcombine.low %v8763_v25, %v1528_v62  ;;  %v9496_v13 = vrot.slane %v2575_v5, %v8024_v9 }
 0x166   : > { %v3718_v11 = vrot.slane %v3710_v59, %v8024_v9  ;;  %v4907_v21 = vrot.slane %v4893_v26, %v8024_v9  ;;  %v647_v27 = vsel %vm8297_vm6, 0, %v646_v56  ;;  %v904_v19 = vrot.slane %v8549_v54, 4  ;;  %v649_v56 = vld [vmem:[#allocation2 + $0x80] sm:$0x1] }
 0x167   : > { %12037 = vst [vmem:[#allocation106_spill] sm:$0xff] %v9490_v50  ;;  %12038 = vst [vmem:[#allocation107_spill] sm:$0xff] %v9496_v13  ;;  %v5939_v7 = vcombine.low %v5931_v34, %v5938_v36  ;;  %v9501_v43 = vrot.slane %v2622_v40, %v8024_v9  ;;  %v1938_v5 = vcombine.high %v8856_v14, %v8856_v14  ;;  %vm7584_vm2 = vcmask 64512  }
 0x168   : > { %648 = vst [vmem:[#allocation2 + $0x74] sm:$0x1] %v647_v27  ;;  %v9506_v29 = vcombine.low %v3718_v11, %v3725_v58  ;;  %v4908_v59 = vcombine.low %v4900_v6, %v4907_v21  ;;  %v1939_v26 = vcombine.high %v8864_v47, %v8864_v47  ;;  %v1962_v54 = vcombine.high %v8867_v30, %v8867_v30  ;;  %v12041_v27 = vld [vmem:[#allocation34_spill] sm:$0xff] }
 0x169   : > { %12039 = vst [vmem:[#allocation108_spill] sm:$0xff] %v9501_v43  ;;  %6044 = vrot.lane.b32.xlu1 %v5939_v7, %s7971_s22  ;;  %v4927_v36 = vcombine.low %v9490_v50, %v9501_v43  ;;  %v1467_v58 = vcombine.high %v8627_v15, %v8627_v15  ;;  %v5668_v6 = vcombine.low %v9404_v8, %v9407_v41  ;;  %v12042_v7 = vld [vmem:[#allocation32_spill] sm:$0xff]  ;;  %v650_v8 = vsel %vm8297_vm6, 0, %v649_v56  ;;  %v12047_v56 = vld [vmem:[#allocation33_spill] sm:$0xff] }
 0x16a   : > { %12040 = vst [vmem:[#allocation109_spill] sm:$0xff] %v9506_v29  ;;  %v7721_v34 = vld.sshfl [vmem:[#allocation2 + $0x20] sm:$0x1 pattern:$0x75316420]  ;;  %5238 = vrot.lane.b32.xlu0 %v4908_v59, %s7970_s21  ;;  %v4120_v11 = vcombine.low %v8864_v47, %v1938_v5  ;;  %v4121_v21 = vcombine.low %v1939_v26, %v8867_v30  ;;  %v3760_v0 = vcombine.low %v12042_v7, %v12041_v27  ;;  %v12050_v27 = vld [vmem:[#allocation11_spill] sm:$0xff] }
 0x16b   : > { %v1481_v40 = vrot.slane %v7721_v34, %v8024_v9  ;;  %v4941_v62 = vrot.slane %v4927_v36, %v8024_v9  ;;  %v4122_v43 = vcombine.low %v12043_v22, %v1962_v54  ;;  %v9530_v15 = vrot.slane %v5668_v6, %v8024_v9  ;;  %651 = vst [vmem:[#allocation2 + $0x80] sm:$0x1] %v650_v8  ;;  %v581_v5 = vld [vmem:[#allocation2 + $0x30] sm:$0x1] }
 0x16c   : > { %v9536_v59 = vrot.slane %v4120_v11, %v8024_v9  ;;  %v9539_v47 = vrot.slane %v4121_v21, %v8024_v9  ;;  %v3774_v34 = vrot.slane %v3760_v0, %v8024_v9  ;;  %v921_v36 = vrot.slane %v12047_v56, 4  ;;  %v12049_v11 = vld [vmem:[#allocation10_spill] sm:$0xff] }
 0x16d   : > { %v2574_v41 = vcombine.low %v1481_v40, %v8739_v38  ;;  %v3727_v30 = vcombine.low %v1467_v58, %v1481_v40  ;;  %4586 = vrot.lane.b32.xlu1 %v9506_v29, %s7968_s19  ;;  %v9544_v26 = vrot.slane %v4122_v43, %v8024_v9  ;;  %v4201_v40 = vcombine.low %v9057_v49, %v9064_v39  ;;  %v12051_v39 = vld [vmem:[#allocation31_spill] sm:$0xff] }
 0x16e   : > { %12044 = vst [vmem:[#allocation34_spill] sm:$0xff] %v9536_v59  ;;  %12045 = vst [vmem:[#allocation32_spill] sm:$0xff] %v9539_v47  ;;  %v418_v43 = vmul.f32 %v8496_v18, %v12049_v11  ;;  %v419_v7 = vmul.f32 %v8496_v18, %v12050_v27  ;;  %v582_v8 = vsel %vm8009_vm3, 0, %v581_v5 }
 0x16f   : > { %12046 = vst [vmem:[#allocation45_spill] sm:$0xff] %v9544_v26  ;;  %v9551_v54 = vrot.slane %v2574_v41, %v8024_v9  ;;  %v1134_v6 = vld [vmem:[#allocation2 + $0x74] sm:$0x1]  ;;  %v3737_v58 = vrot.slane %v3727_v30, %v8024_v9  ;;  %v4152_v21 = vcombine.low %v9539_v47, %v9544_v26  ;;  %v9571_v56 = vrot.slane %v4201_v40, %v8024_v9 }
 0x170   : > { %v1135_v0 = vsel %vm8009_vm3, %v904_v19, %v1134_v6  ;;  %583 = vst [vmem:[#allocation2 + $0x30] sm:$0x1] %v582_v8  ;;  %v628_v19 = vld [vmem:[#allocation2 + $0x2c] sm:$0x1]  ;;  %vm450_vm5 = vcmp.ge.f32.partialorder %v418_v43, 0.0  ;;  %vm451_vm7 = vcmp.ge.f32.partialorder %v419_v7, 0.0 }
 0x171   : > { %12048 = vst [vmem:[#allocation33_spill] sm:$0xff] %v9551_v54  ;;  %v4926_v41 = vcombine.low %v9551_v54, %v9496_v13  ;;  %1136 = vst [vmem:[#allocation2 + $0x74] sm:$0x1] %v1135_v0  ;;  %v5669_v49 = vcombine.low %v9410_v57, %v3737_v58  ;;  %v3759_v30 = vcombine.low %v3737_v58, %v12051_v39  ;;  %v482_v11 = vmul.f32 0.01, %v418_v43  ;;  %v12052_v8 = vld [vmem:[#allocation15_spill] sm:$0xff] }
 0x172   : > { %v9574_v6 = vrot.slane %v4152_v21, %v8024_v9  ;;  %v483_v57 = vmul.f32 0.01, %v419_v7  ;;  %v1141_v38 = vld [vmem:[#allocation2 + $0x80] sm:$0x1]  ;;  %v629_v40 = vsel %vm8297_vm6, 0, %v628_v19  ;;  %v802_v39 = vrot.slane %v12052_v8, 4 }
 0x173   : > { %v4934_v5 = vrot.slane %v4926_v41, %v8024_v9  ;;  %v5683_v27 = vrot.slane %v5669_v49, %v8024_v9  ;;  %v3767_v0 = vrot.slane %v3759_v30, %v8024_v9  ;;  %v514_v58 = vsel %vm450_vm5, %v418_v43, %v482_v11  ;;  %630 = vst [vmem:[#allocation2 + $0x2c] sm:$0x1] %v629_v40  ;;  %v12054_v19 = vld [vmem:[#allocation65_spill] sm:$0xff]  ;;  %v12055_v8 = vld [vmem:[#allocation66_spill] sm:$0xff] }
 0x174   : > { %v2000_v21 = vcombine.high %v9016_v10, %v9016_v10  ;;  %v1142_v49 = vsel %vm8009_vm3, %v921_v36, %v1141_v38  ;;  %v515_v43 = vsel %vm451_vm7, %v419_v7, %v483_v57  ;;  %v7836_v30 = vpack.c.bf16 %v514_v58, %v514_v58  ;;  %v12056_v36 = vld [vmem:[#allocation13_spill] sm:$0xff]  ;;  %v12057_v57 = vld [vmem:[#allocation67_spill] sm:$0xff] }
 0x175   : > { %v9584_v26 = vcombine.low %v4934_v5, %v4941_v62  ;;  %v5684_v47 = vcombine.low %v9530_v15, %v5683_v27  ;;  %v9587_v41 = vcombine.low %v3767_v0, %v3774_v34  ;;  %1143 = vst [vmem:[#allocation2 + $0x80] sm:$0x1] %v1142_v49  ;;  %v2001_v11 = vcombine.high %v12054_v19, %v12054_v19  ;;  %v12061_v34 = vld [vmem:[#allocation14_spill] sm:$0xff] }
 0x176   : > { %v2024_v13 = vcombine.high %v12055_v8, %v12055_v8  ;;  %v7837_v62 = vpack.c.bf16 %v515_v43, %v515_v43  ;;  %v3016_v15 = vcombine.low %v12054_v19, %v2000_v21  ;;  %v434_v38 = vmul.f32 %v8496_v18, %v12056_v36 }
 0x177   : > { %12053 = vst [vmem:[#allocation10_spill] sm:$0xff] %v9587_v41  ;;  %5362 = vrot.lane.b32.xlu1 %v9584_v26, %s7969_s20  ;;  %v804_v5 = vshrl.u32 %v7836_v30, 16  ;;  %v807_v27 = vshll.u32 %v7836_v30, 16  ;;  %v3017_v0 = vcombine.low %v2001_v11, %v12055_v8  ;;  %v435_v30 = vmul.f32 %v8496_v18, %v12061_v34  ;;  %v652_v34 = vld [vmem:[#allocation2 + $0x8c] sm:$0x1] }
 0x178   : > { %v7742_v7 = vld.sshfl [vmem:[#allocation2 + $0x74] sm:$0x1 pattern:$0x75316420]  ;;  %v3063_v58 = vcombine.low %v12057_v57, %v2024_v13  ;;  %v812_v49 = vshrl.u32 %v7837_v62, 16  ;;  %v815_v50 = vshll.u32 %v7837_v62, 16  ;;  %v9607_v43 = vrot.slane %v3016_v15, %v8024_v9 }
 0x179   : > { %v1915_v40 = vrot.slane %v7742_v7, %v8024_v9  ;;  %v806_v21 = vrot.slane %v804_v5, 7  ;;  %v9610_v19 = vrot.slane %v3017_v0, %v8024_v9  ;;  %v12062_v13 = vcombine.high %v8674_v61, %v8674_v61  ;;  %v1095_v15 = vld [vmem:[#allocation2 + $0x30] sm:$0xf] }
 0x17a   : > { %12058 = vst [vmem:[#allocation11_spill] sm:$0xff] %v9607_v43  ;;  %v9613_v36 = vrot.slane %v3063_v58, %v8024_v9  ;;  %v9624_v62 = vrot.slane %v812_v49, 7  ;;  %vm466_vm8 = vcmp.ge.f32.partialorder %v434_v38, 0.0  ;;  %v605_v7 = vld [vmem:[#allocation2 + $0x90] sm:$0x1]  ;;  %vm467_vm9 = vcmp.ge.f32.partialorder %v435_v30, 0.0 }
 0x17b   : > { %12059 = vst [vmem:[#allocation31_spill] sm:$0xff] %v9610_v19  ;;  %v9620_v11 = vcombine.low %v12062_v13, %v1915_v40  ;;  %v4119_v8 = vcombine.low %v1915_v40, %v8856_v14  ;;  %6014 = vrot.lane.b32.xlu1 %v5684_v47, %s7971_s22  ;;  %v809_v5 = vor.u32 %v807_v27, %v806_v21  ;;  %v810_v0 = vrot.slane %v806_v21, 4  ;;  %v1092_v58 = vld [vmem:[#allocation2 + $0x2c] sm:$0x1] }
 0x17c   : > { %12060 = vst [vmem:[#allocation15_spill] sm:$0xff] %v9613_v36  ;;  %v5080_v18 = vcombine.low %v9610_v19, %v9613_v36  ;;  %v7745_v54 = vld.sshfl [vmem:[#allocation2 + $0x80] sm:$0x1 pattern:$0x75316420]  ;;  %v817_v14 = vor.u32 %v815_v50, %v9624_v62  ;;  %v1093_v47 = vsel %vm8009_vm3, %v802_v39, %v1092_v58 }
 0x17d   : > { %12063 = vst [vmem:[#allocation65_spill] sm:$0xff] %v9620_v11  ;;  %v9629_v13 = vrot.slane %v4119_v8, %v8024_v9  ;;  %v498_v40 = vmul.f32 0.01, %v434_v38  ;;  %v1977_v49 = vrot.slane %v7745_v54, %v8024_v9  ;;  %1094 = vst [vmem:[#allocation2 + $0x2c] sm:$0x1] %v1093_v47  ;;  %v1096_v27 = vsel %vm8520_vm14, %v809_v5, %v1095_v15 }
 0x17e   : > { %v5094_v21 = vrot.slane %v5080_v18, %v8024_v9  ;;  %v499_v53 = vmul.f32 0.01, %v435_v30  ;;  %v818_v50 = vsel %vm8530_vm15, %v810_v0, %v817_v14  ;;  %1097 = vst [vmem:[#allocation2 + $0x30] sm:$0xf] %v1096_v27  ;;  %v606_v54 = vsel %vm8009_vm3, 0, %v605_v7 }
 0x17f   : > { %12064 = vst [vmem:[#allocation66_spill] sm:$0xff] %v9629_v13  ;;  %v4151_v8 = vcombine.low %v9629_v13, %v9536_v59  ;;  %4466 = vrot.lane.b32.xlu1 %v9506_v29, %s7967_s18  ;;  %v530_v39 = vsel %vm466_vm8, %v434_v38, %v498_v40  ;;  %v584_v58 = vld [vmem:[#allocation2 + $0x3c] sm:$0x1]  ;;  %v12065_v15 = vcombine.high %v12043_v22, %v12043_v22  ;;  %1098 = vst.msk [vmem:[#allocation2 + $0x34] sm:$0xf] %vm556_vm0, %v818_v50  ;;  %v12066_v40 = vld [vmem:[#allocation56_spill] sm:$0xff] }
 0x180   : > { %v3015_v18 = vcombine.low %v1977_v49, %v9016_v10  ;;  %v531_v47 = vsel %vm467_vm9, %v435_v30, %v499_v53  ;;  %607 = vst [vmem:[#allocation2 + $0x90] sm:$0x1] %v606_v54  ;;  %v653_v0 = vsel %vm8297_vm6, 0, %v652_v34  ;;  %v7852_v14 = vpack.c.bf16 %v530_v39, %v530_v39  ;;  %v631_v59 = vld [vmem:[#allocation2 + $0x38] sm:$0x1] }
 0x181   : > { %v4168_v5 = vcombine.low %v12065_v15, %v1977_v49  ;;  %v4159_v38 = vrot.slane %v4151_v8, %v8024_v9  ;;  %654 = vst [vmem:[#allocation2 + $0x8c] sm:$0x1] %v653_v0  ;;  %v7853_v7 = vpack.c.bf16 %v531_v47, %v531_v47  ;;  %v938_v27 = vrot.slane %v12066_v40, 4  ;;  %v12070_v39 = vld [vmem:[#allocation68_spill] sm:$0xff] }
 0x182   : > { %v9661_v50 = vrot.slane %v3015_v18, %v8024_v9  ;;  %v585_v10 = vsel %vm8009_vm3, 0, %v584_v58  ;;  %v940_v34 = vshrl.u32 %v7852_v14, 16  ;;  %v943_v49 = vshll.u32 %v7852_v14, 16  ;;  %v12071_v0 = vld [vmem:[#allocation36_spill] sm:$0xff]  ;;  %v12072_v14 = vld [vmem:[#allocation38_spill] sm:$0xff] }
 0x183   : > { %v9658_v22 = vrot.slane %v4168_v5, %v8024_v9  ;;  %v9668_v30 = vcombine.low %v4159_v38, %v9574_v6  ;;  %v948_v8 = vshrl.u32 %v7853_v7, 16  ;;  %586 = vst [vmem:[#allocation2 + $0x3c] sm:$0x1] %v585_v10  ;;  %v951_v5 = vshll.u32 %v7853_v7, 16 }
 0x184   : > { %12068 = vst [vmem:[#allocation67_spill] sm:$0xff] %v9661_v50  ;;  %v5079_v15 = vcombine.low %v9661_v50, %v9607_v43  ;;  %v632_v18 = vsel %vm8297_vm6, 0, %v631_v59  ;;  %v7724_v6 = vld.sshfl [vmem:[#allocation2 + $0x2c] sm:$0x1 pattern:$0x75316420] }
 0x185   : > { %12067 = vst [vmem:[#allocation13_spill] sm:$0xff] %v9658_v22  ;;  %12069 = vst [vmem:[#allocation14_spill] sm:$0xff] %v9668_v30  ;;  %v4200_v54 = vcombine.low %v9658_v22, %v12070_v39  ;;  %4484 = vrot.lane.b32.xlu0 %v9668_v30, %s7967_s18  ;;  %4604 = vrot.lane.b32.xlu1 %v9668_v30, %s7968_s19  ;;  %v942_v58 = vrot.slane %v940_v34, 7  ;;  %v9680_v47 = vrot.slane %v948_v8, 7  ;;  %v819_v53 = vrot.slane %v9624_v62, 4 }
 0x186   : > { %633 = vst [vmem:[#allocation2 + $0x38] sm:$0x1] %v632_v18  ;;  %v7725_v59 = vld.sshfl [vmem:[#allocation2 + $0x30] sm:$0x33 pattern:$0x75316420]  ;;  %v1543_v10 = vrot.slane %v7724_v6, %v8024_v9  ;;  %v5087_v39 = vrot.slane %v5079_v15, %v8024_v9 }
 0x187   : > { %v4208_v40 = vrot.slane %v4200_v54, %v8024_v9  ;;  %v7726_v22 = vld.sshfl [vmem:[#allocation2 + $0x34] sm:$0x33 pattern:$0x75316420]  ;;  %v1551_v34 = vcombine.high %v7725_v59, %v7725_v59  ;;  %v1558_v8 = vrot.slane %v7725_v59, %v8024_v9  ;;  %v945_v18 = vor.u32 %v943_v49, %v942_v58  ;;  %v12075_v49 = vld [vmem:[#allocation26_spill] sm:$0xff] }
 0x188   : > { %v946_v13 = vrot.slane %v942_v58, 4  ;;  %v1582_v7 = vrot.slane %v7726_v22, %v8024_v9  ;;  %v9695_v42 = vcombine.low %v5087_v39, %v5094_v21  ;;  %v1575_v54 = vcombine.high %v7726_v22, %v7726_v22  ;;  %v1148_v30 = vld [vmem:[#allocation2 + $0x8c] sm:$0x1]  ;;  %v608_v39 = vld [vmem:[#allocation2 + $0x9c] sm:$0x1] }
 0x189   : > { %v9692_v38 = vcombine.low %v4208_v40, %v9571_v56  ;;  %4468 = vrot.lane.b32.xlu0 %v9587_v41, %s7967_s18  ;;  %v1565_v62 = vrot.slane %v1551_v34, %v8024_v9  ;;  %v1566_v15 = vcombine.high %v1558_v8, %v1558_v8  ;;  %v3777_v6 = vcombine.low %v1543_v10, %v1558_v8 }
 0x18a   : > { %12074 = vst [vmem:[#allocation68_spill] sm:$0xff] %v9695_v42  ;;  %4588 = vrot.lane.b32.xlu1 %v9587_v41, %s7968_s19  ;;  %v824_v58 = vshll.u32 %v12075_v49, 16  ;;  %v9704_v56 = vrot.slane %v1575_v54, %v8024_v9  ;;  %v12076_v21 = vcombine.high %v8763_v25, %v8763_v25  ;;  %v953_v40 = vor.u32 %v951_v5, %v9680_v47  ;;  %v1151_v49 = vld [vmem:[#allocation2 + $0x90] sm:$0xf] }
 0x18b   : > { %12073 = vst [vmem:[#allocation56_spill] sm:$0xff] %v9692_v38  ;;  %v1149_v59 = vsel %vm8009_vm3, %v938_v27, %v1148_v30  ;;  %v1567_v34 = vcombine.high %v1565_v62, %v1565_v62  ;;  %v3778_v43 = vcombine.low %v1565_v62, %v1566_v15  ;;  %v3793_v19 = vrot.slane %v3777_v6, %v8024_v9  ;;  %v12078_v15 = vld [vmem:[#allocation35_spill] sm:$0xff] }
 0x18c   : > { %v2623_v22 = vcombine.low %v12076_v21, %v1543_v10  ;;  %v2624_v50 = vcombine.low %v1558_v8, %v1565_v62  ;;  %1150 = vst [vmem:[#allocation2 + $0x8c] sm:$0x1] %v1149_v59  ;;  %v7772_v12 = vcombine.high %v1558_v8, %v1565_v62  ;;  %v2671_v25 = vcombine.low %v1582_v7, %v9704_v56  ;;  %v1102_v21 = vld [vmem:[#allocation2 + $0x3c] sm:$0xf] }
 0x18d   : > { %v954_v5 = vsel %vm8530_vm15, %v946_v13, %v953_v40  ;;  %v1099_v10 = vld [vmem:[#allocation2 + $0x38] sm:$0x1]  ;;  %4606 = vrot.lane.b32.xlu0 %v9692_v38, %s7968_s19  ;;  %v3779_v27 = vcombine.low %v1567_v34, %v1582_v7  ;;  %v3800_v30 = vrot.slane %v3778_v43, %v8024_v9  ;;  %v3808_v6 = vcombine.low %v12078_v15, %v3793_v19  ;;  %v12081_v59 = vld [vmem:[#allocation29_spill] sm:$0xff] }
 0x18e   : > { %v9714_v54 = vrot.slane %v2623_v22, %v8024_v9  ;;  %5242 = vrot.lane.b32.xlu1 %v9584_v26, %s7970_s21  ;;  %1154 = vst.msk [vmem:[#allocation2 + $0x94] sm:$0xf] %vm556_vm0, %v954_v5  ;;  %v609_v8 = vsel %vm8009_vm3, 0, %v608_v39  ;;  %v9729_v48 = vrot.slane %v2624_v50, %v8024_v9  ;;  %v9732_v13 = vrot.slane %v7772_v12, %v8024_v9 }
 0x18f   : > { %v9735_v62 = vrot.slane %v2671_v25, %v8024_v9  ;;  %v1152_v43 = vsel %vm8520_vm14, %v945_v18, %v1151_v49  ;;  %610 = vst [vmem:[#allocation2 + $0x9c] sm:$0x1] %v609_v8  ;;  %v3807_v22 = vrot.slane %v3779_v27, %v8024_v9  ;;  %v3816_v40 = vrot.slane %v3808_v6, %v8024_v9  ;;  %v655_v25 = vld [vmem:[#allocation2 + $0x98] sm:$0x1] }
 0x190   : > { %12077 = vst [vmem:[#allocation36_spill] sm:$0xff] %v9714_v54  ;;  %12079 = vst [vmem:[#allocation38_spill] sm:$0xff] %v9729_v48  ;;  %v826_v39 = vor.u32 %v824_v58, %v12081_v59  ;;  %v1100_v50 = vsel %vm8009_vm3, %v819_v53, %v1099_v10  ;;  %v4943_v12 = vcombine.low %v9714_v54, %v9729_v48  ;;  %vm3358_vm0 = vsmask.f32 7424 }
 0x191   : > { %12080 = vst [vmem:[#allocation26_spill] sm:$0xff] %v9732_v13  ;;  %1153 = vst [vmem:[#allocation2 + $0x90] sm:$0xf] %v1152_v43  ;;  %v4944_v34 = vcombine.low %v9732_v13, %v9735_v62  ;;  %v7773_v18 = vcombine.high %v1582_v7, %v9704_v56  ;;  %v1590_v49 = vcombine.high %v1582_v7, %v1582_v7  ;;  %vm4873_vm15 = vcmask 162944  }
 0x192   : > { %1101 = vst [vmem:[#allocation2 + $0x38] sm:$0x1] %v1100_v50  ;;  %v3809_v5 = vcombine.low %v3800_v30, %v3807_v22  ;;  %5380 = vrot.lane.b32.xlu1 %v9695_v42, %s7969_s20  ;;  %v1103_v58 = vsel %vm8520_vm14, %v826_v39, %v1102_v21  ;;  %v5702_v27 = vcombine.low %v3793_v19, %v3800_v30  ;;  %v656_v30 = vsel %vm8297_vm6, 0, %v655_v25 }
 0x193   : > { %v4951_v10 = vrot.slane %v4943_v12, %v8024_v9  ;;  %v4958_v15 = vrot.slane %v4944_v34, %v8024_v9  ;;  %v7748_v6 = vld.sshfl [vmem:[#allocation2 + $0x8c] sm:$0x1 pattern:$0x75316420]  ;;  %1104 = vst [vmem:[#allocation2 + $0x3c] sm:$0xf] %v1103_v58  ;;  %v9758_v7 = vrot.slane %v7773_v18, %v8024_v9  ;;  %v3825_v8 = vcombine.low %v9704_v56, %v1590_v49 }
 0x194   : > { %v3823_v43 = vrot.slane %v3809_v5, %v8024_v9  ;;  %v2039_v59 = vrot.slane %v7748_v6, %v8024_v9  ;;  %v9764_v19 = vrot.slane %v5702_v27, %v8024_v9  ;;  %657 = vst [vmem:[#allocation2 + $0x98] sm:$0x1] %v656_v30  ;;  %v12084_v25 = vcombine.high %v12057_v57, %v12057_v57 }
 0x195   : > { %v9768_v21 = vcombine.low %v4951_v10, %v4958_v15  ;;  %v7750_v39 = vld.sshfl [vmem:[#allocation2 + $0x94] sm:$0x33 pattern:$0x75316420]  ;;  %v9773_v12 = vrot.slane %v3825_v8, %v8024_v9  ;;  %v12085_v15 = vld [vmem:[#allocation62_spill] sm:$0xff]  ;;  %v12088_v30 = vcombine.high %v12072_v14, %v12072_v14 }
 0x196   : > { %v9776_v18 = vcombine.low %v3816_v40, %v3823_v43  ;;  %v2071_v49 = vcombine.high %v7750_v39, %v7750_v39  ;;  %v9779_v5 = vrot.slane %v7750_v39, %v8024_v9  ;;  %v3064_v58 = vcombine.low %v12084_v25, %v2039_v59  ;;  %v12087_v43 = vld [vmem:[#allocation37_spill] sm:$0xff] }
 0x197   : > { %12082 = vst [vmem:[#allocation35_spill] sm:$0xff] %v9768_v21  ;;  %5364 = vrot.lane.b32.xlu1 %v9768_v21, %s7969_s20  ;;  %v5703_v10 = vcombine.low %v3807_v22, %v9773_v12  ;;  %v960_v6 = vshll.u32 %v12085_v15, 16  ;;  %v12086_v40 = vcombine.high %v12071_v0, %v12071_v0  ;;  %v9798_v57 = vcombine.low %v12088_v30, %v12087_v43  ;;  %v12090_v30 = vld [vmem:[#allocation63_spill] sm:$0xff]  ;;  %v1158_v11 = vld [vmem:[#allocation2 + $0x9c] sm:$0xf] }
 0x198   : > { %12083 = vst [vmem:[#allocation29_spill] sm:$0xff] %v9776_v18  ;;  %v7749_v27 = vld.sshfl [vmem:[#allocation2 + $0x90] sm:$0x33 pattern:$0x75316420]  ;;  %4590 = vrot.lane.b32.xlu0 %v9776_v18, %s7968_s19  ;;  %v9804_v25 = vrot.slane %v2071_v49, %v8024_v9  ;;  %v9807_v15 = vrot.slane %v3064_v58, %v8024_v9 }
 0x199   : > { %v9792_v8 = vcombine.low %v12072_v14, %v12086_v40  ;;  %v2047_v39 = vcombine.high %v7749_v27, %v7749_v27  ;;  %v2054_v22 = vrot.slane %v7749_v27, %v8024_v9  ;;  %v7727_v40 = vld.sshfl [vmem:[#allocation2 + $0x38] sm:$0x1 pattern:$0x75316420]  ;;  %v2086_v14 = vcombine.high %v9779_v5, %v9779_v5 }
 0x19a   : > { %12089 = vst [vmem:[#allocation62_spill] sm:$0xff] %v9807_v15  ;;  %v1605_v50 = vrot.slane %v7727_v40, %v8024_v9  ;;  %v9813_v43 = vrot.slane %v5703_v10, %v8024_v9  ;;  %v9816_v34 = vor.u32 %v960_v6, %v12090_v30  ;;  %v3112_v58 = vcombine.low %v9779_v5, %v9804_v25  ;;  %v7728_v53 = vld.sshfl [vmem:[#allocation2 + $0x3c] sm:$0x33 pattern:$0x75316420] }
 0x19b   : > { %v2061_v27 = vrot.slane %v2047_v39, %v8024_v9  ;;  %v2062_v52 = vcombine.high %v2054_v22, %v2054_v22  ;;  %v1613_v40 = vcombine.high %v7728_v53, %v7728_v53  ;;  %v1620_v48 = vrot.slane %v7728_v53, %v8024_v9 }
 0x19c   : > { %v4218_v13 = vcombine.low %v2039_v59, %v2054_v22  ;;  %v4266_v10 = vcombine.low %v9804_v25, %v2086_v14  ;;  %5260 = vrot.lane.b32.xlu0 %v9695_v42, %s7970_s21  ;;  %v9828_v39 = vrot.slane %v3112_v58, %v8024_v9 }
 0x19d   : > { %v3065_v6 = vcombine.low %v2054_v22, %v2061_v27  ;;  %v7780_v30 = vcombine.high %v2054_v22, %v2061_v27  ;;  %v2063_v49 = vcombine.high %v2061_v27, %v2061_v27  ;;  %v1627_v36 = vrot.slane %v1613_v40, %v8024_v9 }
 0x19e   : > { %12091 = vst [vmem:[#allocation37_spill] sm:$0xff] %v9828_v39  ;;  %v1628_v54 = vcombine.high %v1620_v48, %v1620_v48  ;;  %v2673_v17 = vcombine.low %v1605_v50, %v1620_v48  ;;  %v4219_v41 = vcombine.low %v2061_v27, %v2062_v52  ;;  %v4234_v14 = vrot.slane %v4218_v13, %v8024_v9 }
 0x19f   : > { %v9832_v51 = vrot.slane %v3065_v6, %v8024_v9  ;;  %v9835_v53 = vrot.slane %v7780_v30, %v8024_v9  ;;  %v4220_v59 = vcombine.low %v2063_v49, %v9779_v5  ;;  %v1629_v22 = vcombine.high %v1627_v36, %v1627_v36 }
 0x1a0   : > { %v2674_v42 = vcombine.low %v1627_v36, %v1628_v54  ;;  %v9840_v58 = vrot.slane %v2673_v17, %v8024_v9  ;;  %v4241_v40 = vrot.slane %v4219_v41, %v8024_v9  ;;  %5244 = vrot.lane.b32.xlu0 %v9768_v21, %s7970_s21  ;;  %v9859_v6 = vrot.slane %v4266_v10, %v8024_v9  ;;  %v1155_v10 = vld [vmem:[#allocation2 + $0x98] sm:$0x1] }
 0x1a1   : > { %12092 = vst [vmem:[#allocation63_spill] sm:$0xff] %v9832_v51  ;;  %12093 = vst [vmem:[#allocation110_spill] sm:$0xff] %v9835_v53  ;;  %v5096_v27 = vcombine.low %v9807_v15, %v9832_v51  ;;  %v5097_v49 = vcombine.low %v9835_v53, %v9828_v39  ;;  %v4248_v13 = vrot.slane %v4220_v59, %v8024_v9  ;;  %v9872_v15 = vpop.permute.xlu1 %4462 }
 0x1a2   : > { %v9853_v54 = vrot.slane %v2674_v42, %v8024_v9  ;;  %v2720_v17 = vcombine.low %v1629_v22, %v12071_v0  ;;  %v4960_v41 = vcombine.low %v9758_v7, %v9840_v58  ;;  %v5855_v51 = vcombine.low %v4234_v14, %v4241_v40  ;;  %12094 = vst [vmem:[#allocation111_spill] sm:$0xff] %v9872_v15 }
 0x1a3   : > { %v5104_v30 = vrot.slane %v5096_v27, %v8024_v9  ;;  %v5111_v52 = vrot.slane %v5097_v49, %v8024_v9  ;;  %v5718_v53 = vcombine.low %v9764_v19, %v9813_v43  ;;  %v5856_v22 = vcombine.low %v4248_v13, %v9859_v6 }
 0x1a4   : > { %v9868_v59 = vrot.slane %v2720_v17, %v8024_v9  ;;  %v4968_v0 = vrot.slane %v4960_v41, %v8024_v9  ;;  %v5863_v49 = vrot.slane %v5855_v51, %v8024_v9  ;;  %v12096_v19 = vcombine.high %v9704_v56, %v9704_v56 }
 0x1a5   : > { %v9874_v27 = vcombine.low %v5104_v30, %v5111_v52  ;;  %v3827_v21 = vcombine.low %v1620_v48, %v1627_v36  ;;  %v5870_v42 = vrot.slane %v5856_v22, %v8024_v9  ;;  %v7788_v41 = vcombine.high %v1620_v48, %v1627_v36 }
 0x1a6   : > { %v3826_v43 = vcombine.low %v12096_v19, %v1605_v50  ;;  %v4961_v17 = vcombine.low %v9853_v54, %v9868_v59  ;;  %v4249_v61 = vcombine.low %v12097_v63, %v4234_v14  ;;  %v4250_v30 = vcombine.low %v4241_v40, %v4248_v13  ;;  %v12100_v40 = vld [vmem:[#allocation41_spill] sm:$0xff] }
 0x1a7   : > { %12095 = vst [vmem:[#allocation112_spill] sm:$0xff] %v9874_v27  ;;  %5382 = vrot.lane.b32.xlu0 %v9874_v27, %s7969_s20  ;;  %v3849_v51 = vrot.slane %v3827_v21, %v8024_v9  ;;  %v12098_v56 = vrot.slane %v9680_v47, 4  ;;  %v5871_v22 = vcombine.low %v5863_v49, %v5870_v42  ;;  %v3856_v36 = vrot.slane %v7788_v41, %v8024_v9  ;;  %v12104_v41 = vld [vmem:[#allocation39_spill] sm:$0xff] }
 0x1a8   : > { %v3842_v52 = vrot.slane %v3826_v43, %v8024_v9  ;;  %v4975_v19 = vrot.slane %v4961_v17, %v8024_v9  ;;  %v4257_v63 = vrot.slane %v4249_v61, %v8024_v9  ;;  %v4264_v14 = vrot.slane %v4250_v30, %v8024_v9  ;;  %v12103_v17 = vld [vmem:[#allocation40_spill] sm:$0xff] }
 0x1a9   : > { %v1156_v50 = vsel %vm8009_vm3, %v12098_v56, %v1155_v10  ;;  %v1159_v47 = vsel %vm8520_vm14, %v9816_v34, %v1158_v11  ;;  %6036 = vrot.lane.b32.xlu1 %v5871_v22, %s7971_s22  ;;  %v5720_v13 = vcombine.low %v3856_v36, %v12100_v40  ;;  %v3858_v42 = vcombine.low %v3849_v51, %v3856_v36  ;;  %v9906_v10 = vpop.permute.xlu1 %4464 }
 0x1aa   : > { %1157 = vst [vmem:[#allocation2 + $0x98] sm:$0x1] %v1156_v50  ;;  %v5719_v48 = vcombine.low %v3842_v52, %v3849_v51  ;;  %v3857_v43 = vcombine.low %v9773_v12, %v3842_v52  ;;  %v9900_v21 = vcombine.low %v4968_v0, %v4975_v19  ;;  %1160 = vst [vmem:[#allocation2 + $0x9c] sm:$0xf] %v1159_v47  ;;  %vm4638_vm14 = vcmask 130144  }
 0x1ab   : > { %v2087_v61 = vcombine.high %v9804_v25, %v9804_v25  ;;  %12101 = vst [vmem:[#allocation41_spill] sm:$0xff] %v9906_v10  ;;  %v9909_v12 = vcombine.low %v4257_v63, %v4264_v14  ;;  %v7781_v11 = vcombine.high %v9779_v5, %v9804_v25  ;;  %v5734_v34 = vrot.slane %v5720_v13, %v8024_v9  ;;  %v12109_v13 = vld [vmem:[#allocation72_spill] sm:$0xff] }
 0x1ac   : > { %12099 = vst [vmem:[#allocation69_spill] sm:$0xff] %v9900_v21  ;;  %v5727_v49 = vrot.slane %v5719_v48, %v8024_v9  ;;  %v3865_v23 = vrot.slane %v3857_v43, %v8024_v9  ;;  %5366 = vrot.lane.b32.xlu0 %v9900_v21, %s7969_s20  ;;  %v3872_v0 = vrot.slane %v3858_v42, %v8024_v9  ;;  %v12110_v42 = vld [vmem:[#allocation71_spill] sm:$0xff] }
 0x1ad   : > { %12102 = vst [vmem:[#allocation113_spill] sm:$0xff] %v9909_v12  ;;  %v2723_v52 = vcombine.low %v12104_v41, %v12103_v17  ;;  %v9922_v51 = vrot.slane %v9792_v8, %v8024_v9  ;;  %v9925_v30 = vrot.slane %v7781_v11, %v8024_v9  ;;  %v9929_v5 = vrot.slane %v9798_v57, %v8024_v9  ;;  %v12107_v8 = vld [vmem:[#allocation70_spill] sm:$0xff] }
 0x1ae   : > { %v7774_v25 = vcombine.high %v12104_v41, %v12103_v17  ;;  %v2148_v56 = vcombine.high %v9086_v60, %v9086_v60  ;;  %v5735_v50 = vcombine.low %v5727_v49, %v5734_v34  ;;  %v9935_v19 = vcombine.low %v3865_v23, %v3872_v0  ;;  %v9956_v23 = vpop.permute.xlu1 %5240 }
 0x1af   : > { %12105 = vst [vmem:[#allocation40_spill] sm:$0xff] %v9925_v30  ;;  %v9938_v22 = vrot.slane %v2723_v52, %v8024_v9  ;;  %v2149_v36 = vcombine.high %v12107_v8, %v12107_v8  ;;  %v4977_v14 = vcombine.low %v9922_v51, %v9929_v5  ;;  %v3164_v49 = vcombine.low %v12110_v42, %v12109_v13 }
 0x1b0   : > { %12106 = vst [vmem:[#allocation39_spill] sm:$0xff] %v9935_v19  ;;  %v9945_v48 = vrot.slane %v7774_v25, %v8024_v9  ;;  %v3162_v43 = vcombine.low %v12107_v8, %v2148_v56  ;;  %6018 = vrot.lane.b32.xlu0 %v5718_v53, %s7971_s22  ;;  %6020 = vrot.lane.b32.xlu1 %v5735_v50, %s7971_s22  ;;  %12111 = vst [vmem:[#allocation72_spill] sm:$0xff] %v9956_v23 }
 0x1b1   : > { %v7751_v63 = vld.sshfl [vmem:[#allocation2 + $0x98] sm:$0x1 pattern:$0x75316420]  ;;  %v3163_v40 = vcombine.low %v2149_v36, %v9093_v20  ;;  %v4985_v53 = vrot.slane %v4977_v14, %v8024_v9  ;;  %v9972_v36 = vrot.slane %v3164_v49, %v8024_v9  ;;  %v1691_v14 = vcombine.high %v12103_v17, %v12103_v17 }
 0x1b2   : > { %12108 = vst [vmem:[#allocation70_spill] sm:$0xff] %v9945_v48  ;;  %v2101_v47 = vrot.slane %v7751_v63, %v8024_v9  ;;  %v7752_v11 = vld.sshfl [vmem:[#allocation2 + $0x9c] sm:$0x33 pattern:$0x75316420]  ;;  %v4978_v41 = vcombine.low %v9938_v22, %v9945_v48  ;;  %v9964_v52 = vrot.slane %v3162_v43, %v8024_v9  ;;  %v7782_v63 = vcombine.high %v12110_v42, %v12109_v13  ;;  %v9992_v10 = vpop.permute.xlu1 %6016  ;;  %v12138_v48 = vld [vmem:[#allocation55_spill] sm:$0xff] }
 0x1b3   : > { %v2109_v25 = vcombine.high %v7752_v11, %v7752_v11  ;;  %v2116_v20 = vrot.slane %v7752_v11, %v8024_v9  ;;  %v9968_v50 = vrot.slane %v3163_v40, %v8024_v9  ;;  %12115 = vst [vmem:[#allocation115_spill] sm:$0xff] %v9972_v36  ;;  %12117 = vst [vmem:[#allocation117_spill] sm:$0xff] %v9992_v10 }
 0x1b4   : > { %12113 = vst [vmem:[#allocation71_spill] sm:$0xff] %v9964_v52  ;;  %v4267_v56 = vcombine.low %v2087_v61, %v2101_v47  ;;  %v4992_v8 = vrot.slane %v4978_v41, %v8024_v9  ;;  %4486 = vrot.lane.b32.xlu0 %v9692_v38, %s7967_s18  ;;  %4470 = vrot.lane.b32.xlu1 %v9776_v18, %s7967_s18  ;;  %v12125_v38 = vld [vmem:[#allocation42_spill] sm:$0xff] }
 0x1b5   : > { %12114 = vst [vmem:[#allocation114_spill] sm:$0xff] %v9968_v50  ;;  %v2123_v61 = vrot.slane %v2109_v25, %v8024_v9  ;;  %v2124_v40 = vcombine.high %v2116_v20, %v2116_v20  ;;  %v3114_v11 = vcombine.low %v2101_v47, %v2116_v20  ;;  %v9987_v41 = vrot.slane %v7782_v63, %v8024_v9  ;;  %v10001_v63 = vpop.permute.xlu0 %4584  ;;  %v12132_v47 = vld [vmem:[#allocation74_spill] sm:$0xff] }
 0x1b6   : > { %v4283_v43 = vrot.slane %v4267_v56, %v8024_v9  ;;  %v9984_v49 = vcombine.low %v4985_v53, %v4992_v8  ;;  %v5130_v17 = vcombine.low %v9964_v52, %v9968_v50  ;;  %12120 = vst [vmem:[#allocation119_spill] sm:$0xff] %v10001_v63 }
 0x1b7   : > { %12116 = vst [vmem:[#allocation116_spill] sm:$0xff] %v9987_v41  ;;  %v4268_v42 = vcombine.low %v2116_v20, %v2123_v61  ;;  %v7796_v0 = vcombine.high %v2116_v20, %v2123_v61  ;;  %v2125_v23 = vcombine.high %v2123_v61, %v2123_v61  ;;  %v3115_v25 = vcombine.low %v2123_v61, %v2124_v40  ;;  %v12121_v40 = vld [vmem:[#allocation22_spill] sm:$0xff] }
 0x1b8   : > { %v4298_v57 = vcombine.low %v9859_v6, %v4283_v43  ;;  %v9995_v56 = vrot.slane %v3114_v11, %v8024_v9  ;;  %v5131_v8 = vcombine.low %v9972_v36, %v9987_v41  ;;  %4488 = vrot.lane.b32.xlu0 %v9909_v12, %s7967_s18  ;;  %4608 = vrot.lane.b32.xlu1 %v9909_v12, %s7968_s19 }
 0x1b9   : > { %v4290_v6 = vrot.slane %v4268_v42, %v8024_v9  ;;  %v4297_v20 = vrot.slane %v7796_v0, %v8024_v9  ;;  %v10012_v53 = vrot.slane %v3115_v25, %v8024_v9  ;;  %v3161_v10 = vcombine.low %v2125_v23, %v9086_v60  ;;  %v12123_v42 = vld [vmem:[#allocation51_spill] sm:$0xff] }
 0x1ba   : > { %12118 = vst [vmem:[#allocation118_spill] sm:$0xff] %v9995_v56  ;;  %v4306_v61 = vrot.slane %v4298_v57, %v8024_v9  ;;  %v5113_v63 = vcombine.low %v9925_v30, %v9995_v56  ;;  %v5138_v15 = vrot.slane %v5130_v17, %v8024_v9  ;;  %v5145_v12 = vrot.slane %v5131_v8, %v8024_v9  ;;  %v12124_v0 = vld [vmem:[#allocation43_spill] sm:$0xff]  ;;  %v10036_v8 = vpop.permute.xlu1 %5258 }
 0x1bb   : > { %12122 = vst [vmem:[#allocation22_spill] sm:$0xff] %v10012_v53  ;;  %v4299_v1 = vcombine.low %v4290_v6, %v4297_v20  ;;  %v3923_v18 = vcombine.low %v1691_v14, %v12123_v42  ;;  %v5736_v57 = vcombine.low %v12125_v38, %v12124_v0  ;;  %v10025_v25 = vrot.slane %v3161_v10, %v8024_v9 }
 0x1bc   : > { %v5121_v60 = vrot.slane %v5113_v63, %v8024_v9  ;;  %v5872_v23 = vcombine.low %v4283_v43, %v4290_v6  ;;  %4472 = vrot.lane.b32.xlu0 %v9935_v19, %s7967_s18  ;;  %4592 = vrot.lane.b32.xlu1 %v9935_v19, %s7968_s19  ;;  %v10033_v17 = vcombine.low %v5138_v15, %v5145_v12  ;;  %v4674_v10 = vshll.u32 %v12121_v40, 16  ;;  %v12128_v6 = vld [vmem:[#allocation73_spill] sm:$0xff]  ;;  %v12131_v19 = vld [vmem:[#allocation75_spill] sm:$0xff] }
 0x1bd   : > { %12126 = vst [vmem:[#allocation51_spill] sm:$0xff] %v10025_v25  ;;  %v4313_v14 = vrot.slane %v4299_v1, %v8024_v9  ;;  %v3933_v38 = vrot.slane %v3923_v18, %v8024_v9  ;;  %12127 = vst [vmem:[#allocation43_spill] sm:$0xff] %v10036_v8  ;;  %v5114_v63 = vcombine.low %v10012_v53, %v10025_v25  ;;  %v10048_v1 = vpop.permute.xlu0 %5360  ;;  %v12130_v18 = vld [vmem:[#allocation44_spill] sm:$0xff]  ;;  %v12145_v25 = vld [vmem:[#allocation83_spill] sm:$0xff] }
 0x1be   : > { %v10042_v43 = vrot.slane %v5736_v57, %v8024_v9  ;;  %v5873_v0 = vcombine.low %v4297_v20, %v12128_v6  ;;  %v10046_v11 = vrot.slane %v5872_v23, %v8024_v9  ;;  %12129 = vst [vmem:[#allocation42_spill] sm:$0xff] %v10048_v1  ;;  %v2187_v8 = vcombine.high %v12109_v13, %v12109_v13  ;;  %v12133_v23 = vld [vmem:[#allocation54_spill] sm:$0xff] }
 0x1bf   : > { %v10050_v15 = vcombine.low %v4306_v61, %v4313_v14  ;;  %v5737_v12 = vcombine.low %v12130_v18, %v3933_v38  ;;  %v5889_v41 = vcombine.low %v12132_v47, %v12131_v19  ;;  %v5128_v57 = vrot.slane %v5114_v63, %v8024_v9  ;;  %v12134_v19 = vld [vmem:[#allocation82_spill] sm:$0xff]  ;;  %v12136_v18 = vld [vmem:[#allocation52_spill] sm:$0xff] }
 0x1c0   : > { %v10059_v34 = vrot.slane %v5873_v0, %v8024_v9  ;;  %v1714_v20 = vcombine.high %v12123_v42, %v12123_v42  ;;  %v1715_v61 = vcombine.high %v12133_v23, %v12133_v23  ;;  %5262 = vrot.lane.b32.xlu1 %v9874_v27, %s7970_s21  ;;  %v4364_v47 = vcombine.low %v2187_v8, %v12134_v19  ;;  %v12137_v8 = vld [vmem:[#allocation57_spill] sm:$0xff] }
 0x1c1   : > { %4610 = vrot.lane.b32.xlu0 %v10050_v15, %s7968_s19  ;;  %v10070_v13 = vrot.slane %v5737_v12, %v8024_v9  ;;  %v10074_v14 = vrot.slane %v5889_v41, %v8024_v9  ;;  %v10076_v63 = vrot.slane %v4674_v10, 1  ;;  %v10078_v42 = vcombine.low %v5121_v60, %v5128_v57  ;;  %v10091_v60 = vpop.permute.xlu1 %6034  ;;  %v10099_v50 = vpop.permute.xlu0 %4482 }
 0x1c2   : > { %v3924_v0 = vcombine.low %v12133_v23, %v1714_v20  ;;  %v3925_v1 = vcombine.low %v1715_v61, %v12136_v18  ;;  %v4374_v27 = vrot.slane %v4364_v47, %v8024_v9  ;;  %v3926_v41 = vcombine.low %v12138_v48, %v12137_v8  ;;  %12139 = vst [vmem:[#allocation44_spill] sm:$0xff] %v10091_v60  ;;  %v12140_v20 = vld [vmem:[#allocation85_spill] sm:$0xff]  ;;  %v12141_v61 = vld [vmem:[#allocation87_spill] sm:$0xff]  ;;  %v12142_v18 = vld [vmem:[#allocation86_spill] sm:$0xff] }
 0x1c3   : > { %12135 = vst [vmem:[#allocation73_spill] sm:$0xff] %v10078_v42  ;;  %v2210_v10 = vcombine.high %v12134_v19, %v12134_v19  ;;  %v2211_v23 = vcombine.high %v12140_v20, %v12140_v20  ;;  %v4367_v12 = vcombine.low %v12142_v18, %v12141_v61  ;;  %12143 = vst [vmem:[#allocation75_spill] sm:$0xff] %v10099_v50  ;;  %v12144_v48 = vld [vmem:[#allocation76_spill] sm:$0xff] }
 0x1c4   : > { %v3940_v57 = vrot.slane %v3924_v0, %v8024_v9  ;;  %v3947_v6 = vrot.slane %v3925_v1, %v8024_v9  ;;  %5246 = vrot.lane.b32.xlu1 %v9900_v21, %s7970_s21  ;;  %v5890_v19 = vcombine.low %v12144_v48, %v4374_v27  ;;  %v3954_v47 = vrot.slane %v3926_v41, %v8024_v9  ;;  %v12146_v21 = vld [vmem:[#allocation80_spill] sm:$0xff] }
 0x1c5   : > { %5264 = vrot.lane.b32.xlu0 %v10078_v42, %s7970_s21  ;;  %v4365_v1 = vcombine.low %v12140_v20, %v2210_v10  ;;  %v4679_v0 = vshll.u32 %v9506_v29, 16  ;;  %v4366_v52 = vcombine.low %v2211_v23, %v12145_v25  ;;  %v10111_v50 = vrot.slane %v4367_v12, %v8024_v9  ;;  %v10139_v12 = vpop.permute.xlu1 %4474  ;;  %v12149_v20 = vld [vmem:[#allocation77_spill] sm:$0xff]  ;;  %v12152_v29 = vld [vmem:[#allocation78_spill] sm:$0xff] }
 0x1c6   : > { %v3955_v60 = vcombine.low %v3933_v38, %v3940_v57  ;;  %v5753_v36 = vcombine.low %v3940_v57, %v3947_v6  ;;  %v10114_v53 = vrot.slane %v5890_v19, %v8024_v9  ;;  %v3956_v56 = vcombine.low %v3947_v6, %v3954_v47  ;;  %12147 = vst [vmem:[#allocation74_spill] sm:$0xff] %v10139_v12  ;;  %v12150_v19 = vld [vmem:[#allocation79_spill] sm:$0xff] }
 0x1c7   : > { %v5754_v30 = vcombine.low %v3954_v47, %v12146_v21  ;;  %v10118_v48 = vrot.slane %v4365_v1, %v8024_v9  ;;  %v10125_v38 = vrot.slane %v4366_v52, %v8024_v9  ;;  %v1753_v25 = vcombine.high %v12137_v8, %v12137_v8  ;;  %v12148_v52 = vld [vmem:[#allocation64_spill] sm:$0xff] }
 0x1c8   : > { %v3963_v41 = vrot.slane %v3955_v60, %v8024_v9  ;;  %v10122_v10 = vrot.slane %v5753_v36, %v8024_v9  ;;  %5384 = vrot.lane.b32.xlu1 %v10078_v42, %s7969_s20  ;;  %v5905_v21 = vcombine.low %v10074_v14, %v10114_v53  ;;  %v3970_v6 = vrot.slane %v3956_v56, %v8024_v9  ;;  %v10149_v14 = vpop.permute.xlu0 %4594 }
 0x1c9   : > { %5248 = vrot.lane.b32.xlu0 %v9984_v49, %s7970_s21  ;;  %v10137_v36 = vrot.slane %v5754_v30, %v8024_v9  ;;  %v5487_v60 = vshll.u32 %v12148_v52, 16  ;;  %v4396_v8 = vcombine.low %v4374_v27, %v10118_v48  ;;  %v4397_v57 = vcombine.low %v10125_v38, %v10111_v50  ;;  %12151 = vst [vmem:[#allocation54_spill] sm:$0xff] %v10149_v14 }
 0x1ca   : > { %v1776_v23 = vcombine.high %v12149_v20, %v12149_v20  ;;  %v1777_v53 = vcombine.high %v12150_v19, %v12150_v19  ;;  %v10151_v56 = vcombine.low %v3963_v41, %v3970_v6  ;;  %v2819_v47 = vcombine.low %v1753_v25, %v12149_v20 }
 0x1cb   : > { %v2867_v27 = vcombine.low %v9155_v55, %v9196_v3  ;;  %v4404_v1 = vrot.slane %v4396_v8, %v8024_v9  ;;  %v4411_v12 = vrot.slane %v4397_v57, %v8024_v9  ;;  %v2249_v55 = vcombine.high %v12141_v61, %v12141_v61 }
 0x1cc   : > { %v2820_v42 = vcombine.low %v12150_v19, %v1776_v23  ;;  %v2821_v39 = vcombine.low %v1777_v53, %v12152_v29  ;;  %5368 = vrot.lane.b32.xlu1 %v9984_v49, %s7969_s20  ;;  %v10167_v41 = vrot.slane %v2819_v47, %v8024_v9  ;;  %v10174_v3 = vrot.slane %v4679_v0, 1  ;;  %v12155_v47 = vld [vmem:[#allocation9_spill] sm:$0xff] }
 0x1cd   : > { %5386 = vrot.lane.b32.xlu0 %v10033_v17, %s7969_s20  ;;  %v10170_v25 = vrot.slane %v2867_v27, %v8024_v9  ;;  %v2272_v8 = vcombine.high %v9387_v16, %v9387_v16  ;;  %v10184_v57 = vrot.slane %v5487_v60, 1  ;;  %v10186_v20 = vcombine.low %v4404_v1, %v4411_v12  ;;  %v10200_v12 = vpop.permute.xlu0 %5370  ;;  %v12156_v27 = vld [vmem:[#allocation7_spill] sm:$0xff] }
 0x1ce   : > { %v10177_v6 = vrot.slane %v2820_v42, %v8024_v9  ;;  %v10180_v29 = vrot.slane %v2821_v39, %v8024_v9  ;;  %v2273_v23 = vcombine.high %v9398_v37, %v9398_v37  ;;  %v3260_v19 = vcombine.low %v2249_v55, %v9387_v16  ;;  %v10193_v42 = vpop.permute.xlu1 %4612  ;;  %12154 = vst [vmem:[#allocation52_spill] sm:$0xff] %v10200_v12 }
 0x1cf   : > { %v5164_v0 = vcombine.low %v9419_v44, %v9436_v24  ;;  %12153 = vst [vmem:[#allocation82_spill] sm:$0xff] %v10193_v42  ;;  %v3261_v60 = vcombine.low %v9398_v37, %v2272_v8  ;;  %v2428_v1 = vcombine.low %v12156_v27, %v12155_v47  ;;  %v12157_v16 = vcombine.low %v10042_v43, %v10070_v13  ;;  %v12160_v13 = vld [vmem:[#allocation8_spill] sm:$0xff] }
 0x1d0   : > { %v5011_v39 = vcombine.low %v10167_v41, %v10177_v6  ;;  %v5012_v53 = vcombine.low %v10180_v29, %v10170_v25  ;;  %v12158_v55 = vcombine.low %v10046_v11, %v10059_v34  ;;  %v3262_v30 = vcombine.low %v2273_v23, %v9401_v32  ;;  %v12159_v32 = vld [vmem:[#allocation6_spill] sm:$0xff] }
 0x1d1   : > { %6022 = vrot.lane.b32.xlu0 %v12157_v16, %s7971_s22  ;;  %v10214_v37 = vrot.slane %v3260_v19, %v8024_v9  ;;  %v5171_v8 = vrot.slane %v5164_v0, %v8024_v9  ;;  %v5491_v42 = vshrl.u32 %v12148_v52, 16  ;;  %v10221_v43 = vrot.slane %v3261_v60, %v8024_v9 }
 0x1d2   : > { %6038 = vrot.lane.b32.xlu1 %v12158_v55, %s7971_s22  ;;  %v5019_v12 = vrot.slane %v5011_v39, %v8024_v9  ;;  %v5026_v14 = vrot.slane %v5012_v53, %v8024_v9  ;;  %v7769_v34 = vcombine.high %v12156_v27, %v12155_v47  ;;  %v10226_v11 = vrot.slane %v3262_v30, %v8024_v9  ;;  %v12165_v55 = vld [vmem:[#allocation25_spill] sm:$0xff] }
 0x1d3   : > { %v12161_v23 = vcombine.low %v12159_v32, %v12160_v13  ;;  %v12162_v52 = vcombine.high %v12159_v32, %v12160_v13  ;;  %v2450_v39 = vrot.slane %v2428_v1, %v8024_v9  ;;  %v5172_v60 = vcombine.low %v10214_v37, %v10221_v43  ;;  %v10255_v32 = vpop.permute.xlu1 %5250  ;;  %v10258_v13 = vpop.permute.xlu0 %4492 }
 0x1d4   : > { %v10237_v53 = vcombine.low %v5019_v12, %v5026_v14  ;;  %v2457_v30 = vrot.slane %v7769_v34, %v8024_v9  ;;  %v12163_v47 = vcombine.low %v9415_v2, %v9426_v33  ;;  %v5173_v16 = vcombine.low %v10226_v11, %v5171_v8  ;;  %12166 = vst [vmem:[#allocation57_spill] sm:$0xff] %v10255_v32  ;;  %v12195_v32 = vld [vmem:[#allocation100_spill] sm:$0xff] }
 0x1d5   : > { %v2436_v19 = vrot.slane %v12161_v23, %v8024_v9  ;;  %v2443_v0 = vrot.slane %v12162_v52, %v8024_v9  ;;  %4490 = vrot.lane.b32.xlu0 %v10050_v15, %s7967_s18  ;;  %v12164_v14 = vcombine.low %v9429_v28, %v9432_v4  ;;  %v5448_v34 = vshrl.u32 %v12165_v55, 16  ;;  %12167 = vst [vmem:[#allocation55_spill] sm:$0xff] %v10258_v13 }
 0x1d6   : > { %v2515_v27 = vrot.slane %v12163_v47, %v8024_v9  ;;  %6040 = vrot.lane.b32.xlu1 %v5905_v21, %s7971_s22  ;;  %v5180_v2 = vrot.slane %v5172_v60, %v8024_v9  ;;  %v2459_v33 = vcombine.low %v2450_v39, %v2457_v30  ;;  %v7798_v21 = vcombine.high %v12142_v18, %v12141_v61 }
 0x1d7   : > { %v2458_v1 = vcombine.low %v2436_v19, %v2443_v0  ;;  %v2522_v12 = vrot.slane %v12164_v14, %v8024_v9  ;;  %v5906_v8 = vcombine.low %v10118_v48, %v10125_v38  ;;  %v5187_v23 = vrot.slane %v5173_v16, %v8024_v9 }
 0x1d8   : > { %v12168_v19 = vshrl.u32 %v12121_v40, 16  ;;  %v2473_v0 = vrot.slane %v2459_v33, %v8024_v9  ;;  %v4423_v39 = vrot.slane %v7798_v21, %v8024_v9  ;;  %v5493_v61 = vor.u32 %v5491_v42, %v10184_v57 }
 0x1d9   : > { %v2466_v28 = vrot.slane %v2458_v1, %v8024_v9  ;;  %v10266_v4 = vcombine.low %v2515_v27, %v2522_v12  ;;  %v10274_v60 = vrot.slane %v5906_v8, %v8024_v9  ;;  %4476 = vrot.lane.b32.xlu0 %v10151_v56, %s7967_s18  ;;  %v12169_v18 = vcombine.low %v10122_v10, %v10137_v36  ;;  %v12172_v1 = vld [vmem:[#allocation81_spill] sm:$0xff]  ;;  %v10302_v12 = vpop.permute.xlu1 %5388 }
 0x1da   : > { %v4677_v52 = vor.u32 %v10076_v63, %v12168_v19  ;;  %v10283_v40 = vcombine.low %v5180_v2, %v5187_v23  ;;  %v5495_v38 = vshll.u32 %v10237_v53, 16  ;;  %v4445_v30 = vcombine.low %v4423_v39, %v9443_v45  ;;  %12173 = vst [vmem:[#allocation86_spill] sm:$0xff] %v10302_v12 }
 0x1db   : > { %6024 = vrot.lane.b32.xlu1 %v12169_v18, %s7971_s22  ;;  %v3367_v63 = vshll.u32 %v10266_v4, 16  ;;  %3327 = vst.msk [vmem:[#allocation3 + $0x8] sm:$0xff] %vm204_vm4, %v10266_v4  ;;  %v2474_v42 = vcombine.low %v2466_v28, %v2473_v0  ;;  %v5907_v47 = vcombine.low %v10111_v50, %v4423_v39  ;;  %v5450_v10 = vshll.u32 %v12165_v55, 16  ;;  %v10309_v55 = vpop.permute.xlu0 %4598 }
 0x1dc   : > { %12170 = vst [vmem:[#allocation85_spill] sm:$0xff] %v10283_v40  ;;  %v10290_v48 = vsel %vm3358_vm0, %v4677_v52, %v10174_v3  ;;  %v10298_v27 = vrot.slane %v5495_v38, 1  ;;  %v5455_v16 = vshll.u32 %v9584_v26, 16  ;;  %v4783_v14 = vshll.u32 %v12172_v1, 16  ;;  %12174 = vst [vmem:[#allocation76_spill] sm:$0xff] %v10309_v55 }
 0x1dd   : > { %v10296_v36 = vrot.slane %v3367_v63, 1  ;;  %v3360_v2 = vshrl.u32 %v2474_v42, 16  ;;  %v3362_v33 = vshll.u32 %v2474_v42, 16  ;;  %3326 = vst.msk [vmem:[#allocation3] sm:$0xff] %vm204_vm4, %v2474_v42  ;;  %v4453_v45 = vrot.slane %v4445_v30, %v8024_v9  ;;  %4614 = vrot.lane.b32.xlu0 %v10186_v20, %s7968_s19 }
 0x1de   : > { %12171 = vst [vmem:[#allocation87_spill] sm:$0xff] %v10298_v27  ;;  %v10307_v50 = vrot.slane %v5907_v47, %v8024_v9  ;;  %v10317_v21 = vsel %vm3358_vm0, %v5493_v61, %v10298_v27  ;;  %v5452_v8 = vrot.slane %v5450_v10, 1  ;;  %v10319_v23 = vrot.slane %v5455_v16, 1  ;;  %v10354_v10 = vpop.permute.xlu1 %6044 }
 0x1df   : > { %4596 = vrot.lane.b32.xlu1 %v10151_v56, %s7968_s19  ;;  %v10321_v28 = vrot.slane %v4783_v14, 1  ;;  %v3364_v19 = vrot.slane %v3362_v33, 1  ;;  %v10324_v52 = vcombine.low %v4453_v45, %v9480_v35  ;;  %v4787_v39 = vshrl.u32 %v12172_v1, 16  ;;  %12178 = vst [vmem:[#allocation80_spill] sm:$0xff] %v10354_v10 }
 0x1e0   : > { %v5922_v0 = vcombine.low %v10274_v60, %v10307_v50  ;;  %v5453_v18 = vor.u32 %v5452_v8, %v5448_v34  ;;  %v4791_v63 = vshll.u32 %v10186_v20, 16  ;;  %v12176_v61 = vcombine.low %v9735_v62, %v9758_v7  ;;  %v12181_v8 = vld [vmem:[#allocation48_spill] sm:$0xff] }
 0x1e1   : > { %12175 = vst [vmem:[#allocation83_spill] sm:$0xff] %v10321_v28  ;;  %v12177_v42 = vcombine.low %v9840_v58, %v9853_v54  ;;  %v3365_v35 = vor.u32 %v3364_v19, %v3360_v2  ;;  %v4789_v47 = vor.u32 %v4787_v39, %v10321_v28  ;;  %v2752_v60 = vcombine.low %v9868_v59, %v9922_v51  ;;  %v10358_v51 = vpop.permute.xlu0 %5268 }
 0x1e2   : > { %v2711_v38 = vrot.slane %v12176_v61, %v8024_v9  ;;  %v2753_v34 = vcombine.low %v9929_v5, %v9938_v22  ;;  %5252 = vrot.lane.b32.xlu0 %v10237_v53, %s7970_s21  ;;  %v10349_v62 = vsel %vm3358_vm0, %v5453_v18, %v10319_v23  ;;  %v10351_v7 = vrot.slane %v4791_v63, 1  ;;  %12179 = vst [vmem:[#allocation64_spill] sm:$0xff] %v10358_v51 }
 0x1e3   : > { %v2718_v30 = vrot.slane %v12177_v42, %v8024_v9  ;;  %5266 = vrot.lane.b32.xlu1 %v10033_v17, %s7970_s21  ;;  %v5559_v54 = vshll.u32 %v9281_v31, 16  ;;  %v3370_v59 = vsel %vm3358_vm0, %v3365_v35, %v10296_v36  ;;  %v2760_v5 = vrot.slane %v2752_v60, %v8024_v9  ;;  %v12183_v35 = vld [vmem:[#allocation20_spill] sm:$0xff] }
 0x1e4   : > { %v2767_v22 = vrot.slane %v2753_v34, %v8024_v9  ;;  %v5563_v16 = vshrl.u32 %v9281_v31, 16  ;;  %v10365_v1 = vsel %vm3358_vm0, %v4789_v47, %v10351_v7  ;;  %v5567_v50 = vshll.u32 %v10283_v40, 16 }
 0x1e5   : > { %v2719_v58 = vcombine.low %v2711_v38, %v2718_v30  ;;  %v10368_v33 = vrot.slane %v5559_v54, 1  ;;  %v4711_v19 = vshll.u32 %v12181_v8, 16  ;;  %v4715_v39 = vshrl.u32 %v12181_v8, 16 }
 0x1e6   : > { %v10370_v45 = vcombine.low %v2760_v5, %v2767_v22  ;;  %5390 = vrot.lane.b32.xlu0 %v10283_v40, %s7969_s20  ;;  %v4719_v63 = vshll.u32 %v10151_v56, 16  ;;  %v1877_v61 = vcombine.high %v8657_v46, %v8657_v46  ;;  %v10388_v42 = vrot.slane %v5567_v50, 1  ;;  %v12184_v46 = vld [vmem:[#allocation65_spill] sm:$0xff]  ;;  %v10402_v5 = vpop.permute.xlu1 %4586 }
 0x1e7   : > { %v3399_v14 = vshll.u32 %v2719_v58, 16  ;;  %v3403_v2 = vshrl.u32 %v2719_v58, 16  ;;  %3331 = vst.msk [vmem:[#allocation3 + $0x28] sm:$0xff] %vm204_vm4, %v2719_v58  ;;  %12180 = vst [vmem:[#allocation77_spill] sm:$0xff] %v10368_v33  ;;  %5372 = vrot.lane.b32.xlu1 %v10237_v53, %s7969_s20  ;;  %v5565_v18 = vor.u32 %v5563_v16, %v10368_v33  ;;  %v10390_v30 = vrot.slane %v4711_v19, 1  ;;  %v10406_v16 = vpop.permute.xlu0 %5374  ;;  %v12187_v50 = vld [vmem:[#allocation21_spill] sm:$0xff] }
 0x1e8   : > { %v3407_v38 = vshll.u32 %v10370_v45, 16  ;;  %3332 = vst.msk [vmem:[#allocation3 + $0x30] sm:$0xff] %vm204_vm4, %v10370_v45  ;;  %12182 = vst [vmem:[#allocation79_spill] sm:$0xff] %v10388_v42  ;;  %v1900_v47 = vcombine.high %v12183_v35, %v12183_v35  ;;  %v10395_v34 = vrot.slane %v4719_v63, 1  ;;  %v2918_v58 = vcombine.low %v1877_v61, %v12183_v35  ;;  %v12188_v63 = vld [vmem:[#allocation101_spill] sm:$0xff] }
 0x1e9   : > { %v10379_v31 = vrot.slane %v3399_v14, 1  ;;  %v10400_v54 = vrot.slane %v12184_v46, %v8024_v9  ;;  %12185 = vst [vmem:[#allocation78_spill] sm:$0xff] %v10402_v5  ;;  %12186 = vst [vmem:[#allocation9_spill] sm:$0xff] %v10406_v16  ;;  %v10410_v14 = vsel %vm3358_vm0, %v5565_v18, %v10388_v42  ;;  %v5503_v61 = vshll.u32 %v12188_v63, 16  ;;  %v12189_v35 = vld [vmem:[#allocation37_spill] sm:$0xff]  ;;  %v12190_v18 = vld [vmem:[#allocation40_spill] sm:$0xff] }
 0x1ea   : > { %v10404_v22 = vrot.slane %v3407_v38, 1  ;;  %v2919_v8 = vcombine.low %v12187_v50, %v1900_v47  ;;  %3507 = vrot.lane.b32.xlu0 %v3370_v59, %s7972_s23  ;;  %v10417_v19 = vrot.slane %v2918_v58, %v8024_v9  ;;  %v5507_v38 = vshrl.u32 %v12188_v63, 16  ;;  %v12192_v47 = vld [vmem:[#allocation118_spill] sm:$0xff] }
 0x1eb   : > { %v3405_v60 = vor.u32 %v3403_v2, %v10379_v31  ;;  %v4717_v2 = vor.u32 %v4715_v39, %v10390_v30  ;;  %6042 = vrot.lane.b32.xlu1 %v5922_v0, %s7971_s22  ;;  %v12191_v46 = vcombine.low %v12189_v35, %v12190_v18  ;;  %v12193_v58 = vld [vmem:[#allocation22_spill] sm:$0xff]  ;;  %v10438_v5 = vrot.slane %v5503_v61, 1  ;;  %v12197_v35 = vld [vmem:[#allocation71_spill] sm:$0xff] }
 0x1ec   : > { %v2947_v0 = vrot.slane %v2919_v8, %v8024_v9  ;;  %v12194_v50 = vcombine.low %v12192_v47, %v12193_v58  ;;  %v5045_v13 = vcombine.low %v12195_v32, %v10417_v19  ;;  %v12198_v18 = vld [vmem:[#allocation51_spill] sm:$0xff]  ;;  %v12200_v16 = vld [vmem:[#allocation114_spill] sm:$0xff]  ;;  %v12201_v8 = vld [vmem:[#allocation109_spill] sm:$0xff]  ;;  %v10454_v58 = vpop.permute.xlu1 %5362 }
 0x1ed   : > { %v3152_v10 = vrot.slane %v12191_v46, %v8024_v9  ;;  %v3410_v39 = vsel %vm3358_vm0, %v3405_v60, %v10404_v22  ;;  %v10429_v59 = vsel %vm3358_vm0, %v4717_v2, %v10395_v34  ;;  %12196 = vst [vmem:[#allocation7_spill] sm:$0xff] %v10438_v5  ;;  %v3193_v46 = vcombine.low %v12198_v18, %v12197_v35  ;;  %v12199_v60 = vld [vmem:[#allocation115_spill] sm:$0xff]  ;;  %v12202_v42 = vld [vmem:[#allocation10_spill] sm:$0xff] }
 0x1ee   : > { %v3159_v51 = vrot.slane %v12194_v50, %v8024_v9  ;;  %v3194_v55 = vcombine.low %v12200_v16, %v12199_v60  ;;  %v5046_v2 = vcombine.low %v2947_v0, %v10400_v54  ;;  %v4683_v63 = vshrl.u32 %v12201_v8, 16  ;;  %4819 = vrot.lane.b32.xlu0 %v10290_v48, %s7973_s24  ;;  %12203 = vst [vmem:[#allocation6_spill] sm:$0xff] %v10454_v58  ;;  %v10457_v50 = vpop.permute.xlu0 %6026 }
 0x1ef   : > { %v4687_v40 = vshll.u32 %v12202_v42, 16  ;;  %5605 = vrot.lane.b32.xlu1 %v10317_v21, %s7974_s25  ;;  %v5053_v61 = vrot.slane %v5045_v13, %v8024_v9  ;;  %v5509_v47 = vor.u32 %v5507_v38, %v10438_v5  ;;  %v3201_v16 = vrot.slane %v3193_v46, %v8024_v9  ;;  %12205 = vst [vmem:[#allocation8_spill] sm:$0xff] %v10457_v50  ;;  %v12206_v38 = vld [vmem:[#allocation70_spill] sm:$0xff]  ;;  %v12209_v5 = vld [vmem:[#allocation59_spill] sm:$0xff]  ;;  %v12210_v50 = vld [vmem:[#allocation60_spill] sm:$0xff] }
 0x1f0   : > { %v3160_v12 = vcombine.low %v3152_v10, %v3159_v51  ;;  %v12204_v10 = vld [vmem:[#allocation84_spill] sm:$0xff]  ;;  %v5060_v35 = vrot.slane %v5046_v2, %v8024_v9  ;;  %v3208_v48 = vrot.slane %v3194_v55, %v8024_v9  ;;  %v4685_v13 = vor.u32 %v4683_v63, %v10174_v3  ;;  %v12207_v46 = vld [vmem:[#allocation58_spill] sm:$0xff]  ;;  %v12213_v3 = vld [vmem:[#allocation61_spill] sm:$0xff] }
 0x1f1   : > { %v4727_v51 = vshll.u32 %v12204_v10, 16  ;;  %v10463_v21 = vrot.slane %v4687_v40, 1  ;;  %v12208_v8 = vcombine.low %v12206_v38, %v12207_v46  ;;  %v12211_v27 = vcombine.low %v12209_v5, %v12210_v50  ;;  %v12219_v38 = vld [vmem:[#allocation46_spill] sm:$0xff] }
 0x1f2   : > { %v3471_v18 = vshll.u32 %v3160_v12, 16  ;;  %v3475_v60 = vshrl.u32 %v3160_v12, 16  ;;  %3340 = vst.msk [vmem:[#allocation3 + $0x70] sm:$0xff] %vm204_vm4, %v3160_v12  ;;  %v10473_v33 = vcombine.low %v5053_v61, %v5060_v35  ;;  %v10475_v55 = vcombine.low %v3201_v16, %v3208_v48  ;;  %5595 = vrot.lane.b32.xlu0 %v10349_v62, %s7974_s25  ;;  %v10506_v48 = vpop.permute.xlu0 %5238 }
 0x1f3   : > { %v2809_v58 = vrot.slane %v12208_v8, %v8024_v9  ;;  %v2816_v2 = vrot.slane %v12211_v27, %v8024_v9  ;;  %v2850_v40 = vcombine.low %v12213_v3, %v10167_v41  ;;  %4847 = vrot.lane.b32.xlu1 %v10365_v1, %s7973_s24  ;;  %v4690_v12 = vsel %vm3358_vm0, %v4685_v13, %v10463_v21  ;;  %v12221_v3 = vld [vmem:[#allocation47_spill] sm:$0xff] }
 0x1f4   : > { %12212 = vst [vmem:[#allocation25_spill] sm:$0xff] %v10473_v33  ;;  %v10477_v28 = vrot.slane %v3471_v18, 1  ;;  %v2851_v27 = vcombine.low %v10177_v6, %v10180_v29  ;;  %v10489_v63 = vrot.slane %v4727_v51, 1  ;;  %v5511_v61 = vshll.u32 %v10473_v33, 16  ;;  %3341 = vst.msk [vmem:[#allocation3 + $0x78] sm:$0xff] %vm204_vm4, %v10475_v55  ;;  %v10500_v29 = vpop.permute.xlu1 %6014  ;;  %v12217_v18 = vld [vmem:[#allocation96_spill] sm:$0xff] }
 0x1f5   : > { %v2817_v5 = vcombine.low %v2809_v58, %v2816_v2  ;;  %v3479_v41 = vshll.u32 %v10475_v55, 16  ;;  %v2858_v62 = vrot.slane %v2850_v40, %v8024_v9  ;;  %v2949_v6 = vcombine.low %v10417_v19, %v2947_v0  ;;  %12214 = vst [vmem:[#allocation81_spill] sm:$0xff] %v10500_v29  ;;  %12216 = vst [vmem:[#allocation20_spill] sm:$0xff] %v10506_v48  ;;  %v12220_v2 = vld [vmem:[#allocation49_spill] sm:$0xff]  ;;  %v12259_v29 = vld [vmem:[#allocation19_spill] sm:$0xff] }
 0x1f6   : > { %v3477_v16 = vor.u32 %v3475_v60, %v10477_v28  ;;  %v2865_v1 = vrot.slane %v2851_v27, %v8024_v9  ;;  %v10502_v51 = vrot.slane %v5511_v61, 1  ;;  %v12218_v60 = vcombine.low %v12217_v18, %v12195_v32  ;;  %3517 = vrot.lane.b32.xlu0 %v3410_v39, %s7972_s23  ;;  %v12225_v18 = vld [vmem:[#allocation67_spill] sm:$0xff] }
 0x1f7   : > { %v3415_v50 = vshll.u32 %v2817_v5, 16  ;;  %v3419_v58 = vshrl.u32 %v2817_v5, 16  ;;  %3333 = vst.msk [vmem:[#allocation3 + $0x38] sm:$0xff] %vm204_vm4, %v2817_v5  ;;  %v10504_v35 = vrot.slane %v3479_v41, 1  ;;  %v2997_v46 = vcombine.low %v10400_v54, %v12219_v38  ;;  %5623 = vrot.lane.b32.xlu1 %v10410_v14, %s7974_s25  ;;  %v12222_v5 = vld [vmem:[#allocation92_spill] sm:$0xff] }
 0x1f8   : > { %12215 = vst [vmem:[#allocation48_spill] sm:$0xff] %v10502_v51  ;;  %v2956_v13 = vrot.slane %v12218_v60, %v8024_v9  ;;  %v10517_v19 = vcombine.low %v2858_v62, %v2865_v1  ;;  %v2963_v8 = vrot.slane %v2949_v6, %v8024_v9  ;;  %v2998_v40 = vcombine.low %v12221_v3, %v12220_v2  ;;  %v12223_v1 = vld [vmem:[#allocation93_spill] sm:$0xff]  ;;  %v12226_v60 = vld [vmem:[#allocation50_spill] sm:$0xff]  ;;  %v10550_v2 = vpop.permute.xlu1 %4466  ;;  %v10552_v3 = vpop.permute.xlu0 %4484 }
 0x1f9   : > { %v10519_v0 = vrot.slane %v3415_v50, 1  ;;  %v5514_v32 = vsel %vm3358_vm0, %v5509_v47, %v10502_v51  ;;  %v3482_v54 = vsel %vm3358_vm0, %v3477_v16, %v10504_v35  ;;  %v3005_v39 = vrot.slane %v2997_v46, %v8024_v9  ;;  %v12224_v50 = vld [vmem:[#allocation102_spill] sm:$0xff]  ;;  %12227 = vst [vmem:[#allocation65_spill] sm:$0xff] %v10550_v2  ;;  %12228 = vst [vmem:[#allocation21_spill] sm:$0xff] %v10552_v3  ;;  %v12237_v3 = vld [vmem:[#allocation91_spill] sm:$0xff] }
 0x1fa   : > { %v1838_v14 = vcombine.high %v12222_v5, %v12222_v5  ;;  %v3423_v61 = vshll.u32 %v10517_v19, 16  ;;  %3334 = vst.msk [vmem:[#allocation3 + $0x40] sm:$0xff] %vm204_vm4, %v10517_v19  ;;  %v2964_v41 = vcombine.low %v2956_v13, %v2963_v8  ;;  %v3012_v62 = vrot.slane %v2998_v40, %v8024_v9  ;;  %4829 = vrot.lane.b32.xlu0 %v10429_v59, %s7973_s24  ;;  %v12230_v59 = vld [vmem:[#allocation11_spill] sm:$0xff] }
 0x1fb   : > { %v3421_v27 = vor.u32 %v3419_v58, %v10519_v0  ;;  %v10539_v16 = vrot.slane %v12224_v50, %v8024_v9  ;;  %v4731_v6 = vshrl.u32 %v12204_v10, 16  ;;  %v3046_v38 = vcombine.low %v12226_v60, %v12225_v18  ;;  %5609 = vrot.lane.b32.xlu1 %v5514_v32, %s7974_s25  ;;  %v12232_v18 = vld [vmem:[#allocation88_spill] sm:$0xff]  ;;  %v12268_v10 = vld [vmem:[#allocation38_spill] sm:$0xff] }
 0x1fc   : > { %v4023_v47 = vcombine.low %v12223_v1, %v1838_v14  ;;  %v10547_v58 = vrot.slane %v3423_v61, 1  ;;  %v3013_v13 = vcombine.low %v3005_v39, %v3012_v62  ;;  %v3439_v46 = vshll.u32 %v2964_v41, 16  ;;  %3336 = vst.msk [vmem:[#allocation3 + $0x50] sm:$0xff] %vm204_vm4, %v2964_v41  ;;  %v12229_v14 = vld [vmem:[#allocation31_spill] sm:$0xff] }
 0x1fd   : > { %v3443_v8 = vshrl.u32 %v2964_v41, 16  ;;  %v4733_v5 = vor.u32 %v4731_v6, %v10489_v63  ;;  %v3047_v1 = vcombine.low %v12230_v59, %v12229_v14  ;;  %v3054_v32 = vrot.slane %v3046_v38, %v8024_v9  ;;  %v12231_v6 = vld [vmem:[#allocation116_spill] sm:$0xff]  ;;  %v12234_v38 = vld [vmem:[#allocation89_spill] sm:$0xff]  ;;  %v12235_v59 = vld [vmem:[#allocation90_spill] sm:$0xff] }
 0x1fe   : > { %v10555_v40 = vrot.slane %v4023_v47, %v8024_v9  ;;  %v3426_v39 = vsel %vm3358_vm0, %v3421_v27, %v10547_v58  ;;  %v10563_v61 = vrot.slane %v3439_v46, 1  ;;  %v3447_v41 = vshll.u32 %v3013_v13, 16  ;;  %3337 = vst.msk [vmem:[#allocation3 + $0x58] sm:$0xff] %vm204_vm4, %v3013_v13  ;;  %3535 = vrot.lane.b32.xlu0 %v3482_v54, %s7972_s23 }
 0x1ff   : > { %v3451_v62 = vshrl.u32 %v3013_v13, 16  ;;  %v3061_v50 = vrot.slane %v3047_v1, %v8024_v9  ;;  %v12233_v60 = vcombine.low %v12231_v6, %v12232_v18  ;;  %v12236_v27 = vcombine.low %v12234_v38, %v12235_v59  ;;  %4821 = vrot.lane.b32.xlu1 %v4690_v12, %s7973_s24  ;;  %v12238_v38 = vld [vmem:[#allocation14_spill] sm:$0xff] }
 0x200   : > { %v4054_v47 = vcombine.low %v10555_v40, %v10539_v16  ;;  %v3445_v13 = vor.u32 %v3443_v8, %v10563_v61  ;;  %v3449_v2 = vrot.slane %v3447_v41, 1  ;;  %v3291_v1 = vcombine.low %v12237_v3, %v10214_v37  ;;  %v10591_v41 = vpop.permute.xlu1 %4604  ;;  %v12240_v37 = vld [vmem:[#allocation103_spill] sm:$0xff] }
 0x201   : > { %v3250_v14 = vrot.slane %v12233_v60, %v8024_v9  ;;  %v3257_v46 = vrot.slane %v12236_v27, %v8024_v9  ;;  %v3292_v51 = vcombine.low %v10221_v43, %v10226_v11  ;;  %v10585_v18 = vcombine.low %v3054_v32, %v3061_v50  ;;  %12239 = vst [vmem:[#allocation37_spill] sm:$0xff] %v10591_v41  ;;  %v10596_v43 = vpop.permute.xlu0 %4468  ;;  %v12244_v50 = vld [vmem:[#allocation56_spill] sm:$0xff] }
 0x202   : > { %v4068_v6 = vrot.slane %v4054_v47, %v8024_v9  ;;  %v4751_v59 = vshll.u32 %v12238_v38, 16  ;;  %v3450_v54 = vsel %vm3358_vm0, %v3445_v13, %v3449_v2  ;;  %v3453_v27 = vor.u32 %v3451_v62, %v3449_v2  ;;  %12242 = vst [vmem:[#allocation118_spill] sm:$0xff] %v10596_v43  ;;  %3521 = vrot.lane.b32.xlu0 %v3426_v39, %s7972_s23 }
 0x203   : > { %v3258_v60 = vcombine.low %v3250_v14, %v3257_v46  ;;  %v3299_v12 = vrot.slane %v3291_v1, %v8024_v9  ;;  %v3306_v8 = vrot.slane %v3292_v51, %v8024_v9  ;;  %v3455_v11 = vshll.u32 %v10585_v18, 16  ;;  %3338 = vst.msk [vmem:[#allocation3 + $0x60] sm:$0xff] %vm204_vm4, %v10585_v18  ;;  %3527 = vrot.lane.b32.xlu1 %v3450_v54, %s7972_s23 }
 0x204   : > { %v10594_v3 = vcombine.low %v12240_v37, %v4068_v6  ;;  %v10606_v2 = vrot.slane %v4751_v59, 1  ;;  %v4755_v62 = vshrl.u32 %v12238_v38, 16  ;;  %v4759_v14 = vshll.u32 %v12244_v50, 16  ;;  %v12245_v6 = vld [vmem:[#allocation18_spill] sm:$0xff]  ;;  %v12247_v38 = vld [vmem:[#allocation105_spill] sm:$0xff] }
 0x205   : > { %v3487_v32 = vshll.u32 %v3258_v60, 16  ;;  %v3491_v47 = vshrl.u32 %v3258_v60, 16  ;;  %3342 = vst.msk [vmem:[#allocation3 + $0x80] sm:$0xff] %vm204_vm4, %v3258_v60  ;;  %v10604_v51 = vcombine.low %v3299_v12, %v3306_v8  ;;  %v10611_v13 = vrot.slane %v3455_v11, 1  ;;  %v12246_v60 = vld [vmem:[#allocation17_spill] sm:$0xff]  ;;  %v12248_v12 = vld [vmem:[#allocation16_spill] sm:$0xff] }
 0x206   : > { %12241 = vst [vmem:[#allocation40_spill] sm:$0xff] %v10594_v3  ;;  %12243 = vst [vmem:[#allocation22_spill] sm:$0xff] %v10606_v2  ;;  %v4735_v46 = vshll.u32 %v10594_v3, 16  ;;  %v2557_v37 = vcombine.low %v12246_v60, %v12245_v6  ;;  %v4757_v59 = vor.u32 %v4755_v62, %v10606_v2  ;;  %v10621_v54 = vrot.slane %v4759_v14, 1  ;;  %v12258_v2 = vld [vmem:[#allocation33_spill] sm:$0xff] }
 0x207   : > { %v10613_v1 = vrot.slane %v3487_v32, 1  ;;  %v3495_v39 = vshll.u32 %v10604_v51, 16  ;;  %3343 = vst.msk [vmem:[#allocation3 + $0x88] sm:$0xff] %vm204_vm4, %v10604_v51  ;;  %v12249_v8 = vcombine.low %v12247_v38, %v12248_v12  ;;  %v3458_v32 = vsel %vm3358_vm0, %v3453_v27, %v10611_v13  ;;  %v10644_v12 = vpop.permute.xlu0 %4606 }
 0x208   : > { %v10627_v43 = vrot.slane %v4735_v46, 1  ;;  %v2571_v60 = vrot.slane %v2557_v37, %v8024_v9  ;;  %3529 = vrot.lane.b32.xlu1 %v3458_v32, %s7972_s23  ;;  %v4762_v62 = vsel %vm3358_vm0, %v4757_v59, %v10621_v54  ;;  %v3371_v14 = vshrl.u32 %v10266_v4, 16  ;;  %v10640_v46 = vpop.permute.xlu1 %4588  ;;  %12253 = vst [vmem:[#allocation115_spill] sm:$0xff] %v10644_v12  ;;  %v12254_v37 = vld [vmem:[#allocation29_spill] sm:$0xff] }
 0x209   : > { %v2564_v11 = vrot.slane %v12249_v8, %v8024_v9  ;;  %v3493_v6 = vor.u32 %v3491_v47, %v10613_v1  ;;  %v10634_v41 = vrot.slane %v3495_v39, 1  ;;  %v4691_v38 = vshrl.u32 %v12202_v42, 16  ;;  %12252 = vst [vmem:[#allocation51_spill] sm:$0xff] %v10640_v46  ;;  %v12255_v42 = vld [vmem:[#allocation35_spill] sm:$0xff] }
 0x20a   : > { %12250 = vst [vmem:[#allocation100_spill] sm:$0xff] %v10627_v43  ;;  %v4738_v27 = vsel %vm3358_vm0, %v4733_v5, %v10627_v43  ;;  %v4695_v8 = vshll.u32 %v12254_v37, 16  ;;  %v5459_v39 = vshrl.u32 %v9584_v26, 16  ;;  %v5463_v32 = vshll.u32 %v12255_v42, 16  ;;  %v7952_v5 = vld [vmem:[%s11715_s1] sm:$0xff]   ;;  %v12256_v26 = vld [vmem:[#allocation68_spill] sm:$0xff] }
 0x20b   : > { %12251 = vst [vmem:[#allocation71_spill] sm:$0xff] %v10634_v41  ;;  %v2572_v47 = vcombine.low %v2564_v11, %v2571_v60  ;;  %4833 = vrot.lane.b32.xlu0 %v4738_v27, %s7973_s24  ;;  %v3498_v59 = vsel %vm3358_vm0, %v3493_v6, %v10634_v41  ;;  %v4693_v4 = vor.u32 %v4691_v38, %v10463_v21  ;;  %v5527_v27 = vshll.u32 %v12256_v26, 16  ;;  %v12257_v38 = vld [vmem:[#allocation112_spill] sm:$0xff] }
 0x20c   : > { %v3373_v46 = vor.u32 %v3371_v14, %v10296_v36  ;;  %v10658_v60 = vrot.slane %v4695_v8, 1  ;;  %4839 = vrot.lane.b32.xlu1 %v4762_v62, %s7973_s24  ;;  %v5461_v6 = vor.u32 %v5459_v39, %v10319_v23  ;;  %v5531_v21 = vshrl.u32 %v12256_v26, 16  ;;  %7883 = vmatprep.subr.bf16.mxu0 %v7952_v5  ;;  %v7953_v36 = vld [vmem:[%s11715_s1 + $0x8] sm:$0xff]   ;;  %v10680_v3 = vpop.permute.xlu1 %5242 }
 0x20d   : > { %v3375_v11 = vshll.u32 %v2572_v47, 16  ;;  %3328 = vst.msk [vmem:[#allocation3 + $0x10] sm:$0xff] %vm204_vm4, %v2572_v47  ;;  %v5535_v12 = vshll.u32 %v12257_v38, 16  ;;  %v2605_v33 = vcombine.low %v12259_v29, %v12258_v2  ;;  %v10672_v48 = vrot.slane %v5527_v27, 1  ;;  %v12260_v62 = vld [vmem:[#allocation106_spill] sm:$0xff]  ;;  %v12261_v23 = vld [vmem:[#allocation107_spill] sm:$0xff]  ;;  %7884 = vmatpush3.bf16.msra.mxu0 %v7952_v5  ;;  %7925 = vmatprep.subr.bf16.mxu1 %v7952_v5 }
 0x20e   : > { %v4698_v8 = vsel %vm3358_vm0, %v4693_v4, %v10658_v60  ;;  %v2606_v39 = vcombine.low %v12261_v23, %v12260_v62  ;;  %v5465_v26 = vrot.slane %v5463_v32, 1  ;;  %v3379_v43 = vshrl.u32 %v2572_v47, 16  ;;  %12262 = vst [vmem:[#allocation114_spill] sm:$0xff] %v10680_v3  ;;  %7885 = vmatprep.subr.bf16.mxu0 %v7953_v36  ;;  %7928 = vmatpush3.bf16.msra.mxu1 %v7952_v5  ;;  %v12266_v47 = vld [vmem:[#allocation108_spill] sm:$0xff]  ;;  %v12267_v3 = vld [vmem:[#allocation26_spill] sm:$0xff] }
 0x20f   : > { %v3377_v14 = vrot.slane %v3375_v11, 1  ;;  %3539 = vrot.lane.b32.xlu0 %v3498_v59, %s7972_s23  ;;  %v10677_v29 = vrot.slane %v5535_v12, 1  ;;  %v2613_v2 = vrot.slane %v2605_v33, %v8024_v9  ;;  %v10683_v11 = vpop.permute.xlu0 %4590  ;;  %v5533_v27 = vor.u32 %v5531_v21, %v10672_v48  ;;  %v12264_v12 = vld [vmem:[#allocation69_spill] sm:$0xff]  ;;  %v12265_v33 = vld [vmem:[#allocation36_spill] sm:$0xff]  ;;  %7926 = vmatprep.subr.bf16.mxu1 %v7953_v36 }
 0x210   : > { %12263 = vst [vmem:[#allocation109_spill] sm:$0xff] %v10683_v11  ;;  %v2620_v62 = vrot.slane %v2606_v39, %v8024_v9  ;;  %v5467_v23 = vshrl.u32 %v12255_v42, 16  ;;  %4823 = vrot.lane.b32.xlu1 %v4698_v8, %s7973_s24  ;;  %v5471_v59 = vshll.u32 %v12264_v12, 16  ;;  %v2654_v32 = vcombine.low %v12266_v47, %v12265_v33 }
 0x211   : > { %v3378_v4 = vsel %vm3358_vm0, %v3373_v46, %v3377_v14  ;;  %v2655_v41 = vcombine.low %v12268_v10, %v12267_v3  ;;  %v5538_v46 = vsel %vm3358_vm0, %v5533_v27, %v10677_v29  ;;  %v5475_v39 = vshrl.u32 %v12264_v12, 16  ;;  %7886 = vmatpush3.bf16.msra.mxu0 %v7953_v36 }
 0x212   : > { %v2621_v21 = vcombine.low %v2613_v2, %v2620_v62  ;;  %v5469_v11 = vor.u32 %v5467_v23, %v5465_v26  ;;  %v5473_v42 = vrot.slane %v5471_v59, 1  ;;  %v2662_v5 = vrot.slane %v2654_v32, %v8024_v9  ;;  %7929 = vmatpush3.bf16.msra.mxu1 %v7953_v36  ;;  %v10709_v23 = vpop.permute.xlu1 %5380 }
 0x213   : > { %3509 = vrot.lane.b32.xlu0 %v3378_v4, %s7972_s23  ;;  %v2669_v8 = vrot.slane %v2655_v41, %v8024_v9  ;;  %v5479_v33 = vshll.u32 %v9984_v49, 16  ;;  %v5466_v10 = vsel %vm3358_vm0, %v5461_v6, %v5465_v26  ;;  %v10702_v3 = vpop.permute.xlu0 %5260  ;;  %v3381_v47 = vor.u32 %v3379_v43, %v3377_v14  ;;  %v12269_v43 = vld [vmem:[#allocation15_spill] sm:$0xff]  ;;  %v12270_v14 = vld [vmem:[#allocation62_spill] sm:$0xff] }
 0x214   : > { %v3383_v27 = vshll.u32 %v2621_v21, 16  ;;  %3329 = vst.msk [vmem:[#allocation3 + $0x18] sm:$0xff] %vm204_vm4, %v2621_v21  ;;  %v3387_v2 = vshrl.u32 %v2621_v21, 16  ;;  %5615 = vrot.lane.b32.xlu1 %v5538_v46, %s7974_s25  ;;  %v5474_v4 = vsel %vm3358_vm0, %v5469_v11, %v5473_v42  ;;  %v4763_v41 = vshrl.u32 %v12244_v50, 16  ;;  %v12272_v11 = vld [vmem:[#allocation63_spill] sm:$0xff]  ;;  %v12273_v46 = vld [vmem:[#allocation110_spill] sm:$0xff] }
 0x215   : > { %v10707_v62 = vcombine.low %v2662_v5, %v2669_v8  ;;  %v5477_v6 = vor.u32 %v5475_v39, %v5473_v42  ;;  %v10712_v26 = vrot.slane %v5479_v33, 1  ;;  %v12271_v59 = vcombine.low %v12269_v43, %v12270_v14  ;;  %v12276_v8 = vld [vmem:[#allocation113_spill] sm:$0xff] }
 0x216   : > { %v3385_v12 = vrot.slane %v3383_v27, 1  ;;  %v12274_v50 = vcombine.low %v12272_v11, %v12273_v46  ;;  %v4767_v33 = vshll.u32 %v12276_v8, 16  ;;  %v4765_v14 = vor.u32 %v4763_v41, %v10621_v54 }
 0x217   : > { %v3103_v32 = vrot.slane %v12271_v59, %v8024_v9  ;;  %5597 = vrot.lane.b32.xlu0 %v5466_v10, %s7974_s25  ;;  %v3391_v36 = vshll.u32 %v10707_v62, 16  ;;  %3330 = vst.msk [vmem:[#allocation3 + $0x20] sm:$0xff] %vm204_vm4, %v10707_v62  ;;  %v10727_v42 = vpop.permute.xlu0 %5244  ;;  %v5482_v43 = vsel %vm3358_vm0, %v5477_v6, %v10712_v26  ;;  %v10737_v59 = vpop.permute.xlu1 %5364  ;;  %v4699_v6 = vshrl.u32 %v12254_v37, 16 }
 0x218   : > { %v3110_v21 = vrot.slane %v12274_v50, %v8024_v9  ;;  %v3386_v39 = vsel %vm3358_vm0, %v3381_v47, %v3385_v12  ;;  %12275 = vst [vmem:[#allocation10_spill] sm:$0xff] %v10727_v42  ;;  %v3389_v5 = vor.u32 %v3387_v2, %v3385_v12  ;;  %5599 = vrot.lane.b32.xlu1 %v5474_v4, %s7974_s25  ;;  %v4771_v2 = vshrl.u32 %v12276_v8, 16 }
 0x219   : > { %v10731_v10 = vrot.slane %v3391_v36, 1  ;;  %v4775_v4 = vshll.u32 %v10050_v15, 16  ;;  %v12277_v36 = vld [vmem:[#allocation39_spill] sm:$0xff]  ;;  %v5539_v50 = vshrl.u32 %v12257_v38, 16 }
 0x21a   : > { %v3111_v27 = vcombine.low %v3103_v32, %v3110_v21  ;;  %v4769_v32 = vrot.slane %v4767_v33, 1  ;;  %v4703_v54 = vshll.u32 %v12277_v36, 16  ;;  %v12279_v21 = vld [vmem:[#allocation73_spill] sm:$0xff]  ;;  %v4701_v33 = vor.u32 %v4699_v6, %v10658_v60 }
 0x21b   : > { %3511 = vrot.lane.b32.xlu0 %v3386_v39, %s7972_s23  ;;  %v3394_v12 = vsel %vm3358_vm0, %v3389_v5, %v10731_v10  ;;  %v10747_v46 = vpop.permute.xlu0 %5382  ;;  %v5543_v39 = vshll.u32 %v12279_v21, 16  ;;  %v10752_v42 = vrot.slane %v4775_v4, 1  ;;  %v4707_v5 = vshrl.u32 %v12277_v36, 16  ;;  %v12280_v36 = vld [vmem:[#allocation95_spill] sm:$0xff] }
 0x21c   : > { %v3463_v47 = vshll.u32 %v3111_v27, 16  ;;  %v3467_v11 = vshrl.u32 %v3111_v27, 16  ;;  %3339 = vst.msk [vmem:[#allocation3 + $0x68] sm:$0xff] %vm204_vm4, %v3111_v27  ;;  %5601 = vrot.lane.b32.xlu1 %v5482_v43, %s7974_s25  ;;  %12278 = vst [vmem:[#allocation70_spill] sm:$0xff] %v10747_v46  ;;  %v4773_v27 = vor.u32 %v4771_v2, %v4769_v32  ;;  %v4770_v37 = vsel %vm3358_vm0, %v4765_v14, %v4769_v32  ;;  %v10759_v46 = vpop.permute.xlu1 %6036 }
 0x21d   : > { %v4705_v43 = vrot.slane %v4703_v54, 1  ;;  %v5541_v38 = vor.u32 %v5539_v50, %v10677_v29  ;;  %v5547_v2 = vshrl.u32 %v12279_v21, 16  ;;  %v3459_v6 = vshrl.u32 %v10585_v18, 16  ;;  %v667_v21 = vld [vmem:[#allocation2 + $0xc8] sm:$0x1] }
 0x21e   : > { %v3465_v41 = vrot.slane %v3463_v47, 1  ;;  %v4778_v60 = vsel %vm3358_vm0, %v4773_v27, %v10752_v42  ;;  %v4795_v29 = vshrl.u32 %v10186_v20, 16  ;;  %v2899_v54 = vcombine.low %v10170_v25, %v12280_v36  ;;  %v12284_v36 = vld [vmem:[#allocation23_spill] sm:$0xff] }
 0x21f   : > { %3513 = vrot.lane.b32.xlu0 %v3394_v12, %s7972_s23  ;;  %v10765_v4 = vpop.permute.xlu0 %5366  ;;  %v4709_v14 = vor.u32 %v4707_v5, %v4705_v43  ;;  %v5551_v12 = vshll.u32 %v10033_v17, 16  ;;  %v4706_v32 = vsel %vm3358_vm0, %v4701_v33, %v4705_v43  ;;  %v7762_v5 = vld.sshfl [vmem:[#allocation2 + $0xc4] sm:$0x33 pattern:$0x75316420]  ;;  %v5483_v33 = vshrl.u32 %v9984_v49, 16 }
 0x220   : > { %v3469_v8 = vor.u32 %v3467_v11, %v3465_v41  ;;  %v5545_v11 = vrot.slane %v5543_v39, 1  ;;  %v4797_v27 = vor.u32 %v4795_v29, %v10351_v7  ;;  %v3461_v7 = vor.u32 %v3459_v6, %v10611_v13  ;;  %v12283_v6 = vld [vmem:[#allocation99_spill] sm:$0xff] }
 0x221   : > { %v4714_v25 = vsel %vm3358_vm0, %v4709_v14, %v10390_v30  ;;  %v2319_v30 = vcombine.high %v7762_v5, %v7762_v5  ;;  %v10801_v14 = vrot.slane %v7762_v5, %v8024_v9  ;;  %v3483_v49 = vshrl.u32 %v10475_v55, 16 }
 0x222   : > { %v3474_v47 = vsel %vm3358_vm0, %v3469_v8, %v10477_v28  ;;  %v3411_v28 = vshrl.u32 %v10370_v45, 16  ;;  %v5546_v39 = vsel %vm3358_vm0, %v5541_v38, %v5545_v11  ;;  %v5549_v8 = vor.u32 %v5547_v2, %v5545_v11 }
 0x223   : > { %3533 = vrot.lane.b32.xlu1 %v3474_v47, %s7972_s23  ;;  %4841 = vrot.lane.b32.xlu0 %v4770_v37, %s7973_s24  ;;  %v4799_v45 = vshll.u32 %v10324_v52, 16  ;;  %v10782_v18 = vpop.permute.xlu0 %6018  ;;  %v10784_v37 = vpop.permute.xlu1 %6020  ;;  %v3395_v47 = vshrl.u32 %v10707_v62, 16  ;;  %v668_v2 = vsel %vm8297_vm6, 0, %v667_v21  ;;  %v5787_v29 = vcombine.low %v12283_v6, %v10555_v40  ;;  %v12285_v40 = vld [vmem:[#allocation97_spill] sm:$0xff] }
 0x224   : > { %v3413_v50 = vor.u32 %v3411_v28, %v10404_v22  ;;  %v5553_v22 = vrot.slane %v5551_v12, 1  ;;  %669 = vst [vmem:[#allocation2 + $0xc8] sm:$0x1] %v668_v2  ;;  %v5788_v55 = vcombine.low %v10539_v16, %v12284_v36  ;;  %v12286_v16 = vld [vmem:[#allocation98_spill] sm:$0xff]  ;;  %v3350_v11 = vrot.slane %v9419_v44, %v8024_v9 }
 0x225   : > { %v10795_v38 = vrot.slane %v4799_v45, 1  ;;  %v3397_v21 = vor.u32 %v3395_v47, %v10731_v10  ;;  %v2311_v45 = vcombine.high %v9436_v24, %v9436_v24  ;;  %v12287_v5 = vcombine.low %v12285_v40, %v12286_v16  ;;  %v12290_v16 = vld [vmem:[#allocation77_spill] sm:$0xff] }
 0x226   : > { %v10791_v43 = vsel %vm3358_vm0, %v3413_v50, %v10519_v0  ;;  %v5554_v12 = vsel %vm3358_vm0, %v5549_v8, %v5553_v22  ;;  %v3466_v50 = vsel %vm3358_vm0, %v3461_v7, %v3465_v41  ;;  %v10827_v8 = vrot.slane %v5787_v29, %v8024_v9 }
 0x227   : > { %4843 = vrot.lane.b32.xlu1 %v4778_v60, %s7973_s24  ;;  %4825 = vrot.lane.b32.xlu0 %v4706_v32, %s7973_s24  ;;  %v12282_v60 = vld [vmem:[#allocation94_spill] sm:$0xff]  ;;  %v10807_v0 = vsel %vm3358_vm0, %v4797_v27, %v10795_v38  ;;  %v10810_v13 = vpop.permute.xlu0 %4486  ;;  %v10812_v62 = vpop.permute.xlu1 %4470  ;;  %v5485_v32 = vor.u32 %v5483_v33, %v10712_v26  ;;  %v2907_v27 = vrot.slane %v2899_v54, %v8024_v9  ;;  %v5555_v10 = vshrl.u32 %v10033_v17, 16 }
 0x228   : > { %v1023_v28 = vrot.slane %v12282_v60, 4  ;;  %v10830_v26 = vrot.slane %v5788_v55, %v8024_v9  ;;  %v2914_v41 = vrot.slane %v12287_v5, %v8024_v9  ;;  %v4723_v54 = vshrl.u32 %v10151_v56, 16 }
 0x229   : > { %v5490_v47 = vsel %vm3358_vm0, %v5485_v32, %v10184_v57  ;;  %v2333_v56 = vrot.slane %v2319_v30, %v8024_v9  ;;  %v5557_v30 = vor.u32 %v5555_v10, %v5553_v22  ;;  %v3357_v55 = vrot.slane %v3350_v11, %v8024_v9 }
 0x22a   : > { %v2915_v17 = vcombine.low %v2907_v27, %v2914_v41  ;;  %v4725_v36 = vor.u32 %v4723_v54, %v10395_v34  ;;  %v2334_v27 = vcombine.high %v10801_v14, %v10801_v14  ;;  %vm4516_vm6 = vcmask 97344  }
 0x22b   : > { %4827 = vrot.lane.b32.xlu1 %v4714_v25, %s7973_s24  ;;  %5617 = vrot.lane.b32.xlu0 %v5546_v39, %s7974_s25  ;;  %v4779_v39 = vshrl.u32 %v10050_v15, 16  ;;  %v3485_v15 = vor.u32 %v3483_v49, %v10504_v35  ;;  %v3427_v25 = vshrl.u32 %v10517_v19, 16  ;;  %v10842_v33 = vpop.permute.xlu0 %4488  ;;  %v10844_v7 = vpop.permute.xlu1 %4608  ;;  %v5803_v35 = vcombine.low %v10827_v8, %v10830_v26  ;;  %v1183_v60 = vld [vmem:[#allocation2 + $0xc8] sm:$0x1] }
 0x22c   : > { %v3402_v19 = vsel %vm3358_vm0, %v3397_v21, %v10379_v31  ;;  %v1184_v32 = vsel %vm8009_vm3, %v1023_v28, %v1183_v60  ;;  %v3431_v6 = vshll.u32 %v2915_v17, 16  ;;  %3335 = vst.msk [vmem:[#allocation3 + $0x48] sm:$0xff] %vm204_vm4, %v2915_v17  ;;  %v3435_v29 = vshrl.u32 %v2915_v17, 16  ;;  %v12289_v21 = vld [vmem:[#allocation83_spill] sm:$0xff] }
 0x22d   : > { %v4781_v2 = vor.u32 %v4779_v39, %v10752_v42  ;;  %v3429_v49 = vor.u32 %v3427_v25, %v10547_v58  ;;  %v5499_v31 = vshrl.u32 %v10237_v53, 16  ;;  %1185 = vst [vmem:[#allocation2 + $0xc8] sm:$0x1] %v1184_v32  ;;  %v3490_v28 = vsel %vm3358_vm0, %v3485_v15, %v10613_v1  ;;  %v12293_v32 = vld [vmem:[#allocation7_spill] sm:$0xff] }
 0x22e   : > { %v10874_v39 = vld.sshfl [vmem:[#allocation2 + $0xcc] sm:$0x33 pattern:$0x75316420]  ;;  %v7800_v53 = vcombine.high %v9419_v44, %v9436_v24  ;;  %v5190_v34 = vcombine.low %v10801_v14, %v2333_v56  ;;  %v5562_v5 = vsel %vm3358_vm0, %v5557_v30, %v12290_v16  ;;  %v4730_v44 = vsel %vm3358_vm0, %v4725_v36, %v10489_v63 }
 0x22f   : > { %5619 = vrot.lane.b32.xlu1 %v5554_v12, %s7974_s25  ;;  %3531 = vrot.lane.b32.xlu0 %v3466_v50, %s7972_s23  ;;  %v4536_v12 = vcombine.low %v2311_v45, %v10801_v14  ;;  %v10865_v58 = vpop.permute.xlu0 %4472  ;;  %v10867_v42 = vpop.permute.xlu1 %4592  ;;  %v3433_v50 = vrot.slane %v3431_v6, 1  ;;  %v4786_v22 = vsel %vm3358_vm0, %v4781_v2, %v12289_v21  ;;  %v12291_v24 = vld [vmem:[#allocation87_spill] sm:$0xff]  ;;  %v3499_v15 = vshrl.u32 %v10604_v51, 16 }
 0x230   : > { %v5501_v41 = vor.u32 %v5499_v31, %v12291_v24  ;;  %v3503_v25 = vshll.u32 %v3357_v55, 16  ;;  %v7801_v11 = vcombine.high %v10801_v14, %v2333_v56  ;;  %v5199_v17 = vrot.slane %v7800_v53, %v8024_v9  ;;  %v7765_v24 = vld.sshfl [vmem:[#allocation2 + $0xd0] sm:$0x33 pattern:$0x75316420] }
 0x231   : > { %v10882_v45 = vrot.slane %v4536_v12, %v8024_v9  ;;  %v10885_v1 = vsel %vm3358_vm0, %v3429_v49, %v3433_v50  ;;  %v3437_v40 = vor.u32 %v3435_v29, %v3433_v50  ;;  %v5206_v51 = vrot.slane %v5190_v34, %v8024_v9  ;;  %v12292_v49 = vld [vmem:[#allocation104_spill] sm:$0xff]  ;;  %v12294_v29 = vld [vmem:[#allocation71_spill] sm:$0xff] }
 0x232   : > { %v4537_v2 = vcombine.low %v2333_v56, %v2334_v27  ;;  %v5506_v6 = vsel %vm3358_vm0, %v5501_v41, %v12293_v32  ;;  %v3501_v30 = vor.u32 %v3499_v15, %v12294_v29  ;;  %v5213_v36 = vrot.slane %v7801_v11, %v8024_v9 }
 0x233   : > { %5603 = vrot.lane.b32.xlu1 %v5490_v47, %s7974_s25  ;;  %3515 = vrot.lane.b32.xlu0 %v3402_v19, %s7972_s23  ;;  %v10895_v10 = vpop.permute.xlu0 %4610  ;;  %v10897_v54 = vpop.permute.xlu1 %5262  ;;  %v10901_v47 = vrot.slane %v10874_v39, %v8024_v9  ;;  %v10906_v63 = vsel %vm3358_vm0, %v3437_v40, %v10563_v61  ;;  %v2335_v19 = vcombine.high %v2333_v56, %v2333_v56  ;;  %v3505_v56 = vrot.slane %v3503_v25, 1 }
 0x234   : > { %v7763_v60 = vld.sshfl [vmem:[#allocation2 + $0xc8] sm:$0x1 pattern:$0x75316420]  ;;  %v4567_v12 = vcombine.low %v12292_v49, %v10882_v45  ;;  %v10925_v50 = vrot.slane %v4537_v2, %v8024_v9  ;;  %v4803_v11 = vshrl.u32 %v10324_v52, 16  ;;  %v2381_v2 = vcombine.high %v7765_v24, %v7765_v24 }
 0x235   : > { %v2349_v57 = vrot.slane %v7763_v60, %v8024_v9  ;;  %v3506_v27 = vsel %vm3358_vm0, %v3501_v30, %v3505_v56  ;;  %v10976_v56 = vrot.slane %v7765_v24, %v8024_v9  ;;  %v7954_v24 = vld [vmem:[%s11715_s1 + $0x10] ss:$0 sps:$4 sm:$0x33]   ;;  %vm6187_vm3 = vcmask 1041408  }
 0x236   : > { %v4575_v40 = vrot.slane %v4567_v12, %v8024_v9  ;;  %v12296_v12 = vld [vmem:[#allocation79_spill] sm:$0xff]  ;;  %7931 = vmatprep.subr.msk.bf16.mxu0 %vm6187_vm3, %v7954_v24  ;;  %7932 = vmatprep.subr.msk.bf16.mxu1 %vm6187_vm3, %v7954_v24  ;;  %vm3561_vm4 = vcmask 64544  }
 0x237   : > { %3537 = vrot.lane.b32.xlu1 %v3490_v28, %s7972_s23  ;;  %4845 = vrot.lane.b32.xlu0 %v4786_v22, %s7973_s24  ;;  %v10915_v14 = vpop.permute.xlu0 %5264  ;;  %v10917_v61 = vpop.permute.xlu1 %5246  ;;  %v5192_v31 = vcombine.low %v2349_v57, %v10901_v47  ;;  %v5221_v28 = vcombine.low %v5199_v17, %v5206_v51  ;;  %v4538_v55 = vcombine.low %v2335_v19, %v2349_v57 }
 0x238   : > { %v2357_v19 = vcombine.high %v10874_v39, %v10874_v39 }
 0x239   : > { %v5220_v21 = vrot.slane %v5192_v31, %v8024_v9  ;;  %v10930_v22 = vrot.slane %v4538_v55, %v8024_v9  ;;  %v2372_v55 = vcombine.high %v10901_v47, %v10901_v47 }
 0x23a   : > { %v10973_v30 = vrot.slane %v2357_v19, %v8024_v9 }
 0x23b   : > { %4831 = vrot.lane.b32.xlu1 %v4730_v44, %s7973_s24  ;;  %5621 = vrot.lane.b32.xlu0 %v5562_v5, %s7974_s25  ;;  %v10934_v53 = vpop.permute.xlu0 %5248  ;;  %v10936_v34 = vpop.permute.xlu1 %5384  ;;  %v5222_v16 = vcombine.low %v5213_v36, %v5220_v21  ;;  %v5229_v5 = vrot.slane %v5221_v28, %v8024_v9  ;;  %v4568_v44 = vcombine.low %v10925_v50, %v10930_v22 }
 0x23c   : > { %v10979_v36 = vrot.slane %v2381_v2, %v8024_v9  ;;  %v5311_v19 = vcombine.low %v10973_v30, %v2372_v55 }
 0x23d   : > { %v5236_v41 = vrot.slane %v5222_v16, %v8024_v9  ;;  %v4582_v25 = vrot.slane %v4568_v44, %v8024_v9  ;;  %v2396_v16 = vcombine.high %v10976_v56, %v10976_v56 }
 0x23f   : > { %5607 = vrot.lane.b32.xlu1 %v5506_v6, %s7974_s25  ;;  %3519 = vrot.lane.b32.xlu0 %v10791_v43, %s7972_s23  ;;  %v12295_v43 = vld [vmem:[#allocation85_spill] sm:$0xff]  ;;  %v10950_v17 = vpop.permute.xlu0 %5386  ;;  %v10952_v51 = vpop.permute.xlu1 %5368  ;;  %v10956_v60 = vcombine.low %v5229_v5, %v5236_v41  ;;  %v10958_v49 = vcombine.low %v4575_v40, %v4582_v25  ;;  %v2373_v40 = vcombine.high %v10973_v30, %v10973_v30  ;;  %v12299_v41 = vld [vmem:[#allocation40_spill] sm:$0xff]  ;;  %v12300_v25 = vld [vmem:[#allocation30_spill] sm:$0xff] }
 0x240   : > { %v5571_v15 = vshrl.u32 %v12295_v43, 16  ;;  %v2397_v5 = vcombine.high %v10979_v36, %v10979_v36 }
 0x241   : > { %v5575_v32 = vshll.u32 %v10956_v60, 16  ;;  %v4807_v6 = vshll.u32 %v10958_v49, 16 }
 0x242   : > { %v5573_v57 = vor.u32 %v5571_v15, %v12296_v12  ;;  %v4739_v15 = vshrl.u32 %v12299_v41, 16 }
 0x243   : > { %3541 = vrot.lane.b32.xlu1 %v3506_v27, %s7972_s23  ;;  %4849 = vrot.lane.b32.xlu0 %v10807_v0, %s7973_s24  ;;  %v4805_v0 = vor.u32 %v4803_v11, %v10795_v38  ;;  %v10968_v29 = vpop.permute.xlu0 %6022  ;;  %v10981_v31 = vrot.slane %v5575_v32, 1  ;;  %v10983_v8 = vrot.slane %v4807_v6, 1  ;;  %v7766_v38 = vld.sshfl [vmem:[#allocation2 + $0xd4] sm:$0x1 pattern:$0x75316420]  ;;  %v5313_v32 = vcombine.low %v10979_v36, %v2396_v16 }
 0x244   : > { %v10970_v39 = vpop.permute.xlu1 %6038  ;;  %v11005_v44 = vrot.slane %v7766_v38, %v8024_v9  ;;  %v4743_v11 = vshll.u32 %v12300_v25, 16  ;;  %v6189_v6 = vsel %vm6187_vm3, %v7954_v24, 0  ;;  %v12301_v38 = vld [vmem:[#allocation100_spill] sm:$0xff] }
 0x245   : > { %v5578_v26 = vsel %vm3358_vm0, %v5573_v57, %v10981_v31  ;;  %v4810_v28 = vsel %vm3358_vm0, %v4805_v0, %v10983_v8  ;;  %v5312_v57 = vcombine.low %v2373_v40, %v10976_v56  ;;  %7888 = vmatpush3.bf16.msra.mxu0 %v6189_v6  ;;  %7930 = vmatpush3.bf16.msra.mxu1 %v6189_v6 }
 0x246   : > { %v5314_v0 = vcombine.low %v2397_v5, %v11005_v44  ;;  %v5321_v40 = vrot.slane %v5311_v19, %v8024_v9  ;;  %v5335_v5 = vrot.slane %v5313_v32, %v8024_v9 }
 0x247   : > { %6028 = vrot.lane.b32.xlu1 %v5803_v35, %s7971_s22  ;;  %v12297_v35 = vld [vmem:[#allocation84_spill] sm:$0xff]  ;;  %5625 = vrot.lane.b32.xlu0 %v5578_v26, %s7974_s25  ;;  %v10994_v21 = vpop.permute.xlu0 %4490  ;;  %v11027_v26 = vrot.slane %v4743_v11, 1  ;;  %v5328_v16 = vrot.slane %v5312_v57, %v8024_v9  ;;  %v4663_v57 = vrot.slane %v10901_v47, %v8024_v9 }
 0x248   : > { %v10996_v27 = vpop.permute.xlu1 %6040  ;;  %v5342_v24 = vrot.slane %v5314_v0, %v8024_v9 }
 0x249   : > { %12298 = vst [vmem:[#allocation58_spill] sm:$0xff] %v10996_v27  ;;  %v5343_v6 = vcombine.low %v5321_v40, %v5328_v16  ;;  %v4811_v16 = vshrl.u32 %v10958_v49, 16 }
 0x24a   : > { %v5344_v19 = vcombine.low %v5335_v5, %v5342_v24  ;;  %v12305_v24 = vld [vmem:[#allocation111_spill] sm:$0xff] }
 0x24b   : > { %4478 = vrot.lane.b32.xlu1 %v12297_v35, %s7967_s18  ;;  %3523 = vrot.lane.b32.xlu0 %v10885_v1, %s7972_s23  ;;  %v11017_v2 = vpop.permute.xlu0 %4476  ;;  %v4741_v1 = vor.u32 %v4739_v15, %v12301_v38  ;;  %v5351_v32 = vrot.slane %v5343_v6, %v8024_v9  ;;  %v4670_v38 = vrot.slane %v4663_v57, %v8024_v9  ;;  %v5579_v57 = vshrl.u32 %v10956_v60, 16 }
 0x24c   : > { %v5358_v0 = vrot.slane %v5344_v19, %v8024_v9 }
 0x24d   : > { %v11019_v12 = vpop.permute.xlu1 %6024  ;;  %v4746_v11 = vsel %vm3358_vm0, %v4741_v1, %v11027_v26  ;;  %v4815_v5 = vshll.u32 %v4670_v38, 16 }
 0x24e   : > { %v11066_v40 = vcombine.low %v5351_v32, %v5358_v0  ;;  %v4813_v0 = vor.u32 %v4811_v16, %v10983_v8 }
 0x24f   : > { %4616 = vrot.lane.b32.xlu1 %v10324_v52, %s7968_s19  ;;  %4494 = vrot.lane.b32.xlu0 %v10186_v20, %s7967_s18  ;;  %v11031_v35 = vpop.permute.xlu0 %4614  ;;  %v4817_v38 = vrot.slane %v4815_v5, 1  ;;  %v5581_v5 = vor.u32 %v5579_v57, %v10981_v31  ;;  %v5948_v31 = vcombine.low %v10882_v45, %v10925_v50  ;;  %v12315_v50 = vld [vmem:[#allocation27_spill] sm:$0xff] }
 0x250   : > { %v5583_v32 = vshll.u32 %v11066_v40, 16 }
 0x251   : > { %v11033_v55 = vpop.permute.xlu1 %4596 }
 0x252   : > { %12302 = vst [vmem:[#allocation59_spill] sm:$0xff] %v11033_v55 }
 0x253   : > { %4600 = vrot.lane.b32.xlu1 %v12299_v41, %s7968_s19  ;;  %3525 = vrot.lane.b32.xlu0 %v10906_v63, %s7972_s23 }
 0x254   : > { %v11042_v15 = vpop.permute.xlu0 %5252 }
 0x255   : > { %v11044_v20 = vpop.permute.xlu1 %5266 }
 0x257   : > { %4851 = vrot.lane.b32.xlu1 %v4810_v28, %s7973_s24  ;;  %4496 = vrot.lane.b32.xlu0 %v10324_v52, %s7967_s18 }
 0x258   : > { %v11053_v28 = vpop.permute.xlu0 %5390 }
 0x259   : > { %12303 = vst [vmem:[#allocation60_spill] sm:$0xff] %v11053_v28  ;;  %v11055_v63 = vpop.permute.xlu1 %5372  ;;  %v12311_v28 = vld [vmem:[#allocation53_spill] sm:$0xff] }
 0x25a   : > { %12304 = vst [vmem:[#allocation61_spill] sm:$0xff] %v11055_v63  ;;  %v5519_v63 = vshll.u32 %v12311_v28, 16 }
 0x25b   : > { %4835 = vrot.lane.b32.xlu1 %v4746_v11, %s7973_s24  ;;  %4480 = vrot.lane.b32.xlu0 %v12299_v41, %s7967_s18  ;;  %v12306_v11 = vld [vmem:[#allocation119_spill] sm:$0xff]  ;;  %v5940_v41 = vcombine.low %v10901_v47, %v10973_v30 }
 0x25c   : > { %v3508_v1 = vpop.permute.xlu0 %3507 }
 0x25d   : > { %v11064_v52 = vpop.permute.xlu1 %6042  ;;  %3562 = vst.msk [vmem:[#allocation3] sm:$0xff] %vm3561_vm4, %v3508_v1  ;;  %v4747_v1 = vshrl.u32 %v12300_v25, 16 }
 0x25e   : > { %4517 = vst.msk [vmem:[#allocation3] sm:$0xff] %vm4516_vm6, %v12305_v24  ;;  %v12308_v24 = vld [vmem:[#allocation20_spill] sm:$0xff] }
 0x25f   : > { %5270 = vrot.lane.b32.xlu1 %v12295_v43, %s7970_s21  ;;  %4639 = vst.msk [vmem:[#allocation3] sm:$0xff] %vm4638_vm14, %v12306_v11  ;;  %v12307_v43 = vld [vmem:[#allocation101_spill] sm:$0xff]  ;;  %4618 = vrot.lane.b32.xlu0 %v10958_v49, %s7968_s19  ;;  %v12309_v49 = vld [vmem:[#allocation42_spill] sm:$0xff]  ;;  %v5947_v11 = vrot.slane %v5940_v41, %v8024_v9  ;;  %v4749_v55 = vor.u32 %v4747_v1, %v11027_v26  ;;  %v12313_v26 = vld [vmem:[#allocation48_spill] sm:$0xff] }
 0x260   : > { %v4820_v6 = vpop.permute.xlu0 %4819  ;;  %v12312_v41 = vld [vmem:[#allocation81_spill] sm:$0xff] }
 0x261   : > { %v11080_v19 = vpop.permute.xlu1 %5605  ;;  %4874 = vst.msk [vmem:[#allocation3] sm:$0xff] %vm4873_vm15, %v4820_v6  ;;  %v12310_v6 = vld [vmem:[#allocation25_spill] sm:$0xff]  ;;  %v5949_v57 = vcombine.low %v10930_v22, %v5947_v11  ;;  %v12316_v22 = vld [vmem:[#allocation24_spill] sm:$0xff] }
 0x262   : > { %5293 = vst.msk [vmem:[#allocation3] sm:$0xff] %vm5292_vm10, %v12308_v24  ;;  %v5515_v24 = vshrl.u32 %v12310_v6, 16  ;;  %v5804_v11 = vcombine.low %v12316_v22, %v12315_v50  ;;  %v12321_v50 = vld [vmem:[#allocation32_spill] sm:$0xff]  ;;  %v12322_v22 = vld [vmem:[#allocation34_spill] sm:$0xff] }
 0x263   : > { %5254 = vrot.lane.b32.xlu1 %v12307_v43, %s7970_s21  ;;  %5415 = vst.msk [vmem:[#allocation3] sm:$0xff] %vm5414_vm11, %v12309_v49  ;;  %4602 = vrot.lane.b32.xlu0 %v12300_v25, %s7968_s19  ;;  %v11097_v43 = vrot.slane %v5583_v32, 1  ;;  %v4818_v49 = vsel %vm3358_vm0, %v4813_v0, %v4817_v38  ;;  %v7767_v25 = vld.sshfl [vmem:[#allocation2 + $0xd8] sm:$0x33 pattern:$0x75316420] }
 0x264   : > { %v5596_v8 = vpop.permute.xlu0 %5595  ;;  %v5517_v1 = vor.u32 %v5515_v24, %v12313_v26  ;;  %v11121_v45 = vrot.slane %v7767_v25, %v8024_v9  ;;  %v12319_v24 = vld [vmem:[#allocation28_spill] sm:$0xff] }
 0x265   : > { %v4848_v16 = vpop.permute.xlu1 %4847  ;;  %5650 = vst.msk [vmem:[#allocation3] sm:$0xff] %vm5649_vm12, %v5596_v8  ;;  %v5586_v38 = vsel %vm3358_vm0, %v5581_v5, %v11097_v43  ;;  %v11115_v8 = vrot.slane %v5519_v63, 1  ;;  %v5956_v63 = vrot.slane %v5948_v31, %v8024_v9  ;;  %v12318_v5 = vld [vmem:[#allocation66_spill] sm:$0xff]  ;;  %v5812_v31 = vrot.slane %v5804_v11, %v8024_v9 }
 0x266   : > { %6069 = vst.msk [vmem:[#allocation3] sm:$0xff] %vm6068_vm13, %v12312_v41  ;;  %v12314_v41 = vld [vmem:[#allocation22_spill] sm:$0xff]  ;;  %v5805_v25 = vcombine.low %v12319_v24, %v12318_v5  ;;  %v12323_v5 = vld [vmem:[#allocation13_spill] sm:$0xff] }
 0x267   : > { %5392 = vrot.lane.b32.xlu1 %v10956_v60, %s7969_s20  ;;  %4853 = vrot.lane.b32.xlu0 %v4818_v49, %s7973_s24  ;;  %v4754_v27 = vsel %vm3358_vm0, %v4749_v55, %v12314_v41  ;;  %v12317_v49 = vld [vmem:[#allocation54_spill] sm:$0xff]  ;;  %v5963_v55 = vrot.slane %v5949_v57, %v8024_v9  ;;  %v5522_v26 = vsel %vm3358_vm0, %v5517_v1, %v11115_v8  ;;  %v12324_v24 = vld [vmem:[#allocation45_spill] sm:$0xff] }
 0x268   : > { %v3518_v32 = vpop.permute.xlu0 %3517  ;;  %v5819_v1 = vrot.slane %v5805_v25, %v8024_v9 }
 0x269   : > { %v5624_v0 = vpop.permute.xlu1 %5623  ;;  %3567 = vst.msk [vmem:[#allocation3 + $0x28] sm:$0xff] %vm3561_vm4, %v3518_v32  ;;  %v5964_v57 = vcombine.low %v5956_v63, %v5963_v55  ;;  %v12325_v55 = vld [vmem:[#allocation82_spill] sm:$0xff] }
 0x26a   : > { %4522 = vst.msk [vmem:[#allocation3 + $0x28] sm:$0xff] %vm4516_vm6, %v10865_v58 }
 0x26b   : > { %5376 = vrot.lane.b32.xlu1 %v12310_v6, %s7969_s20  ;;  %4644 = vst.msk [vmem:[#allocation3 + $0x28] sm:$0xff] %vm4638_vm14, %v12317_v49  ;;  %4837 = vrot.lane.b32.xlu0 %v4754_v27, %s7973_s24  ;;  %v12320_v27 = vld [vmem:[#allocation52_spill] sm:$0xff]  ;;  %v5821_v49 = vcombine.low %v12322_v22, %v12321_v50  ;;  %v5523_v50 = vshrl.u32 %v12311_v28, 16  ;;  %v12330_v22 = vld [vmem:[#allocation21_spill] sm:$0xff] }
 0x26c   : > { %v4830_v32 = vpop.permute.xlu0 %4829 }
 0x26d   : > { %v11135_v58 = vpop.permute.xlu1 %5609  ;;  %4879 = vst.msk [vmem:[#allocation3 + $0x28] sm:$0xff] %vm4873_vm15, %v4830_v32  ;;  %v6087_v41 = vld [vmem:[#allocation3] sm:$0xff]  ;;  %v5822_v32 = vcombine.low %v12324_v24, %v12323_v5  ;;  %v12332_v24 = vld [vmem:[#allocation9_spill] sm:$0xff] }
 0x26e   : > { %5298 = vst.msk [vmem:[#allocation3 + $0x28] sm:$0xff] %vm5292_vm10, %v10934_v53  ;;  %7889 = vmatprep.mubr.msk.bf16.mxu0 %vm6132_vm1, %v6087_v41  ;;  %v7802_v41 = vcombine.high %v10901_v47, %v10973_v30  ;;  %v12327_v47 = vld [vmem:[#allocation75_spill] sm:$0xff]  ;;  %v12328_v30 = vld [vmem:[#allocation76_spill] sm:$0xff] }
 0x26f   : > { %5627 = vrot.lane.b32.xlu1 %v5586_v38, %s7974_s25  ;;  %v5439_v38 = vrot.slane %v11121_v45, %v8024_v9  ;;  %5420 = vst.msk [vmem:[#allocation3 + $0x28] sm:$0xff] %vm5414_vm11, %v12320_v27  ;;  %5272 = vrot.lane.b32.xlu0 %v10956_v60, %s7970_s21  ;;  %v5820_v60 = vcombine.low %v5812_v31, %v5819_v1 }
 0x270   : > { %5655 = vst.msk [vmem:[#allocation3 + $0x28] sm:$0xff] %vm5649_vm12, %v11080_v19  ;;  %v3536_v53 = vpop.permute.xlu0 %3535  ;;  %v5829_v19 = vrot.slane %v5821_v49, %v8024_v9  ;;  %v5836_v25 = vrot.slane %v5822_v32, %v8024_v9  ;;  %v7803_v31 = vcombine.high %v10976_v56, %v10979_v36 }
 0x271   : > { %v11158_v11 = vpop.permute.xlu1 %4821  ;;  %6074 = vst.msk [vmem:[#allocation3 + $0x28] sm:$0xff] %vm6068_vm13, %v11019_v12  ;;  %v5446_v63 = vrot.slane %v5439_v38, %v8024_v9  ;;  %v5966_v38 = vcombine.low %v10976_v56, %v10979_v36  ;;  %v12329_v56 = vld [vmem:[#allocation37_spill] sm:$0xff] }
 0x272   : > { %3576 = vst.msk [vmem:[#allocation3 + $0x70] sm:$0xff] %vm3561_vm4, %v3536_v53  ;;  %v5837_v36 = vcombine.low %v5829_v19, %v5836_v25  ;;  %v5525_v53 = vor.u32 %v5523_v50, %v11115_v8  ;;  %v12334_v19 = vld [vmem:[#allocation41_spill] sm:$0xff] }
 0x273   : > { %5611 = vrot.lane.b32.xlu1 %v5522_v26, %s7974_s25  ;;  %4531 = vst.msk [vmem:[#allocation3 + $0x70] sm:$0xff] %vm4516_vm6, %v10994_v21  ;;  %5256 = vrot.lane.b32.xlu0 %v12310_v6, %s7970_s21  ;;  %v5968_v21 = vcombine.low %v11005_v44, %v11121_v45  ;;  %v5591_v6 = vshll.u32 %v5446_v63, 16  ;;  %v12326_v44 = vld [vmem:[#allocation86_spill] sm:$0xff]  ;;  %v5989_v45 = vrot.slane %v7803_v31, %v8024_v9 }
 0x274   : > { %4653 = vst.msk [vmem:[#allocation3 + $0x70] sm:$0xff] %vm4638_vm14, %v12325_v55  ;;  %v3522_v12 = vpop.permute.xlu0 %3521 }
 0x275   : > { %4888 = vst.msk [vmem:[#allocation3 + $0x70] sm:$0xff] %vm4873_vm15, %v4848_v16  ;;  %v3528_v26 = vpop.permute.xlu1 %3527  ;;  %v5587_v16 = vshrl.u32 %v11066_v40, 16  ;;  %v5996_v27 = vrot.slane %v5968_v21, %v8024_v9  ;;  %v5593_v1 = vrot.slane %v5591_v6, 1  ;;  %v12338_v21 = vld [vmem:[#allocation6_spill] sm:$0xff]  ;;  %v12341_v6 = vld [vmem:[#allocation51_spill] sm:$0xff] }
 0x276   : > { %5307 = vst.msk [vmem:[#allocation3 + $0x70] sm:$0xff] %vm5292_vm10, %v11044_v20  ;;  %v5975_v20 = vrot.slane %v7802_v41, %v8024_v9 }
 0x277   : > { %6046 = vrot.lane.b32.xlu1 %v5964_v57, %s7971_s22  ;;  %3569 = vst.msk [vmem:[#allocation3 + $0x38] sm:$0xff] %vm3561_vm4, %v3522_v12  ;;  %3572 = vst.msk [vmem:[#allocation3 + $0x50] sm:$0xff] %vm3561_vm4, %v3528_v26  ;;  %5394 = vrot.lane.b32.xlu0 %v11066_v40, %s7969_s20  ;;  %v5589_v57 = vor.u32 %v5587_v16, %v11097_v43  ;;  %v12331_v40 = vld [vmem:[#allocation115_spill] sm:$0xff]  ;;  %v5998_v5 = vcombine.low %v5989_v45, %v5996_v27  ;;  %v12335_v12 = vld [vmem:[#allocation78_spill] sm:$0xff] }
 0x278   : > { %5429 = vst.msk [vmem:[#allocation3 + $0x70] sm:$0xff] %vm5414_vm11, %v12326_v44  ;;  %v12337_v26 = vld [vmem:[#allocation72_spill] sm:$0xff]  ;;  %v12346_v27 = vld [vmem:[#allocation10_spill] sm:$0xff] }
 0x279   : > { %4524 = vst.msk [vmem:[#allocation3 + $0x38] sm:$0xff] %vm4516_vm6, %v11017_v2  ;;  %4527 = vst.msk [vmem:[#allocation3 + $0x50] sm:$0xff] %vm4516_vm6, %v12327_v47  ;;  %v5594_v32 = vsel %vm3358_vm0, %v5589_v57, %v5593_v1  ;;  %v6012_v8 = vrot.slane %v5998_v5, %v8024_v9  ;;  %v12353_v5 = vld [vmem:[#allocation64_spill] sm:$0xff] }
 0x27a   : > { %5664 = vst.msk [vmem:[#allocation3 + $0x70] sm:$0xff] %vm5649_vm12, %v5624_v0  ;;  %v3530_v2 = vpop.permute.xlu1 %3529  ;;  %v5982_v0 = vrot.slane %v5966_v38, %v8024_v9  ;;  %v12339_v38 = vld [vmem:[#allocation117_spill] sm:$0xff] }
 0x27b   : > { %4646 = vst.msk [vmem:[#allocation3 + $0x38] sm:$0xff] %vm4638_vm14, %v12328_v30  ;;  %4649 = vst.msk [vmem:[#allocation3 + $0x50] sm:$0xff] %vm4638_vm14, %v12329_v56  ;;  %6030 = vrot.lane.b32.xlu1 %v5820_v60, %s7971_s22  ;;  %5378 = vrot.lane.b32.xlu0 %v12311_v28, %s7969_s20  ;;  %v12333_v28 = vld [vmem:[#allocation43_spill] sm:$0xff]  ;;  %v5530_v60 = vsel %vm3358_vm0, %v5525_v53, %v10672_v48  ;;  %v12336_v48 = vld [vmem:[#allocation44_spill] sm:$0xff] }
 0x27c   : > { %6083 = vst.msk [vmem:[#allocation3 + $0x70] sm:$0xff] %vm6068_vm13, %v11064_v52  ;;  %v5997_v49 = vcombine.low %v5975_v20, %v5982_v0  ;;  %v12342_v30 = vld [vmem:[#allocation114_spill] sm:$0xff] }
 0x27d   : > { %3573 = vst.msk [vmem:[#allocation3 + $0x58] sm:$0xff] %vm3561_vm4, %v3530_v2  ;;  %v4834_v52 = vpop.permute.xlu0 %4833  ;;  %v12343_v56 = vld [vmem:[#allocation118_spill] sm:$0xff] }
 0x27e   : > { %4528 = vst.msk [vmem:[#allocation3 + $0x58] sm:$0xff] %vm4516_vm6, %v12330_v22  ;;  %v4840_v43 = vpop.permute.xlu1 %4839  ;;  %v6092_v22 = vld [vmem:[#allocation3 + $0x28] sm:$0xff] }
 0x27f   : > { %4881 = vst.msk [vmem:[#allocation3 + $0x38] sm:$0xff] %vm4873_vm15, %v4834_v52  ;;  %6032 = vrot.lane.b32.xlu1 %v5837_v36, %s7971_s22  ;;  %4884 = vst.msk [vmem:[#allocation3 + $0x50] sm:$0xff] %vm4873_vm15, %v4840_v43  ;;  %5629 = vrot.lane.b32.xlu0 %v5594_v32, %s7974_s25  ;;  %v12344_v36 = vld [vmem:[#allocation109_spill] sm:$0xff]  ;;  %v12354_v32 = vld [vmem:[#allocation60_spill] sm:$0xff] }
 0x280   : > { %4650 = vst.msk [vmem:[#allocation3 + $0x58] sm:$0xff] %vm4638_vm14, %v12331_v40  ;;  %v12351_v40 = vld [vmem:[#allocation57_spill] sm:$0xff] }
 0x281   : > { %5300 = vst.msk [vmem:[#allocation3 + $0x38] sm:$0xff] %vm5292_vm10, %v11042_v15  ;;  %v3540_v63 = vpop.permute.xlu0 %3539  ;;  %5303 = vst.msk [vmem:[#allocation3 + $0x50] sm:$0xff] %vm5292_vm10, %v12333_v28  ;;  %v6005_v15 = vrot.slane %v5997_v49, %v8024_v9  ;;  %v12352_v49 = vld [vmem:[#allocation61_spill] sm:$0xff] }
 0x282   : > { %5422 = vst.msk [vmem:[#allocation3 + $0x38] sm:$0xff] %vm5414_vm11, %v12332_v24  ;;  %5425 = vst.msk [vmem:[#allocation3 + $0x50] sm:$0xff] %vm5414_vm11, %v10709_v23  ;;  %v4824_v55 = vpop.permute.xlu1 %4823 }
 0x283   : > { %5657 = vst.msk [vmem:[#allocation3 + $0x38] sm:$0xff] %vm5649_vm12, %v11135_v58  ;;  %5613 = vrot.lane.b32.xlu0 %v5530_v60, %s7974_s25  ;;  %v6013_v25 = vcombine.low %v6005_v15, %v6012_v8  ;;  %v6101_v24 = vld [vmem:[#allocation3 + $0x70] sm:$0xff] }
 0x284   : > { %3578 = vst.msk [vmem:[#allocation3 + $0x80] sm:$0xff] %vm3561_vm4, %v3540_v63  ;;  %v12355_v63 = vld [vmem:[#allocation8_spill] sm:$0xff] }
 0x285   : > { %v3510_v58 = vpop.permute.xlu0 %3509  ;;  %v12356_v8 = vld [vmem:[#allocation80_spill] sm:$0xff] }
 0x286   : > { %3563 = vst.msk [vmem:[#allocation3 + $0x8] sm:$0xff] %vm3561_vm4, %v3510_v58  ;;  %v5616_v23 = vpop.permute.xlu1 %5615 }
 0x287   : > { %4518 = vst.msk [vmem:[#allocation3 + $0x8] sm:$0xff] %vm4516_vm6, %v12334_v19  ;;  %6048 = vrot.lane.b32.xlu0 %v6013_v25, %s7971_s22 }
 0x288   : > { %4640 = vst.msk [vmem:[#allocation3 + $0x8] sm:$0xff] %vm4638_vm14, %v12335_v12 }
 0x289   : > { %5660 = vst.msk [vmem:[#allocation3 + $0x50] sm:$0xff] %vm5649_vm12, %v5616_v23  ;;  %v5598_v9 = vpop.permute.xlu0 %5597 }
 0x28a   : > { %4875 = vst.msk [vmem:[#allocation3 + $0x8] sm:$0xff] %vm4873_vm15, %v11158_v11  ;;  %v5600_v41 = vpop.permute.xlu1 %5599  ;;  %v12340_v11 = vld [vmem:[#allocation65_spill] sm:$0xff] }
 0x28b   : > { %6079 = vst.msk [vmem:[#allocation3 + $0x50] sm:$0xff] %vm6068_vm13, %v12336_v48 }
 0x28c   : > { %5294 = vst.msk [vmem:[#allocation3 + $0x8] sm:$0xff] %vm5292_vm10, %v12337_v26 }
 0x28d   : > { %5416 = vst.msk [vmem:[#allocation3 + $0x8] sm:$0xff] %vm5414_vm11, %v12338_v21  ;;  %v3512_v31 = vpop.permute.xlu0 %3511 }
 0x28e   : > { %5651 = vst.msk [vmem:[#allocation3 + $0x8] sm:$0xff] %vm5649_vm12, %v5598_v9  ;;  %v5602_v16 = vpop.permute.xlu1 %5601 }
 0x28f   : > { %6070 = vst.msk [vmem:[#allocation3 + $0x8] sm:$0xff] %vm6068_vm13, %v12339_v38 }
 0x290   : > { %3564 = vst.msk [vmem:[#allocation3 + $0x10] sm:$0xff] %vm3561_vm4, %v3512_v31 }
 0x291   : > { %4519 = vst.msk [vmem:[#allocation3 + $0x10] sm:$0xff] %vm4516_vm6, %v12340_v11  ;;  %v3514_v47 = vpop.permute.xlu0 %3513 }
 0x292   : > { %4641 = vst.msk [vmem:[#allocation3 + $0x10] sm:$0xff] %vm4638_vm14, %v12341_v6  ;;  %v6097_v44 = vld [vmem:[#allocation3 + $0x50] sm:$0xff] }
 0x293   : > { %4876 = vst.msk [vmem:[#allocation3 + $0x10] sm:$0xff] %vm4873_vm15, %v4824_v55  ;;  %7909 = vmatprep.mubr.msk.bf16.mxu1 %vm6132_vm1, %v6097_v44 }
 0x294   : > { %5295 = vst.msk [vmem:[#allocation3 + $0x10] sm:$0xff] %vm5292_vm10, %v12342_v30 }
 0x295   : > { %3565 = vst.msk [vmem:[#allocation3 + $0x18] sm:$0xff] %vm3561_vm4, %v3514_v47  ;;  %v3534_v20 = vpop.permute.xlu1 %3533  ;;  %v4842_v0 = vpop.permute.xlu0 %4841 }
 0x296   : > { %5417 = vst.msk [vmem:[#allocation3 + $0x10] sm:$0xff] %vm5414_vm11, %v10737_v59  ;;  %v6088_v2 = vld [vmem:[#allocation3 + $0x8] sm:$0xff]  ;;  %v12345_v59 = vld [vmem:[#allocation70_spill] sm:$0xff] }
 0x297   : > { %4520 = vst.msk [vmem:[#allocation3 + $0x18] sm:$0xff] %vm4516_vm6, %v12343_v56  ;;  %7890 = vmatmul.mubr.msk.bf16.vlgmr.msra.gmra.mrb[0].mxu0 %vm6132_vm1, %v6088_v2 }
 0x298   : > { %5652 = vst.msk [vmem:[#allocation3 + $0x10] sm:$0xff] %vm5649_vm12, %v5600_v41 }
 0x299   : > { %4642 = vst.msk [vmem:[#allocation3 + $0x18] sm:$0xff] %vm4638_vm14, %v12344_v36  ;;  %v4826_v45 = vpop.permute.xlu0 %4825 }
 0x29a   : > { %6071 = vst.msk [vmem:[#allocation3 + $0x10] sm:$0xff] %vm6068_vm13, %v10782_v18  ;;  %v4844_v18 = vpop.permute.xlu1 %4843 }
 0x29b   : > { %3575 = vst.msk [vmem:[#allocation3 + $0x68] sm:$0xff] %vm3561_vm4, %v3534_v20 }
 0x29c   : > { %4885 = vst.msk [vmem:[#allocation3 + $0x58] sm:$0xff] %vm4873_vm15, %v4842_v0  ;;  %4877 = vst.msk [vmem:[#allocation3 + $0x18] sm:$0xff] %vm4873_vm15, %v4826_v45 }
 0x29d   : > { %4530 = vst.msk [vmem:[#allocation3 + $0x68] sm:$0xff] %vm4516_vm6, %v10842_v33 }
 0x29e   : > { %5304 = vst.msk [vmem:[#allocation3 + $0x58] sm:$0xff] %vm5292_vm10, %v10702_v3  ;;  %5296 = vst.msk [vmem:[#allocation3 + $0x18] sm:$0xff] %vm5292_vm10, %v12346_v27  ;;  %v4828_v57 = vpop.permute.xlu1 %4827  ;;  %v5618_v3 = vpop.permute.xlu0 %5617 }
 0x29f   : > { %4652 = vst.msk [vmem:[#allocation3 + $0x68] sm:$0xff] %vm4638_vm14, %v10895_v10 }
 0x2a0   : > { %5426 = vst.msk [vmem:[#allocation3 + $0x58] sm:$0xff] %vm5414_vm11, %v12345_v59  ;;  %5418 = vst.msk [vmem:[#allocation3 + $0x18] sm:$0xff] %vm5414_vm11, %v10765_v4 }
 0x2a1   : > { %v6089_v33 = vld [vmem:[#allocation3 + $0x10] sm:$0xff]  ;;  %5653 = vst.msk [vmem:[#allocation3 + $0x18] sm:$0xff] %vm5649_vm12, %v5602_v16  ;;  %5661 = vst.msk [vmem:[#allocation3 + $0x58] sm:$0xff] %vm5649_vm12, %v5618_v3 }
 0x2a2   : > { %7893 = vmatprep.mubr.msk.bf16.mxu0 %vm6132_vm1, %v6089_v33  ;;  %6072 = vst.msk [vmem:[#allocation3 + $0x18] sm:$0xff] %vm6068_vm13, %v10784_v37  ;;  %6080 = vst.msk [vmem:[#allocation3 + $0x58] sm:$0xff] %vm6068_vm13, %v10759_v46  ;;  %v5620_v10 = vpop.permute.xlu1 %5619  ;;  %v3532_v1 = vpop.permute.xlu0 %3531 }
 0x2a3   : > { %3574 = vst.msk [vmem:[#allocation3 + $0x60] sm:$0xff] %vm3561_vm4, %v3532_v1 }
 0x2a4   : > { %4529 = vst.msk [vmem:[#allocation3 + $0x60] sm:$0xff] %vm4516_vm6, %v10810_v13 }
 0x2a5   : > { %4651 = vst.msk [vmem:[#allocation3 + $0x60] sm:$0xff] %vm4638_vm14, %v10844_v7 }
 0x2a6   : > { %v5604_v4 = vpop.permute.xlu1 %5603  ;;  %4886 = vst.msk [vmem:[#allocation3 + $0x60] sm:$0xff] %vm4873_vm15, %v4844_v18  ;;  %v3516_v50 = vpop.permute.xlu0 %3515 }
 0x2a7   : > { %5305 = vst.msk [vmem:[#allocation3 + $0x60] sm:$0xff] %vm5292_vm10, %v10897_v54 }
 0x2a8   : > { %3566 = vst.msk [vmem:[#allocation3 + $0x20] sm:$0xff] %vm3561_vm4, %v3516_v50 }
 0x2a9   : > { %v6090_v37 = vld [vmem:[#allocation3 + $0x18] sm:$0xff]  ;;  %5427 = vst.msk [vmem:[#allocation3 + $0x60] sm:$0xff] %vm5414_vm11, %v10936_v34 }
 0x2aa   : > { %7894 = vmatmul.mubr.msk.bf16.gmra.mrb[4].mxu0 %vm6132_vm1, %v6090_v37  ;;  %v6098_v46 = vld [vmem:[#allocation3 + $0x58] sm:$0xff]  ;;  %4521 = vst.msk [vmem:[#allocation3 + $0x20] sm:$0xff] %vm4516_vm6, %v10812_v62  ;;  %v3538_v13 = vpop.permute.xlu1 %3537  ;;  %v4846_v7 = vpop.permute.xlu0 %4845  ;;  %v12347_v62 = vld [vmem:[#allocation55_spill] sm:$0xff]  ;;  %v7975_v37 = vmov 1983009808  }
 0x2ab   : > { %7910 = vmatmul.mubr.msk.bf16.vlgmr.msra.gmra.mrb[0].mxu1 %vm6132_vm1, %v6098_v46  ;;  %5662 = vst.msk [vmem:[#allocation3 + $0x60] sm:$0xff] %vm5649_vm12, %v5620_v10  ;;  %v6406_v46 = vunpack.c.l.s4 %v7975_v37 }
 0x2ac   : > { %4643 = vst.msk [vmem:[#allocation3 + $0x20] sm:$0xff] %vm4638_vm14, %v10867_v42 }
 0x2ad   : > { %6081 = vst.msk [vmem:[#allocation3 + $0x60] sm:$0xff] %vm6068_vm13, %v10970_v39  ;;  %v12349_v39 = vld [vmem:[#allocation74_spill] sm:$0xff] }
 0x2ae   : > { %4878 = vst.msk [vmem:[#allocation3 + $0x20] sm:$0xff] %vm4873_vm15, %v4828_v57  ;;  %4887 = vst.msk [vmem:[#allocation3 + $0x68] sm:$0xff] %vm4873_vm15, %v4846_v7  ;;  %v4832_v42 = vpop.permute.xlu1 %4831  ;;  %v5622_v54 = vpop.permute.xlu0 %5621  ;;  %v11407_v7 = vld [vmem:[%s11716_s2] ss:$0 sm:$0xff] }
 0x2af   : > { %3577 = vst.msk [vmem:[#allocation3 + $0x78] sm:$0xff] %vm3561_vm4, %v3538_v13  ;;  %v6407_v13 = vunpack.c.0.s8 %v6406_v46 }
 0x2b0   : > { %5297 = vst.msk [vmem:[#allocation3 + $0x20] sm:$0xff] %vm5292_vm10, %v10917_v61  ;;  %5306 = vst.msk [vmem:[#allocation3 + $0x68] sm:$0xff] %vm5292_vm10, %v10915_v14  ;;  %v12348_v61 = vld [vmem:[#allocation58_spill] sm:$0xff] }
 0x2b1   : > { %4532 = vst.msk [vmem:[#allocation3 + $0x78] sm:$0xff] %vm4516_vm6, %v12347_v62  ;;  %v12357_v62 = vld [vmem:[#allocation5_spill] sm:$0xff] }
 0x2b2   : > { %5419 = vst.msk [vmem:[#allocation3 + $0x20] sm:$0xff] %vm5414_vm11, %v10952_v51  ;;  %5428 = vst.msk [vmem:[#allocation3 + $0x68] sm:$0xff] %vm5414_vm11, %v10950_v17  ;;  %v5608_v14 = vpop.permute.xlu1 %5607  ;;  %v3520_v51 = vpop.permute.xlu0 %3519  ;;  %v12350_v17 = vld [vmem:[#allocation59_spill] sm:$0xff] }
 0x2b3   : > { %4654 = vst.msk [vmem:[#allocation3 + $0x78] sm:$0xff] %vm4638_vm14, %v11031_v35 }
 0x2b4   : > { %5654 = vst.msk [vmem:[#allocation3 + $0x20] sm:$0xff] %vm5649_vm12, %v5604_v4  ;;  %5663 = vst.msk [vmem:[#allocation3 + $0x68] sm:$0xff] %vm5649_vm12, %v5622_v54  ;;  %v6099_v34 = vld [vmem:[#allocation3 + $0x60] sm:$0xff] }
 0x2b5   : > { %6073 = vst.msk [vmem:[#allocation3 + $0x20] sm:$0xff] %vm6068_vm13, %v10968_v29  ;;  %6082 = vst.msk [vmem:[#allocation3 + $0x68] sm:$0xff] %vm6068_vm13, %v12348_v61  ;;  %7913 = vmatprep.mubr.msk.bf16.mxu1 %vm6132_vm1, %v6099_v34 }
 0x2b6   : > { %3568 = vst.msk [vmem:[#allocation3 + $0x30] sm:$0xff] %vm3561_vm4, %v3520_v51  ;;  %v3542_v35 = vpop.permute.xlu1 %3541  ;;  %v4850_v52 = vpop.permute.xlu0 %4849 }
 0x2b7   : > { %4523 = vst.msk [vmem:[#allocation3 + $0x30] sm:$0xff] %vm4516_vm6, %v12349_v39 }
 0x2b8   : > { %4645 = vst.msk [vmem:[#allocation3 + $0x30] sm:$0xff] %vm4638_vm14, %v12350_v17 }
 0x2b9   : > { %4880 = vst.msk [vmem:[#allocation3 + $0x30] sm:$0xff] %vm4873_vm15, %v4832_v42  ;;  %4889 = vst.msk [vmem:[#allocation3 + $0x78] sm:$0xff] %vm4873_vm15, %v4850_v52  ;;  %v11410_v42 = vsub.s32 %v6407_v13, %v12357_v62 }
 0x2ba   : > { %3579 = vst.msk [vmem:[#allocation3 + $0x88] sm:$0xff] %vm3561_vm4, %v3542_v35  ;;  %v6029_v53 = vpop.permute.xlu1 %6028  ;;  %v5626_v15 = vpop.permute.xlu0 %5625 }
 0x2bb   : > { %5299 = vst.msk [vmem:[#allocation3 + $0x30] sm:$0xff] %vm5292_vm10, %v12351_v40  ;;  %5308 = vst.msk [vmem:[#allocation3 + $0x78] sm:$0xff] %vm5292_vm10, %v12353_v5 }
 0x2bc   : > { %v6091_v29 = vld [vmem:[#allocation3 + $0x20] sm:$0xff]  ;;  %v6100_v43 = vld [vmem:[#allocation3 + $0x68] sm:$0xff]  ;;  %5421 = vst.msk [vmem:[#allocation3 + $0x30] sm:$0xff] %vm5414_vm11, %v12352_v49  ;;  %5430 = vst.msk [vmem:[#allocation3 + $0x78] sm:$0xff] %vm5414_vm11, %v12354_v32 }
 0x2bd   : > { %7897 = vmatprep.mubr.msk.bf16.mxu0 %vm6132_vm1, %v6091_v29  ;;  %7914 = vmatmul.mubr.msk.bf16.gmra.mrb[4].mxu1 %vm6132_vm1, %v6100_v43  ;;  %5656 = vst.msk [vmem:[#allocation3 + $0x30] sm:$0xff] %vm5649_vm12, %v5608_v14  ;;  %5665 = vst.msk [vmem:[#allocation3 + $0x78] sm:$0xff] %vm5649_vm12, %v5626_v15 }
 0x2be   : > { %7898 = vmatmul.mubr.msk.bf16.gmra.mrb[8].mxu0 %vm6132_vm1, %v6092_v22  ;;  %7917 = vmatprep.mubr.msk.bf16.mxu1 %vm6132_vm1, %v6101_v24  ;;  %6075 = vst.msk [vmem:[#allocation3 + $0x30] sm:$0xff] %vm6068_vm13, %v12355_v63  ;;  %6076 = vst.msk [vmem:[#allocation3 + $0x38] sm:$0xff] %vm6068_vm13, %v6029_v53  ;;  %v4479_v28 = vpop.permute.xlu1 %4478  ;;  %v3524_v19 = vpop.permute.xlu0 %3523 }
 0x2bf   : > { %6084 = vst.msk [vmem:[#allocation3 + $0x78] sm:$0xff] %vm6068_vm13, %v12356_v8 }
 0x2c0   : > { %3570 = vst.msk [vmem:[#allocation3 + $0x40] sm:$0xff] %vm3561_vm4, %v3524_v19 }
 0x2c1   : > { %4525 = vst.msk [vmem:[#allocation3 + $0x40] sm:$0xff] %vm4516_vm6, %v4479_v28 }
 0x2c2   : > { %v4617_v60 = vpop.permute.xlu1 %4616  ;;  %v4495_v23 = vpop.permute.xlu0 %4494 }
 0x2c3   : > { %4533 = vst.msk [vmem:[#allocation3 + $0x80] sm:$0xff] %vm4516_vm6, %v4495_v23 }
 0x2c4   : > { %4655 = vst.msk [vmem:[#allocation3 + $0x80] sm:$0xff] %vm4638_vm14, %v4617_v60 }
 0x2c5   : > { %v6093_v55 = vld [vmem:[#allocation3 + $0x30] sm:$0xff]  ;;  %v6094_v58 = vld [vmem:[#allocation3 + $0x38] sm:$0xff] }
 0x2c6   : > { %7901 = vmatprep.mubr.msk.bf16.mxu0 %vm6132_vm1, %v6093_v55  ;;  %v4601_v25 = vpop.permute.xlu1 %4600  ;;  %v6102_v12 = vld [vmem:[#allocation3 + $0x78] sm:$0xff]  ;;  %v3526_v48 = vpop.permute.xlu0 %3525 }
 0x2c7   : > { %7902 = vmatmul.mubr.msk.bf16.gmra.mrb[12].mxu0 %vm6132_vm1, %v6094_v58  ;;  %4647 = vst.msk [vmem:[#allocation3 + $0x40] sm:$0xff] %vm4638_vm14, %v4601_v25  ;;  %7918 = vmatmul.mubr.msk.bf16.gmra.mrb[8].mxu1 %vm6132_vm1, %v6102_v12 }
 0x2c8   : > { %3571 = vst.msk [vmem:[#allocation3 + $0x48] sm:$0xff] %vm3561_vm4, %v3526_v48 }
 0x2ca   : > { %v4852_v9 = vpop.permute.xlu1 %4851  ;;  %v4497_v21 = vpop.permute.xlu0 %4496 }
 0x2cb   : > { %4890 = vst.msk [vmem:[#allocation3 + $0x80] sm:$0xff] %vm4873_vm15, %v4852_v9 }
 0x2cc   : > { %4534 = vst.msk [vmem:[#allocation3 + $0x88] sm:$0xff] %vm4516_vm6, %v4497_v21 }
 0x2ce   : > { %v4836_v26 = vpop.permute.xlu1 %4835  ;;  %v4481_v38 = vpop.permute.xlu0 %4480 }
 0x2cf   : > { %4882 = vst.msk [vmem:[#allocation3 + $0x40] sm:$0xff] %vm4873_vm15, %v4836_v26 }
 0x2d0   : > { %4526 = vst.msk [vmem:[#allocation3 + $0x48] sm:$0xff] %vm4516_vm6, %v4481_v38 }
 0x2d2   : > { %v5271_v41 = vpop.permute.xlu1 %5270  ;;  %v4619_v11 = vpop.permute.xlu0 %4618 }
 0x2d3   : > { %5309 = vst.msk [vmem:[#allocation3 + $0x80] sm:$0xff] %vm5292_vm10, %v5271_v41 }
 0x2d4   : > { %4656 = vst.msk [vmem:[#allocation3 + $0x88] sm:$0xff] %vm4638_vm14, %v4619_v11 }
 0x2d6   : > { %v5255_v31 = vpop.permute.xlu1 %5254  ;;  %v4603_v6 = vpop.permute.xlu0 %4602 }
 0x2d7   : > { %5301 = vst.msk [vmem:[#allocation3 + $0x40] sm:$0xff] %vm5292_vm10, %v5255_v31 }
 0x2d8   : > { %4648 = vst.msk [vmem:[#allocation3 + $0x48] sm:$0xff] %vm4638_vm14, %v4603_v6 }
 0x2da   : > { %v5393_v16 = vpop.permute.xlu1 %5392  ;;  %v4854_v47 = vpop.permute.xlu0 %4853 }
 0x2db   : > { %5431 = vst.msk [vmem:[#allocation3 + $0x80] sm:$0xff] %vm5414_vm11, %v5393_v16 }
 0x2dc   : > { %4891 = vst.msk [vmem:[#allocation3 + $0x88] sm:$0xff] %vm4873_vm15, %v4854_v47 }
 0x2de   : > { %v5377_v44 = vpop.permute.xlu1 %5376  ;;  %v4838_v56 = vpop.permute.xlu0 %4837 }
 0x2df   : > { %5423 = vst.msk [vmem:[#allocation3 + $0x40] sm:$0xff] %vm5414_vm11, %v5377_v44 }
 0x2e0   : > { %4883 = vst.msk [vmem:[#allocation3 + $0x48] sm:$0xff] %vm4873_vm15, %v4838_v56 }
 0x2e2   : > { %v5628_v30 = vpop.permute.xlu1 %5627  ;;  %v5273_v2 = vpop.permute.xlu0 %5272 }
 0x2e3   : > { %5666 = vst.msk [vmem:[#allocation3 + $0x80] sm:$0xff] %vm5649_vm12, %v5628_v30 }
 0x2e4   : > { %5310 = vst.msk [vmem:[#allocation3 + $0x88] sm:$0xff] %vm5292_vm10, %v5273_v2 }
 0x2e6   : > { %v5612_v36 = vpop.permute.xlu1 %5611  ;;  %v5257_v0 = vpop.permute.xlu0 %5256 }
 0x2e7   : > { %5658 = vst.msk [vmem:[#allocation3 + $0x40] sm:$0xff] %vm5649_vm12, %v5612_v36 }
 0x2e8   : > { %5302 = vst.msk [vmem:[#allocation3 + $0x48] sm:$0xff] %vm5292_vm10, %v5257_v0 }
 0x2ea   : > { %v6047_v20 = vpop.permute.xlu1 %6046  ;;  %v5395_v18 = vpop.permute.xlu0 %5394 }
 0x2eb   : > { %6085 = vst.msk [vmem:[#allocation3 + $0x80] sm:$0xff] %vm6068_vm13, %v6047_v20 }
 0x2ec   : > { %5432 = vst.msk [vmem:[#allocation3 + $0x88] sm:$0xff] %vm5414_vm11, %v5395_v18 }
 0x2ee   : > { %v6031_v59 = vpop.permute.xlu1 %6030  ;;  %v5379_v27 = vpop.permute.xlu0 %5378 }
 0x2ef   : > { %6077 = vst.msk [vmem:[#allocation3 + $0x40] sm:$0xff] %vm6068_vm13, %v6031_v59 }
 0x2f0   : > { %5424 = vst.msk [vmem:[#allocation3 + $0x48] sm:$0xff] %vm5414_vm11, %v5379_v27 }
 0x2f2   : > { %v6103_v45 = vld [vmem:[#allocation3 + $0x80] sm:$0xff]  ;;  %v5630_v57 = vpop.permute.xlu0 %5629  ;;  %v6033_v3 = vpop.permute.xlu1 %6032 }
 0x2f3   : > { %7921 = vmatprep.mubr.msk.bf16.mxu1 %vm6132_vm1, %v6103_v45  ;;  %5667 = vst.msk [vmem:[#allocation3 + $0x88] sm:$0xff] %vm5649_vm12, %v5630_v57 }
 0x2f6   : > { %v6095_v33 = vld [vmem:[#allocation3 + $0x40] sm:$0xff]  ;;  %v5614_v10 = vpop.permute.xlu0 %5613 }
 0x2f7   : > { %7905 = vmatprep.mubr.msk.bf16.mxu0 %vm6132_vm1, %v6095_v33  ;;  %5659 = vst.msk [vmem:[#allocation3 + $0x48] sm:$0xff] %vm5649_vm12, %v5614_v10 }
 0x2f8   : > { %6078 = vst.msk [vmem:[#allocation3 + $0x48] sm:$0xff] %vm6068_vm13, %v6033_v3 }
 0x2fa   : > { %v6049_v1 = vpop.permute.xlu0 %6048 }
 0x2fb   : > { %6086 = vst.msk [vmem:[#allocation3 + $0x88] sm:$0xff] %vm6068_vm13, %v6049_v1 }
 0x2ff   : > { %v6096_v4 = vld [vmem:[#allocation3 + $0x48] sm:$0xff] }
 0x300   : > { %7906 = vmatmul.mubr.msk.bf16.gmra.mrb[16].mxu0 %vm6132_vm1, %v6096_v4 }
 0x302   : > { %v6104_v50 = vld [vmem:[#allocation3 + $0x88] sm:$0xff] }
 0x303   : > { %7922 = vmatmul.mubr.msk.bf16.gmra.mrb[12].mxu1 %vm6132_vm1, %v6104_v50 }
 0x36a   : > { %v7891_v54 = vpop.f32.mrb[0].mxu0 }
 0x36b   : > { %v6234_v61 = vadd.f32 %v7891_v54, %v11407_v7  ;;  %v6225_v34 = vpop.f32.mrb[1].mxu0 }
 0x36c   : > { %v6226_v14 = vadd.f32 %v11407_v7, %v6225_v34  ;;  %v7892_v51 = vpop.f32.mrb[2].mxu0 }
 0x36d   : > { %v6438_v39 = vcombine.high %v6234_v61, %v6234_v61  ;;  %v6445_v17 = vrot.slane %v6234_v61, %v11410_v42  ;;  %v6237_v29 = vadd.f32 %v7892_v51, %v11407_v7  ;;  %v6228_v35 = vpop.f32.mrb[3].mxu0 }
 0x36e   : > { %v6404_v52 = vcombine.high %v6226_v14, %v6226_v14  ;;  %v6411_v22 = vrot.slane %v6226_v14, %v11410_v42  ;;  %v6229_v40 = vadd.f32 %v11407_v7, %v6228_v35 }
 0x36f   : > { %v6452_v43 = vrot.slane %v6438_v39, %v11410_v42  ;;  %v6453_v49 = vcombine.high %v6445_v17, %v6445_v17  ;;  %v6462_v15 = vrot.slane %v6237_v29, %v11410_v42  ;;  %v6455_v48 = vcombine.high %v6237_v29, %v6237_v29 }
 0x370   : > { %v6418_v5 = vrot.slane %v6404_v52, %v11410_v42  ;;  %v6419_v24 = vcombine.high %v6411_v22, %v6411_v22  ;;  %v6421_v32 = vcombine.high %v6229_v40, %v6229_v40  ;;  %v6428_v53 = vrot.slane %v6229_v40, %v11410_v42 }
 0x371   : > { %v7042_v63 = vcombine.low %v6453_v49, %v6452_v43  ;;  %v6454_v28 = vcombine.high %v6452_v43, %v6452_v43  ;;  %v6469_v44 = vrot.slane %v6455_v48, %v11410_v42  ;;  %v6470_v47 = vcombine.high %v6462_v15, %v6462_v15 }
 0x372   : > { %v6420_v8 = vcombine.high %v6418_v5, %v6418_v5  ;;  %v7008_v55 = vcombine.low %v6411_v22, %v6419_v24  ;;  %v6435_v60 = vrot.slane %v6421_v32, %v11410_v42  ;;  %v6436_v58 = vcombine.high %v6428_v53, %v6428_v53 }
 0x373   : > { %v7043_v19 = vcombine.low %v6454_v28, %v6462_v15  ;;  %v7050_v9 = vrot.slane %v7042_v63, %v11410_v42  ;;  %v7059_v0 = vcombine.low %v6470_v47, %v6469_v44  ;;  %v6471_v50 = vcombine.high %v6469_v44, %v6469_v44 }
 0x374   : > { %v7009_v25 = vcombine.low %v6418_v5, %v6420_v8  ;;  %v6437_v23 = vcombine.high %v6435_v60, %v6435_v60  ;;  %v7025_v12 = vcombine.low %v6428_v53, %v6436_v58  ;;  %v7016_v21 = vrot.slane %v7008_v55, %v11410_v42 }
 0x375   : > { %v7057_v26 = vrot.slane %v7043_v19, %v11410_v42  ;;  %v7067_v35 = vrot.slane %v7059_v0, %v11410_v42 }
 0x376   : > { %v7023_v41 = vrot.slane %v7009_v25, %v11410_v42  ;;  %v7026_v38 = vcombine.low %v6435_v60, %v6437_v23  ;;  %v7033_v16 = vrot.slane %v7025_v12, %v11410_v42 }
 0x377   : > { %v7058_v31 = vcombine.low %v7050_v9, %v7057_v26 }
 0x378   : > { %v7024_v11 = vcombine.low %v7016_v21, %v7023_v41  ;;  %v7040_v6 = vrot.slane %v7026_v38, %v11410_v42 }
 0x379   : > { %7587 = vst.msk [vmem:[%s11430_s9 + $0x10] sm:$0xff] %vm7584_vm2, %v7058_v31 }
 0x37a   : > { %7585 = vst.msk [vmem:[%s11430_s9] sm:$0xff] %vm7584_vm2, %v7024_v11  ;;  %v7041_v30 = vcombine.low %v7033_v16, %v7040_v6 }
 0x37c   : > { %7586 = vst.msk [vmem:[%s11430_s9 + $0x8] sm:$0xff] %vm7584_vm2, %v7041_v30 }
 0x37d   : > { %v7895_v56 = vpop.f32.mrb[4].mxu0 }
 0x37e   : > { %v6250_v36 = vadd.f32 %v7895_v56, %v11407_v7  ;;  %v6241_v2 = vpop.f32.mrb[5].mxu0  ;;  %v7911_v20 = vpop.f32.mrb[0].mxu1 }
 0x37f   : > { %v6242_v59 = vadd.f32 %v11407_v7, %v6241_v2  ;;  %v11446_v18 = vadd.f32 %v7911_v20, %v11407_v7  ;;  %v7896_v45 = vpop.f32.mrb[6].mxu0  ;;  %v6305_v27 = vpop.f32.mrb[1].mxu1 }
 0x380   : > { %v6505_v33 = vcombine.high %v6250_v36, %v6250_v36  ;;  %v6512_v57 = vrot.slane %v6250_v36, %v11410_v42  ;;  %v6253_v3 = vadd.f32 %v7896_v45, %v11407_v7  ;;  %v6306_v10 = vadd.f32 %v11407_v7, %v6305_v27  ;;  %v6244_v1 = vpop.f32.mrb[7].mxu0  ;;  %v7912_v4 = vpop.f32.mrb[2].mxu1 }
 0x381   : > { %v6472_v37 = vcombine.high %v6242_v59, %v6242_v59  ;;  %v6479_v46 = vrot.slane %v6242_v59, %v11410_v42  ;;  %v6774_v13 = vcombine.high %v11446_v18, %v11446_v18  ;;  %v6308_v62 = vpop.f32.mrb[3].mxu1  ;;  %v6781_v8 = vrot.slane %v11446_v18, %v11410_v42 }
 0x382   : > { %v6519_v54 = vrot.slane %v6505_v33, %v11410_v42  ;;  %v6520_v61 = vcombine.high %v6512_v57, %v6512_v57  ;;  %v6522_v34 = vcombine.high %v6253_v3, %v6253_v3  ;;  %v6529_v14 = vrot.slane %v6253_v3, %v11410_v42 }
 0x383   : > { %v6486_v51 = vrot.slane %v6472_v37, %v11410_v42  ;;  %v7060_v39 = vcombine.low %v6471_v50, %v6479_v46  ;;  %v6788_v17 = vrot.slane %v6774_v13, %v11410_v42  ;;  %v6740_v29 = vcombine.high %v6306_v10, %v6306_v10 }
 0x384   : > { %v6521_v52 = vcombine.high %v6519_v54, %v6519_v54  ;;  %v11460_v22 = vrot.slane %v6522_v34, %v11410_v42  ;;  %v6537_v40 = vcombine.high %v6529_v14, %v6529_v14  ;;  %v6747_v24 = vrot.slane %v6306_v10, %v11410_v42 }
 0x385   : > { %v6487_v43 = vcombine.high %v6486_v51, %v6486_v51  ;;  %v7074_v49 = vrot.slane %v7060_v39, %v11410_v42  ;;  %v6789_v5 = vcombine.high %v6788_v17, %v6788_v17  ;;  %v6754_v63 = vrot.slane %v6740_v29, %v11410_v42 }
 0x386   : > { %v7110_v32 = vcombine.low %v6521_v52, %v6529_v14  ;;  %v7111_v53 = vcombine.low %v6537_v40, %v11460_v22  ;;  %v11466_v28 = vcombine.low %v6512_v57, %v6520_v61  ;;  %v6755_v55 = vcombine.high %v6747_v24, %v6747_v24 }
 0x387   : > { %v7075_v15 = vcombine.low %v7067_v35, %v7074_v49  ;;  %v6245_v19 = vadd.f32 %v11407_v7, %v6244_v1  ;;  %v6317_v25 = vadd.f32 %v7912_v4, %v11407_v7  ;;  %v7076_v23 = vcombine.low %v6486_v51, %v6487_v43 }
 0x388   : > { %v7118_v60 = vrot.slane %v7110_v32, %v11410_v42  ;;  %v7125_v58 = vrot.slane %v7111_v53, %v11410_v42  ;;  %v7348_v12 = vcombine.low %v6788_v17, %v6789_v5  ;;  %v7314_v9 = vcombine.low %v6755_v55, %v6754_v63 }
 0x389   : > { %7588 = vst.msk [vmem:[%s11430_s9 + $0x18] sm:$0xff] %vm7584_vm2, %v7075_v15  ;;  %v6309_v48 = vadd.f32 %v11407_v7, %v6308_v62  ;;  %v6488_v21 = vcombine.high %v6245_v19, %v6245_v19  ;;  %v6495_v41 = vrot.slane %v6245_v19, %v11410_v42  ;;  %v6790_v38 = vcombine.high %v6317_v25, %v6317_v25 }
 0x38a   : > { %v7126_v26 = vcombine.low %v7118_v60, %v7125_v58  ;;  %v7108_v31 = vrot.slane %v11466_v28, %v11410_v42  ;;  %v6797_v11 = vrot.slane %v6317_v25, %v11410_v42  ;;  %v6756_v16 = vcombine.high %v6754_v63, %v6754_v63 }
 0x38b   : > { %v6757_v6 = vcombine.high %v6309_v48, %v6309_v48  ;;  %v6502_v44 = vrot.slane %v6488_v21, %v11410_v42  ;;  %v6503_v47 = vcombine.high %v6495_v41, %v6495_v41  ;;  %v6804_v30 = vrot.slane %v6790_v38, %v11410_v42 }
 0x38c   : > { %7591 = vst.msk [vmem:[%s11430_s9 + $0x30] sm:$0xff] %vm7584_vm2, %v7126_v26  ;;  %v6764_v56 = vrot.slane %v6309_v48, %v11410_v42  ;;  %v7084_v36 = vrot.slane %v7076_v23, %v11410_v42  ;;  %v7356_v2 = vrot.slane %v7348_v12, %v11410_v42  ;;  %v6805_v20 = vcombine.high %v6797_v11, %v6797_v11 }
 0x38d   : > { %v6771_v0 = vrot.slane %v6757_v6, %v11410_v42  ;;  %v7322_v18 = vrot.slane %v7314_v9, %v11410_v42  ;;  %v6504_v45 = vcombine.high %v6502_v44, %v6502_v44  ;;  %v7077_v27 = vcombine.low %v6495_v41, %v6503_v47 }
 0x38e   : > { %v6772_v33 = vcombine.high %v6764_v56, %v6764_v56  ;;  %v7349_v10 = vcombine.low %v6797_v11, %v6805_v20  ;;  %v7315_v4 = vcombine.low %v6756_v16, %v6764_v56  ;;  %v6806_v54 = vcombine.high %v6804_v30, %v6804_v30 }
 0x38f   : > { %v6773_v1 = vcombine.high %v6771_v0, %v6771_v0  ;;  %v7091_v13 = vrot.slane %v7077_v27, %v11410_v42  ;;  %v7093_v62 = vcombine.low %v6502_v44, %v6504_v45  ;;  %v6538_v49 = vcombine.high %v11460_v22, %v11460_v22 }
 0x390   : > { %v7915_v3 = vpop.f32.mrb[4].mxu1  ;;  %v7331_v61 = vcombine.low %v6772_v33, %v6771_v0  ;;  %v7363_v51 = vrot.slane %v7349_v10, %v11410_v42  ;;  %v7329_v39 = vrot.slane %v7315_v4, %v11410_v42  ;;  %v11507_v55 = vcombine.low %v6804_v30, %v6806_v54 }
 0x391   : > { %v7899_v59 = vpop.f32.mrb[8].mxu0  ;;  %v6321_v46 = vpop.f32.mrb[5].mxu1  ;;  %v7332_v17 = vcombine.low %v6773_v1, %v6781_v8  ;;  %v7092_v52 = vcombine.low %v7084_v36, %v7091_v13  ;;  %v7101_v40 = vrot.slane %v7093_v62, %v11410_v42  ;;  %v6330_v8 = vadd.f32 %v7915_v3, %v11407_v7 }
 0x392   : > { %v6257_v57 = vpop.f32.mrb[9].mxu0  ;;  %v6266_v50 = vadd.f32 %v7899_v59, %v11407_v7  ;;  %v7916_v14 = vpop.f32.mrb[6].mxu1  ;;  %v7339_v43 = vrot.slane %v7331_v61, %v11410_v42  ;;  %v7364_v5 = vcombine.low %v7356_v2, %v7363_v51  ;;  %v7330_v24 = vcombine.low %v7322_v18, %v7329_v39 }
 0x393   : > { %v7900_v37 = vpop.f32.mrb[10].mxu0  ;;  %v11494_v35 = vpop.f32.mrb[7].mxu1  ;;  %v7346_v32 = vrot.slane %v7332_v17, %v11410_v42  ;;  %v7109_v63 = vcombine.low %v7101_v40, %v7108_v31  ;;  %7589 = vst.msk [vmem:[%s11430_s9 + $0x20] sm:$0xff] %vm7584_vm2, %v7092_v52  ;;  %v6258_v15 = vadd.f32 %v11407_v7, %v6257_v57  ;;  %v6841_v12 = vcombine.high %v6330_v8, %v6330_v8 }
 0x394   : > { %v6260_v34 = vpop.f32.mrb[11].mxu0  ;;  %v6572_v29 = vcombine.high %v6266_v50, %v6266_v50  ;;  %v6579_v53 = vrot.slane %v6266_v50, %v11410_v42  ;;  %7605 = vst.msk [vmem:[%s11430_s9 + $0xa0] sm:$0xff] %vm7584_vm2, %v7364_v5  ;;  %7603 = vst.msk [vmem:[%s11430_s9 + $0x90] sm:$0xff] %vm7584_vm2, %v7330_v24  ;;  %v11514_v58 = vadd.f32 %v7900_v37, %v11407_v7 }
 0x395   : > { %v7347_v22 = vcombine.low %v7339_v43, %v7346_v32  ;;  %7590 = vst.msk [vmem:[%s11430_s9 + $0x28] sm:$0xff] %vm7584_vm2, %v7109_v63  ;;  %v6539_v25 = vcombine.high %v6258_v15, %v6258_v15  ;;  %v6546_v23 = vrot.slane %v6258_v15, %v11410_v42  ;;  %v11522_v48 = vrot.slane %v6330_v8, %v11410_v42 }
 0x396   : > { %v6586_v28 = vrot.slane %v6572_v29, %v11410_v42  ;;  %v6587_v60 = vcombine.high %v6579_v53, %v6579_v53  ;;  %v6322_v26 = vadd.f32 %v11407_v7, %v6321_v46  ;;  %v7373_v11 = vrot.slane %v11507_v55, %v11410_v42 }
 0x397   : > { %7604 = vst.msk [vmem:[%s11430_s9 + $0x98] sm:$0xff] %vm7584_vm2, %v7347_v22  ;;  %v6553_v41 = vrot.slane %v6539_v25, %v11410_v42  ;;  %v6554_v38 = vcombine.high %v6546_v23, %v6546_v23  ;;  %v7127_v31 = vcombine.low %v6538_v49, %v6546_v23  ;;  %v6855_v16 = vrot.slane %v6841_v12, %v11410_v42 }
 0x398   : > { %v6588_v19 = vcombine.high %v6586_v28, %v6586_v28  ;;  %v7161_v9 = vcombine.low %v6579_v53, %v6587_v60  ;;  %v6856_v6 = vcombine.high %v11522_v48, %v11522_v48  ;;  %v6589_v36 = vcombine.high %v11514_v58, %v11514_v58 }
 0x399   : > { %v7128_v56 = vcombine.low %v6554_v38, %v6553_v41  ;;  %v6807_v0 = vcombine.high %v6322_v26, %v6322_v26  ;;  %v6814_v59 = vrot.slane %v6322_v26, %v11410_v42  ;;  %v6261_v18 = vadd.f32 %v11407_v7, %v6260_v34 }
 0x39a   : > { %v7162_v21 = vcombine.low %v6586_v28, %v6588_v19  ;;  %v11531_v44 = vpop.f32.mrb[12].mxu0  ;;  %v7169_v47 = vrot.slane %v7161_v9, %v11410_v42  ;;  %v11539_v20 = vcombine.low %v6856_v6, %v6855_v16  ;;  %v7135_v33 = vrot.slane %v7127_v31, %v11410_v42  ;;  %v7919_v61 = vpop.f32.mrb[8].mxu1 }
 0x39b   : > { %v11537_v2 = vpop.f32.mrb[13].mxu0  ;;  %v7142_v57 = vrot.slane %v7128_v56, %v11410_v42  ;;  %v6333_v3 = vadd.f32 %v7916_v14, %v11407_v7  ;;  %v11552_v1 = vrot.slane %v11514_v58, %v11410_v42  ;;  %v6821_v4 = vrot.slane %v6807_v0, %v11410_v42  ;;  %v6337_v17 = vpop.f32.mrb[9].mxu1 }
 0x39c   : > { %v7176_v30 = vrot.slane %v7162_v21, %v11410_v42  ;;  %v11543_v45 = vpop.f32.mrb[14].mxu0  ;;  %v6822_v50 = vcombine.high %v6814_v59, %v6814_v59  ;;  %v6555_v37 = vcombine.high %v6261_v18, %v6261_v18  ;;  %v7414_v13 = vrot.slane %v11539_v20, %v11410_v42  ;;  %v7920_v49 = vpop.f32.mrb[10].mxu1 }
 0x39d   : > { %v11548_v10 = vpop.f32.mrb[15].mxu0  ;;  %v7143_v46 = vcombine.low %v7135_v33, %v7142_v57  ;;  %v6562_v62 = vrot.slane %v6261_v18, %v11410_v42  ;;  %v6857_v54 = vcombine.high %v6333_v3, %v6333_v3  ;;  %v6823_v34 = vcombine.high %v6821_v4, %v6821_v4  ;;  %v6340_v63 = vpop.f32.mrb[11].mxu1 }
 0x39e   : > { %v7177_v27 = vcombine.low %v7169_v47, %v7176_v30  ;;  %v7366_v14 = vcombine.low %v6814_v59, %v6822_v50  ;;  %v6569_v51 = vrot.slane %v6555_v37, %v11410_v42  ;;  %v6864_v39 = vrot.slane %v6333_v3, %v11410_v42 }
 0x39f   : > { %7592 = vst.msk [vmem:[%s11430_s9 + $0x38] sm:$0xff] %vm7584_vm2, %v7143_v46  ;;  %v6570_v29 = vcombine.high %v6562_v62, %v6562_v62  ;;  %v6871_v52 = vrot.slane %v6857_v54, %v11410_v42  ;;  %v6325_v40 = vadd.f32 %v11407_v7, %v11494_v35  ;;  %v6346_v43 = vadd.f32 %v7919_v61, %v11407_v7 }
 0x3a0   : > { %7594 = vst.msk [vmem:[%s11430_s9 + $0x48] sm:$0xff] %vm7584_vm2, %v7177_v27  ;;  %v7380_v5 = vrot.slane %v7366_v14, %v11410_v42  ;;  %v6571_v24 = vcombine.high %v6569_v51, %v6569_v51  ;;  %v6872_v32 = vcombine.high %v6864_v39, %v6864_v39  ;;  %v6338_v53 = vadd.f32 %v11407_v7, %v6337_v17 }
 0x3a1   : > { %v7144_v28 = vcombine.low %v6562_v62, %v6570_v29  ;;  %v6873_v15 = vcombine.high %v6871_v52, %v6871_v52  ;;  %v6824_v8 = vcombine.high %v6325_v40, %v6325_v40  ;;  %v6831_v55 = vrot.slane %v6325_v40, %v11410_v42 }
 0x3a2   : > { %v7381_v22 = vcombine.low %v7373_v11, %v7380_v5  ;;  %v7145_v60 = vcombine.low %v6569_v51, %v6571_v24  ;;  %v7416_v19 = vcombine.low %v6864_v39, %v6872_v32  ;;  %v6908_v35 = vcombine.high %v6346_v43, %v6346_v43 }
 0x3a3   : > { %v7152_v25 = vrot.slane %v7144_v28, %v11410_v42  ;;  %v7417_v23 = vcombine.low %v6871_v52, %v6873_v15  ;;  %v6838_v12 = vrot.slane %v6824_v8, %v11410_v42  ;;  %v6839_v9 = vcombine.high %v6831_v55, %v6831_v55 }
 0x3a4   : > { %7606 = vst.msk [vmem:[%s11430_s9 + $0xa8] sm:$0xff] %vm7584_vm2, %v7381_v22  ;;  %v7159_v26 = vrot.slane %v7145_v60, %v11410_v42  ;;  %v7424_v21 = vrot.slane %v7416_v19, %v11410_v42  ;;  %v7382_v41 = vcombine.low %v6823_v34, %v6831_v55  ;;  %v6915_v38 = vrot.slane %v6346_v43, %v11410_v42 }
 0x3a5   : > { %v7431_v31 = vrot.slane %v7417_v23, %v11410_v42  ;;  %v6840_v11 = vcombine.high %v6838_v12, %v6838_v12  ;;  %v7383_v16 = vcombine.low %v6839_v9, %v6838_v12  ;;  %v6922_v6 = vrot.slane %v6908_v35, %v11410_v42 }
 0x3a6   : > { %v7160_v47 = vcombine.low %v7152_v25, %v7159_v26  ;;  %v7390_v30 = vrot.slane %v7382_v41, %v11410_v42  ;;  %v6923_v56 = vcombine.high %v6915_v38, %v6915_v38  ;;  %v6874_v20 = vcombine.high %v6338_v53, %v6338_v53 }
 0x3a7   : > { %v7432_v0 = vcombine.low %v7424_v21, %v7431_v31  ;;  %v7397_v59 = vrot.slane %v7383_v16, %v11410_v42  ;;  %v7399_v18 = vcombine.low %v6840_v11, %v11522_v48  ;;  %v6881_v27 = vrot.slane %v6338_v53, %v11410_v42 }
 0x3a8   : > { %7593 = vst.msk [vmem:[%s11430_s9 + $0x40] sm:$0xff] %vm7584_vm2, %v7160_v47  ;;  %v7467_v33 = vcombine.low %v6923_v56, %v6922_v6  ;;  %v6888_v57 = vrot.slane %v6874_v20, %v11410_v42  ;;  %v11588_v3 = vadd.f32 %v7920_v49, %v11407_v7  ;;  %v6924_v4 = vcombine.high %v6922_v6, %v6922_v6 }
 0x3a9   : > { %7609 = vst.msk [vmem:[%s11430_s9 + $0xc0] sm:$0xff] %vm7584_vm2, %v7432_v0  ;;  %v7398_v50 = vcombine.low %v7390_v30, %v7397_v59  ;;  %v7407_v37 = vrot.slane %v7399_v18, %v11410_v42  ;;  %v6889_v46 = vcombine.high %v6881_v27, %v6881_v27  ;;  %v6282_v48 = vadd.f32 %v11531_v44, %v11407_v7 }
 0x3aa   : > { %v6890_v62 = vcombine.high %v6888_v57, %v6888_v57  ;;  %v6932_v54 = vrot.slane %v11588_v3, %v11410_v42  ;;  %v6603_v51 = vrot.slane %v6589_v36, %v11410_v42  ;;  %v6341_v29 = vadd.f32 %v11407_v7, %v6340_v63 }
 0x3ab   : > { %v7415_v61 = vcombine.low %v7407_v37, %v7414_v13  ;;  %7607 = vst.msk [vmem:[%s11430_s9 + $0xb0] sm:$0xff] %vm7584_vm2, %v7398_v50  ;;  %v7433_v34 = vcombine.low %v6881_v27, %v6889_v46  ;;  %v6639_v14 = vcombine.high %v6282_v48, %v6282_v48  ;;  %v6604_v44 = vcombine.high %v11552_v1, %v11552_v1 }
 0x3ac   : > { %v7434_v39 = vcombine.low %v6888_v57, %v6890_v62  ;;  %v7468_v17 = vcombine.low %v6924_v4, %v6932_v54  ;;  %v7475_v13 = vrot.slane %v7467_v33, %v11410_v42  ;;  %v6274_v40 = vadd.f32 %v11407_v7, %v11537_v2 }
 0x3ad   : > { %7608 = vst.msk [vmem:[%s11430_s9 + $0xb8] sm:$0xff] %vm7584_vm2, %v7415_v61  ;;  %v6653_v52 = vrot.slane %v6639_v14, %v11410_v42  ;;  %v7441_v58 = vrot.slane %v7433_v34, %v11410_v42  ;;  %v6891_v49 = vcombine.high %v6341_v29, %v6341_v29  ;;  %v6646_v1 = vrot.slane %v6282_v48, %v11410_v42 }
 0x3ae   : > { %v7448_v36 = vrot.slane %v7434_v39, %v11410_v42  ;;  %v7482_v43 = vrot.slane %v7468_v17, %v11410_v42  ;;  %v6898_v5 = vrot.slane %v6341_v29, %v11410_v42  ;;  %v7178_v28 = vcombine.low %v6604_v44, %v6603_v51 }
 0x3af   : > { %v6655_v53 = vcombine.high %v6653_v52, %v6653_v52  ;;  %v6905_v63 = vrot.slane %v6891_v49, %v11410_v42  ;;  %v6606_v8 = vcombine.high %v6274_v40, %v6274_v40  ;;  %v6605_v55 = vcombine.high %v6603_v51, %v6603_v51 }
 0x3b0   : > { %v7449_v24 = vcombine.low %v7441_v58, %v7448_v36  ;;  %v7483_v32 = vcombine.low %v7475_v13, %v7482_v43  ;;  %v6906_v15 = vcombine.high %v6898_v5, %v6898_v5  ;;  %v6613_v22 = vrot.slane %v6274_v40, %v11410_v42 }
 0x3b1   : > { %v6907_v2 = vcombine.high %v6905_v63, %v6905_v63  ;;  %v6285_v60 = vadd.f32 %v11543_v45, %v11407_v7  ;;  %v6654_v19 = vcombine.high %v6646_v1, %v6646_v1  ;;  %v6620_v25 = vrot.slane %v6606_v8, %v11410_v42 }
 0x3b2   : > { %7610 = vst.msk [vmem:[%s11430_s9 + $0xc8] sm:$0xff] %vm7584_vm2, %v7449_v24  ;;  %7612 = vst.msk [vmem:[%s11430_s9 + $0xd8] sm:$0xff] %vm7584_vm2, %v7483_v32  ;;  %v7450_v35 = vcombine.low %v6906_v15, %v6905_v63  ;;  %v6277_v23 = vadd.f32 %v11407_v7, %v11548_v10  ;;  %v7229_v12 = vcombine.low %v6653_v52, %v6655_v53 }
 0x3b3   : > { %v7451_v9 = vcombine.low %v6907_v2, %v6915_v38  ;;  %v6621_v26 = vcombine.high %v6613_v22, %v6613_v22  ;;  %v7179_v21 = vcombine.low %v6605_v55, %v6613_v22  ;;  %v7186_v41 = vrot.slane %v7178_v28, %v11410_v42 }
 0x3b4   : > { %v6663_v31 = vrot.slane %v6285_v60, %v11410_v42  ;;  %v6622_v11 = vcombine.high %v6620_v25, %v6620_v25  ;;  %v6623_v16 = vcombine.high %v6277_v23, %v6277_v23  ;;  %v7458_v45 = vrot.slane %v7450_v35, %v11410_v42 }
 0x3b5   : > { %v7465_v6 = vrot.slane %v7451_v9, %v11410_v42  ;;  %v7193_v47 = vrot.slane %v7179_v21, %v11410_v42  ;;  %v7195_v30 = vcombine.low %v6621_v26, %v6620_v25  ;;  %v6630_v38 = vrot.slane %v6277_v23, %v11410_v42 }
 0x3b6   : > { %v6671_v10 = vcombine.high %v6663_v31, %v6663_v31  ;;  %v6637_v56 = vrot.slane %v6623_v16, %v11410_v42  ;;  %v7213_v20 = vcombine.low %v6646_v1, %v6654_v19  ;;  %v7237_v0 = vrot.slane %v7229_v12, %v11410_v42 }
 0x3b7   : > { %v7466_v59 = vcombine.low %v7458_v45, %v7465_v6  ;;  %v7194_v18 = vcombine.low %v7186_v41, %v7193_v47  ;;  %v7203_v27 = vrot.slane %v7195_v30, %v11410_v42  ;;  %v7196_v4 = vcombine.low %v6622_v11, %v6630_v38 }
 0x3b8   : > { %v7230_v33 = vcombine.low %v6663_v31, %v6671_v10  ;;  %v6638_v57 = vcombine.high %v6637_v56, %v6637_v56  ;;  %v7227_v48 = vrot.slane %v7213_v20, %v11410_v42  ;;  %v6925_v14 = vcombine.high %v11588_v3, %v11588_v3 }
 0x3b9   : > { %7611 = vst.msk [vmem:[%s11430_s9 + $0xd0] sm:$0xff] %vm7584_vm2, %v7466_v59  ;;  %7595 = vst.msk [vmem:[%s11430_s9 + $0x50] sm:$0xff] %vm7584_vm2, %v7194_v18  ;;  %v7210_v37 = vrot.slane %v7196_v4, %v11410_v42  ;;  %v6656_v51 = vcombine.high %v6285_v60, %v6285_v60 }
 0x3ba   : > { %v7244_v50 = vrot.slane %v7230_v33, %v11410_v42  ;;  %v7212_v46 = vcombine.low %v6637_v56, %v6638_v57  ;;  %v6939_v39 = vrot.slane %v6925_v14, %v11410_v42 }
 0x3bb   : > { %v7211_v54 = vcombine.low %v7203_v27, %v7210_v37  ;;  %v6670_v17 = vrot.slane %v6656_v51, %v11410_v42 }
 0x3bc   : > { %v7245_v62 = vcombine.low %v7237_v0, %v7244_v50  ;;  %v7220_v61 = vrot.slane %v7212_v46, %v11410_v42  ;;  %v6940_v52 = vcombine.high %v6939_v39, %v6939_v39 }
 0x3bd   : > { %7596 = vst.msk [vmem:[%s11430_s9 + $0x58] sm:$0xff] %vm7584_vm2, %v7211_v54  ;;  %v6672_v36 = vcombine.high %v6670_v17, %v6670_v17 }
 0x3be   : > { %7598 = vst.msk [vmem:[%s11430_s9 + $0x68] sm:$0xff] %vm7584_vm2, %v7245_v62  ;;  %v7228_v34 = vcombine.low %v7220_v61, %v7227_v48  ;;  %v7484_v54 = vcombine.low %v6939_v39, %v6940_v52 }
 0x3c0   : > { %7597 = vst.msk [vmem:[%s11430_s9 + $0x60] sm:$0xff] %vm7584_vm2, %v7228_v34 }
 0x3d3   : > { %v7907_v29 = vpop.f32.mrb[16].mxu0 }
 0x3d4   : > { %v6298_v44 = vadd.f32 %v7907_v29, %v11407_v7  ;;  %v6289_v13 = vpop.f32.mrb[17].mxu0 }
 0x3d5   : > { %v6290_v40 = vadd.f32 %v11407_v7, %v6289_v13  ;;  %v7908_v58 = vpop.f32.mrb[18].mxu0 }
 0x3d6   : > { %v6706_v43 = vcombine.high %v6298_v44, %v6298_v44  ;;  %v6713_v49 = vrot.slane %v6298_v44, %v11410_v42  ;;  %v6301_v1 = vadd.f32 %v7908_v58, %v11407_v7  ;;  %v6292_v3 = vpop.f32.mrb[19].mxu0  ;;  %v7923_v5 = vpop.f32.mrb[12].mxu1 }
 0x3d7   : > { %v6673_v24 = vcombine.high %v6290_v40, %v6290_v40  ;;  %v6680_v32 = vrot.slane %v6290_v40, %v11410_v42  ;;  %v6293_v53 = vadd.f32 %v11407_v7, %v6292_v3  ;;  %v6362_v63 = vadd.f32 %v7923_v5, %v11407_v7  ;;  %v6353_v28 = vpop.f32.mrb[13].mxu1 }
 0x3d8   : > { %v6720_v15 = vrot.slane %v6706_v43, %v11410_v42  ;;  %v6721_v8 = vcombine.high %v6713_v49, %v6713_v49  ;;  %v6723_v2 = vcombine.high %v6301_v1, %v6301_v1  ;;  %v6730_v55 = vrot.slane %v6301_v1, %v11410_v42  ;;  %v7924_v22 = vpop.f32.mrb[14].mxu1 }
 0x3d9   : > { %v6687_v60 = vrot.slane %v6673_v24, %v11410_v42  ;;  %v6688_v19 = vcombine.high %v6680_v32, %v6680_v32  ;;  %v7246_v35 = vcombine.low %v6672_v36, %v6680_v32  ;;  %v6690_v25 = vcombine.high %v6293_v53, %v6293_v53  ;;  %v6356_v23 = vpop.f32.mrb[15].mxu1 }
 0x3da   : > { %v6722_v12 = vcombine.high %v6720_v15, %v6720_v15  ;;  %v7280_v9 = vcombine.low %v6713_v49, %v6721_v8  ;;  %v6737_v26 = vrot.slane %v6723_v2, %v11410_v42  ;;  %v6738_v21 = vcombine.high %v6730_v55, %v6730_v55 }
 0x3db   : > { %v7247_v41 = vcombine.low %v6688_v19, %v6687_v60  ;;  %v7254_v31 = vrot.slane %v7246_v35, %v11410_v42  ;;  %v6689_v11 = vcombine.high %v6687_v60, %v6687_v60  ;;  %v6697_v16 = vrot.slane %v6293_v53, %v11410_v42 }
 0x3dc   : > { %v7281_v45 = vcombine.low %v6720_v15, %v6722_v12  ;;  %v7288_v6 = vrot.slane %v7280_v9, %v11410_v42  ;;  %v6739_v47 = vcombine.high %v6737_v26, %v6737_v26  ;;  %v7297_v30 = vcombine.low %v6730_v55, %v6738_v21 }
 0x3dd   : > { %v7261_v10 = vrot.slane %v7247_v41, %v11410_v42  ;;  %v6704_v38 = vrot.slane %v6690_v25, %v11410_v42  ;;  %v6705_v56 = vcombine.high %v6697_v16, %v6697_v16  ;;  %v7263_v20 = vcombine.low %v6689_v11, %v6697_v16 }
 0x3de   : > { %v7295_v0 = vrot.slane %v7281_v45, %v11410_v42  ;;  %v7298_v59 = vcombine.low %v6737_v26, %v6739_v47  ;;  %v7305_v18 = vrot.slane %v7297_v30, %v11410_v42  ;;  %v6975_v27 = vcombine.high %v6362_v63, %v6362_v63 }
 0x3df   : > { %v7262_v33 = vcombine.low %v7254_v31, %v7261_v10  ;;  %v7264_v57 = vcombine.low %v6705_v56, %v6704_v38  ;;  %v7271_v4 = vrot.slane %v7263_v20, %v11410_v42  ;;  %v6982_v50 = vrot.slane %v6362_v63, %v11410_v42 }
 0x3e0   : > { %v7296_v37 = vcombine.low %v7288_v6, %v7295_v0  ;;  %v7312_v46 = vrot.slane %v7298_v59, %v11410_v42  ;;  %v6989_v48 = vrot.slane %v6975_v27, %v11410_v42  ;;  %v6354_v62 = vadd.f32 %v11407_v7, %v6353_v28 }
 0x3e1   : > { %7599 = vst.msk [vmem:[%s11430_s9 + $0x70] sm:$0xff] %vm7584_vm2, %v7262_v33  ;;  %v7278_v61 = vrot.slane %v7264_v57, %v11410_v42  ;;  %v6365_v34 = vadd.f32 %v7924_v22, %v11407_v7  ;;  %v6357_v14 = vadd.f32 %v11407_v7, %v6356_v23  ;;  %v6990_v40 = vcombine.high %v6982_v50, %v6982_v50 }
 0x3e2   : > { %7601 = vst.msk [vmem:[%s11430_s9 + $0x80] sm:$0xff] %vm7584_vm2, %v7296_v37  ;;  %v7313_v51 = vcombine.low %v7305_v18, %v7312_v46  ;;  %v6941_v17 = vcombine.high %v6354_v62, %v6354_v62  ;;  %v6948_v29 = vrot.slane %v6354_v62, %v11410_v42  ;;  %v6991_v44 = vcombine.high %v6989_v48, %v6989_v48 }
 0x3e3   : > { %v7279_v13 = vcombine.low %v7271_v4, %v7278_v61  ;;  %v6992_v58 = vcombine.high %v6365_v34, %v6365_v34  ;;  %v6999_v39 = vrot.slane %v6365_v34, %v11410_v42  ;;  %v6958_v43 = vcombine.high %v6357_v14, %v6357_v14 }
 0x3e4   : > { %7602 = vst.msk [vmem:[%s11430_s9 + $0x88] sm:$0xff] %vm7584_vm2, %v7313_v51  ;;  %v6955_v52 = vrot.slane %v6941_v17, %v11410_v42  ;;  %v6956_v36 = vcombine.high %v6948_v29, %v6948_v29  ;;  %v6965_v7 = vrot.slane %v6357_v14, %v11410_v42  ;;  %v7492_v63 = vrot.slane %v7484_v54, %v11410_v42 }
 0x3e5   : > { %7600 = vst.msk [vmem:[%s11430_s9 + $0x78] sm:$0xff] %vm7584_vm2, %v7279_v13  ;;  %v7006_v49 = vrot.slane %v6992_v58, %v11410_v42  ;;  %v7007_v1 = vcombine.high %v6999_v39, %v6999_v39  ;;  %v7535_v3 = vcombine.low %v6991_v44, %v6999_v39  ;;  %v6972_v32 = vrot.slane %v6958_v43, %v11410_v42 }
 0x3e6   : > { %v6957_v5 = vcombine.high %v6955_v52, %v6955_v52  ;;  %v7485_v24 = vcombine.low %v6948_v29, %v6956_v36  ;;  %v6973_v53 = vcombine.high %v6965_v7, %v6965_v7  ;;  %v7519_v28 = vcombine.low %v6990_v40, %v6989_v48 }
 0x3e7   : > { %v7536_v15 = vcombine.low %v7007_v1, %v7006_v49  ;;  %v7543_v8 = vrot.slane %v7535_v3, %v11410_v42  ;;  %v6974_v22 = vcombine.high %v6972_v32, %v6972_v32 }
 0x3e8   : > { %v7499_v2 = vrot.slane %v7485_v24, %v11410_v42  ;;  %v7501_v55 = vcombine.low %v6955_v52, %v6957_v5  ;;  %v7502_v60 = vcombine.low %v6965_v7, %v6973_v53  ;;  %v7533_v26 = vrot.slane %v7519_v28, %v11410_v42 }
 0x3e9   : > { %v7550_v19 = vrot.slane %v7536_v15, %v11410_v42  ;;  %v7518_v12 = vcombine.low %v6974_v22, %v6982_v50 }
 0x3ea   : > { %v7500_v35 = vcombine.low %v7492_v63, %v7499_v2  ;;  %v7509_v25 = vrot.slane %v7501_v55, %v11410_v42  ;;  %v7516_v23 = vrot.slane %v7502_v60, %v11410_v42 }
 0x3eb   : > { %v7551_v9 = vcombine.low %v7543_v8, %v7550_v19  ;;  %v7526_v41 = vrot.slane %v7518_v12, %v11410_v42 }
 0x3ec   : > { %7613 = vst.msk [vmem:[%s11430_s9 + $0xe0] sm:$0xff] %vm7584_vm2, %v7500_v35  ;;  %v7517_v21 = vcombine.low %v7509_v25, %v7516_v23 }
 0x3ed   : > { %7616 = vst.msk [vmem:[%s11430_s9 + $0xf8] sm:$0xff] %vm7584_vm2, %v7551_v9  ;;  %v7534_v31 = vcombine.low %v7526_v41, %v7533_v26 }
 0x3ee   : > { %7614 = vst.msk [vmem:[%s11430_s9 + $0xe8] sm:$0xff] %vm7584_vm2, %v7517_v21 }
 0x3ef   : > { %7615 = vst.msk [vmem:[%s11430_s9 + $0xf0] sm:$0xff] %vm7584_vm2, %v7534_v31 }
 0x3f0 PF: > { %s13_s12 = sadd.s32 1, %s7963_s12  }
 0x3f1   : > { %p10_p4 = scmp.ge.s32.totalorder %s13_s12, 4  }
 0x3f3   :  { %12 = sbr.rel (!%p10_p4) target bundleno = 1 (0x1), region = 64 }

</bundles_post_ra>
